<compile_context>
chip_gen: v5e
topology: v5e:2x2
jax: 0.10.0
libtpu: 0.0.40
codegen_flags: <defaults>
</compile_context>

<pallas_src>
import functools

import jax
import jax.numpy as jnp
from jax.experimental import pallas as pl
from jax.experimental.pallas import tpu as pltpu

IN_DIM = 32 * 32 * 3   # 3072
H1 = 1200
H2 = 600
OUT_DIM = 10


def _round_up(v, m):
    return ((v + m - 1) // m) * m


# -----------------------------------------------------------------------------
# Fused kernel: grid = (M blocks ["parallel"], K1 chunks ["arbitrary"])
# -----------------------------------------------------------------------------
def _fused_mlp_kernel(x_ref, w1_ref, b1_ref, w2_ref, b2_ref, w3_ref, b3_ref,
                      o_ref, acc_ref):
    k = pl.program_id(1)

    @pl.when(k == 0)
    def _():
        acc_ref[...] = jnp.zeros_like(acc_ref)

    # Layer-1 partial product: (tm, tk) @ (tk, 1200) accumulated in f32 VMEM.
    acc_ref[...] += jnp.dot(
        x_ref[...], w1_ref[...], preferred_element_type=jnp.float32
    )

    # After the last K chunk, finish layer 1 and run layers 2 & 3 in VMEM.
    @pl.when(k == pl.num_programs(1) - 1)
    def _():
        h1 = jnp.maximum(acc_ref[...] + b1_ref[...], 0.0)
        # TODO(synk): Dropout2d(0.2) is identity in inference mode; training
        # mode stochastic masking (pltpu.prng_*) is not implemented here.
        h2 = jnp.maximum(
            jnp.dot(h1, w2_ref[...], preferred_element_type=jnp.float32)
            + b2_ref[...],
            0.0,
        )
        h3 = jnp.maximum(
            jnp.dot(h2, w3_ref[...], preferred_element_type=jnp.float32)
            + b3_ref[...],
            0.0,
        )
        o_ref[...] = h3.astype(o_ref.dtype)


@functools.partial(jax.jit, static_argnames=("tm", "tk"))
def net_forward(params, x_nchw, *, tm=8, tk=512):
    """Forward pass of `Net` (inference). params = (w1,b1,w2,b2,w3,b3).

    Weights are stored (in, out) -- transposed from PyTorch (out, in) -- and
    biases as (1, N). No weight padding/copies happen inside this function.
    """
    w1, b1, w2, b2, w3, b3 = params

    # Flatten exactly like torch's x.view(-1, 32*32*3) on an NCHW tensor.
    x = x_nchw.reshape(-1, IN_DIM)
    M = x.shape[0]

    assert IN_DIM % tk == 0, "tk must divide 3072 (e.g. 512 or 768)"

    # Only the tiny activation matrix is padded (rows -> multiple of tm).
    Mp = _round_up(max(M, tm), tm)
    if Mp != M:
        x = jnp.zeros((Mp, IN_DIM), x.dtype).at[:M].set(x)

    grid = (Mp // tm, IN_DIM // tk)

    out = pl.pallas_call(
        _fused_mlp_kernel,
        out_shape=jax.ShapeDtypeStruct((Mp, OUT_DIM), jnp.float32),
        grid_spec=pltpu.PrefetchScalarGridSpec(
            num_scalar_prefetch=0,
            grid=grid,
            in_specs=[
                pl.BlockSpec((tm, tk), lambda i, k: (i, k)),       # x chunk
                pl.BlockSpec((tk, H1), lambda i, k: (k, 0)),       # w1 chunk
                pl.BlockSpec((1, H1), lambda i, k: (0, 0)),        # b1
                pl.BlockSpec((H1, H2), lambda i, k: (0, 0)),       # w2 (resident)
                pl.BlockSpec((1, H2), lambda i, k: (0, 0)),        # b2
                pl.BlockSpec((H2, OUT_DIM), lambda i, k: (0, 0)),  # w3 (resident)
                pl.BlockSpec((1, OUT_DIM), lambda i, k: (0, 0)),   # b3
            ],
            out_specs=pl.BlockSpec((tm, OUT_DIM), lambda i, k: (i, 0)),
            scratch_shapes=[pltpu.VMEM((tm, H1), jnp.float32)],
        ),
        compiler_params=pltpu.CompilerParams(
            dimension_semantics=("parallel", "arbitrary"),
            vmem_limit_bytes=32 * 1024 * 1024,
        ),
    )(x, w1, b1, w2, b2, w3, b3)

    return out[:M]


# -----------------------------------------------------------------------------
# Parameter init: transpose / reshape ONCE here, outside the hot path.
# -----------------------------------------------------------------------------
def init_params(key):
    dims = [(IN_DIM, H1), (H1, H2), (H2, OUT_DIM)]
    params = []
    for fan_in, fan_out in dims:
        kw, kb, key = jax.random.split(key, 3)
        bound = 1.0 / jnp.sqrt(fan_in)
        # (in, out) layout == transpose of PyTorch's (out, in) weight.
        w = jax.random.uniform(kw, (fan_in, fan_out), jnp.float32, -bound, bound)
        b = jax.random.uniform(kb, (1, fan_out), jnp.float32, -bound, bound)
        params += [w, b]
    return tuple(params)


if __name__ == "__main__":
    key = jax.random.PRNGKey(0)
    pkey, xkey = jax.random.split(key)

    params = init_params(pkey)
    # CIFAR-shaped input, small batch: NCHW (2, 3, 32, 32)
    x = jax.random.normal(xkey, (2, 3, 32, 32), jnp.float32)

    out = jax.block_until_ready(net_forward(params, x))

    # Sanity check against a plain-JAX reference.
    def ref(params, x_nchw):
        w1, b1, w2, b2, w3, b3 = params
        h = x_nchw.reshape(-1, IN_DIM)
        h = jnp.maximum(h @ w1 + b1, 0.0)
        h = jnp.maximum(h @ w2 + b2, 0.0)
        h = jnp.maximum(h @ w3 + b3, 0.0)
        return h

    r = ref(params, x)
    assert out.shape == (2, OUT_DIM), out.shape
    assert jnp.allclose(out, r, atol=1e-3, rtol=1e-3), "mismatch vs reference"

    print("KERNEL_OK")
</pallas_src>

<mosaic_0001>
module attributes {stable_mosaic.version = 11 : i64} {
  func.func @_fused_mlp_kernel(%arg0: i32, %arg1: i32, %arg2: memref<8x512xf32, #tpu.memory_space<vmem>>, %arg3: memref<512x1200xf32, #tpu.memory_space<vmem>>, %arg4: memref<1x1200xf32, #tpu.memory_space<vmem>>, %arg5: memref<1200x600xf32, #tpu.memory_space<vmem>>, %arg6: memref<1x600xf32, #tpu.memory_space<vmem>>, %arg7: memref<600x10xf32, #tpu.memory_space<vmem>>, %arg8: memref<1x10xf32, #tpu.memory_space<vmem>>, %arg9: memref<8x10xf32, #tpu.memory_space<vmem>>, %arg10: memref<8x1200xf32, #tpu.memory_space<vmem>>) attributes {dimension_semantics = [#tpu.dimension_semantics<parallel>, #tpu.dimension_semantics<arbitrary>], iteration_bounds = array<i64: 1, 6>, scalar_prefetch = 0 : i64, scratch_operands = 1 : i64, tpu.core_type = #tpu.core_type<tc>, window_params = [{transform_indices = @transform_0, window_bounds = array<i64: 8, 512>}, {transform_indices = @transform_1, window_bounds = array<i64: 512, 1200>}, {pipeline_mode = #tpu.pipeline_mode<synchronous>, transform_indices = @transform_2, window_bounds = array<i64: 1, 1200>}, {pipeline_mode = #tpu.pipeline_mode<synchronous>, transform_indices = @transform_3, window_bounds = array<i64: 1200, 600>}, {pipeline_mode = #tpu.pipeline_mode<synchronous>, transform_indices = @transform_4, window_bounds = array<i64: 1, 600>}, {pipeline_mode = #tpu.pipeline_mode<synchronous>, transform_indices = @transform_5, window_bounds = array<i64: 600, 10>}, {pipeline_mode = #tpu.pipeline_mode<synchronous>, transform_indices = @transform_6, window_bounds = array<i64: 1, 10>}, {transform_indices = @transform_7, window_bounds = array<i64: 8, 10>}]} {
    %c0_i32 = arith.constant 0 : i32
    %0 = arith.cmpi eq, %arg1, %c0_i32 : i32
    %1 = arith.extui %0 : i1 to i32
    %c0_i32_0 = arith.constant 0 : i32
    %2 = arith.cmpi ne, %1, %c0_i32_0 : i32
    scf.if %2 {
      %cst_9 = arith.constant 0.000000e+00 : f32
      %12 = vector.broadcast %cst_9 : f32 to vector<8x1200xf32>
      %c0_10 = arith.constant 0 : index
      %c0_11 = arith.constant 0 : index
      %13 = vector.load %arg10[%c0_10, %c0_11] : memref<8x1200xf32, #tpu.memory_space<vmem>>, vector<8x1200xf32>
      tpu.vector_store %arg10[%c0_10, %c0_11], %12 {strides = array<i32>} : memref<8x1200xf32, #tpu.memory_space<vmem>>, vector<8x1200xf32>,
    } else {
    }
    %c0 = arith.constant 0 : index
    %c0_1 = arith.constant 0 : index
    %3 = vector.load %arg10[%c0, %c0_1] : memref<8x1200xf32, #tpu.memory_space<vmem>>, vector<8x1200xf32>
    %c0_2 = arith.constant 0 : index
    %c0_3 = arith.constant 0 : index
    %4 = vector.load %arg2[%c0_2, %c0_3] : memref<8x512xf32, #tpu.memory_space<vmem>>, vector<8x512xf32>
    %c0_4 = arith.constant 0 : index
    %c0_5 = arith.constant 0 : index
    %5 = vector.load %arg3[%c0_4, %c0_5] : memref<512x1200xf32, #tpu.memory_space<vmem>>, vector<512x1200xf32>
    %cst = arith.constant dense<0.000000e+00> : vector<8x1200xf32>
    %6 = tpu.matmul %4, %5, %cst {dimension_numbers = #tpu.dot_dimension_numbers<[1], [0], [0], [1], [0, 0, 1, 1], [], []>} : vector<8x512xf32>, vector<512x1200xf32>, vector<8x1200xf32> -> vector<8x1200xf32>
    %7 = arith.addf %3, %6 : vector<8x1200xf32>
    %c0_6 = arith.constant 0 : index
    %c0_7 = arith.constant 0 : index
    %8 = vector.load %arg10[%c0_6, %c0_7] : memref<8x1200xf32, #tpu.memory_space<vmem>>, vector<8x1200xf32>
    tpu.vector_store %arg10[%c0_6, %c0_7], %7 {strides = array<i32>} : memref<8x1200xf32, #tpu.memory_space<vmem>>, vector<8x1200xf32>,
    %c5_i32 = arith.constant 5 : i32
    %9 = arith.cmpi eq, %arg1, %c5_i32 : i32
    %10 = arith.extui %9 : i1 to i32
    %c0_i32_8 = arith.constant 0 : i32
    %11 = arith.cmpi ne, %10, %c0_i32_8 : i32
    scf.if %11 {
      %c0_9 = arith.constant 0 : index
      %c0_10 = arith.constant 0 : index
      %12 = vector.load %arg10[%c0_9, %c0_10] : memref<8x1200xf32, #tpu.memory_space<vmem>>, vector<8x1200xf32>
      %c0_11 = arith.constant 0 : index
      %c0_12 = arith.constant 0 : index
      %13 = vector.load %arg4[%c0_11, %c0_12] : memref<1x1200xf32, #tpu.memory_space<vmem>>, vector<1x1200xf32>
      %14 = vector.broadcast %13 : vector<1x1200xf32> to vector<8x1200xf32>
      %15 = arith.addf %12, %14 : vector<8x1200xf32>
      %cst_13 = arith.constant 0.000000e+00 : f32
      %16 = vector.broadcast %cst_13 : f32 to vector<8x1200xf32>
      %17 = arith.maximumf %15, %16 : vector<8x1200xf32>
      %c0_14 = arith.constant 0 : index
      %c0_15 = arith.constant 0 : index
      %18 = vector.load %arg5[%c0_14, %c0_15] : memref<1200x600xf32, #tpu.memory_space<vmem>>, vector<1200x600xf32>
      %cst_16 = arith.constant dense<0.000000e+00> : vector<8x600xf32>
      %19 = tpu.matmul %17, %18, %cst_16 {dimension_numbers = #tpu.dot_dimension_numbers<[1], [0], [0], [1], [0, 0, 1, 1], [], []>} : vector<8x1200xf32>, vector<1200x600xf32>, vector<8x600xf32> -> vector<8x600xf32>
      %c0_17 = arith.constant 0 : index
      %c0_18 = arith.constant 0 : index
      %20 = vector.load %arg6[%c0_17, %c0_18] : memref<1x600xf32, #tpu.memory_space<vmem>>, vector<1x600xf32>
      %21 = vector.broadcast %20 : vector<1x600xf32> to vector<8x600xf32>
      %22 = arith.addf %19, %21 : vector<8x600xf32>
      %cst_19 = arith.constant 0.000000e+00 : f32
      %23 = vector.broadcast %cst_19 : f32 to vector<8x600xf32>
      %24 = arith.maximumf %22, %23 : vector<8x600xf32>
      %c0_20 = arith.constant 0 : index
      %c0_21 = arith.constant 0 : index
      %25 = vector.load %arg7[%c0_20, %c0_21] : memref<600x10xf32, #tpu.memory_space<vmem>>, vector<600x10xf32>
      %cst_22 = arith.constant dense<0.000000e+00> : vector<8x10xf32>
      %26 = tpu.matmul %24, %25, %cst_22 {dimension_numbers = #tpu.dot_dimension_numbers<[1], [0], [0], [1], [0, 0, 1, 1], [], []>} : vector<8x600xf32>, vector<600x10xf32>, vector<8x10xf32> -> vector<8x10xf32>
      %c0_23 = arith.constant 0 : index
      %c0_24 = arith.constant 0 : index
      %27 = vector.load %arg8[%c0_23, %c0_24] : memref<1x10xf32, #tpu.memory_space<vmem>>, vector<1x10xf32>
      %28 = vector.broadcast %27 : vector<1x10xf32> to vector<8x10xf32>
      %29 = arith.addf %26, %28 : vector<8x10xf32>
      %cst_25 = arith.constant 0.000000e+00 : f32
      %30 = vector.broadcast %cst_25 : f32 to vector<8x10xf32>
      %31 = arith.maximumf %29, %30 : vector<8x10xf32>
      %c0_26 = arith.constant 0 : index
      %c0_27 = arith.constant 0 : index
      %32 = vector.load %arg9[%c0_26, %c0_27] : memref<8x10xf32, #tpu.memory_space<vmem>>, vector<8x10xf32>
      tpu.vector_store %arg9[%c0_26, %c0_27], %31 {strides = array<i32>} : memref<8x10xf32, #tpu.memory_space<vmem>>, vector<8x10xf32>,
    } else {
    }
    return
  }
  func.func @transform_0(%arg0: i32, %arg1: i32) -> (i32, i32) {
    %c0_i32 = arith.constant 0 : i32
    return %arg0, %arg1 : i32, i32
  }
  func.func @transform_1(%arg0: i32, %arg1: i32) -> (i32, i32) {
    %c0_i32 = arith.constant 0 : i32
    %c0_i32_0 = arith.constant 0 : i32
    return %arg1, %c0_i32 : i32, i32
  }
  func.func @transform_2(%arg0: i32, %arg1: i32) -> (i32, i32) {
    %c0_i32 = arith.constant 0 : i32
    %c0_i32_0 = arith.constant 0 : i32
    %c0_i32_1 = arith.constant 0 : i32
    return %c0_i32, %c0_i32_0 : i32, i32
  }
  func.func @transform_3(%arg0: i32, %arg1: i32) -> (i32, i32) {
    %c0_i32 = arith.constant 0 : i32
    %c0_i32_0 = arith.constant 0 : i32
    %c0_i32_1 = arith.constant 0 : i32
    return %c0_i32, %c0_i32_0 : i32, i32
  }
  func.func @transform_4(%arg0: i32, %arg1: i32) -> (i32, i32) {
    %c0_i32 = arith.constant 0 : i32
    %c0_i32_0 = arith.constant 0 : i32
    %c0_i32_1 = arith.constant 0 : i32
    return %c0_i32, %c0_i32_0 : i32, i32
  }
  func.func @transform_5(%arg0: i32, %arg1: i32) -> (i32, i32) {
    %c0_i32 = arith.constant 0 : i32
    %c0_i32_0 = arith.constant 0 : i32
    %c0_i32_1 = arith.constant 0 : i32
    return %c0_i32, %c0_i32_0 : i32, i32
  }
  func.func @transform_6(%arg0: i32, %arg1: i32) -> (i32, i32) {
    %c0_i32 = arith.constant 0 : i32
    %c0_i32_0 = arith.constant 0 : i32
    %c0_i32_1 = arith.constant 0 : i32
    return %c0_i32, %c0_i32_0 : i32, i32
  }
  func.func @transform_7(%arg0: i32, %arg1: i32) -> (i32, i32) {
    %c0_i32 = arith.constant 0 : i32
    %c0_i32_0 = arith.constant 0 : i32
    return %arg0, %c0_i32 : i32, i32
  }
}

</mosaic_0001>

<bundles_post_ra>
// kernel: net_forward.1
= control target key start
LH: loop header
LB: loop body
LE: loop exit
PB: predicated region body
PF: predicated region fallthrough
CT: control target
= control target key end

     0   :  { %s4030_s24 = smov 0   ;;  %s4032_s25 = smov 0   ;;  %s7416_s0 = inlined_call_operand.vmem [shape: f32[8,3072], index: 0, kind: input, shape index: {}]   ;;  %s7417_s1 = inlined_call_operand.vmem [shape: f32[3072,1200], index: 1, kind: input, shape index: {}]   ;;  %s7418_s2 = inlined_call_operand.vmem [shape: f32[1,1200], index: 2, kind: input, shape index: {}]   ;;  %s7419_s3 = inlined_call_operand.vmem [shape: f32[1200,600], index: 3, kind: input, shape index: {}]   ;;  %s7420_s4 = inlined_call_operand.vmem [shape: f32[1,600], index: 4, kind: input, shape index: {}]   ;;  %s7421_s5 = inlined_call_operand.vmem [shape: f32[600,10], index: 5, kind: input, shape index: {}]   ;;  %s7422_s6 = inlined_call_operand.vmem [shape: f32[1,10], index: 6, kind: input, shape index: {}]   ;;  %s7423_s7 = inlined_call_operand.vmem [shape: f32[8,10], index: 7, kind: output, shape index: {}]  }
   0x1   :  { %s4034_s26 = smov 0  }
   0x2 LB: > { %s26_s27 = sadd.s32 1, %s3983_s25  ;;  %p3914_p0 = scmp.ge.s32.totalorder %s3987_s26, 1  ;;  %s3987_s26 = sphi %s4034_s26, %s17_s26   ;;  %s3983_s25 = sphi %s4032_s25, %s7425_s25   ;;  %s3979_s24 = sphi %s4030_s24, %s7424_s24  }
   0x3   : > { %p27_p1 = scmp.ge.s32.totalorder %s26_s27, 6  ;;  %p268_p2 = scmp.lt.s32.totalorder %s3987_s26, 7 }
   0x5   : > { %s7427_s27 = smov (%p27_p1, %s26_s27), 0  ;;  %p269_p3 = pnand %p3914_p0, %p268_p2 }
   0x6   : > { %s3915_s28 = sshll.u32 (!%p269_p3), %s3979_s24, 2  ;;  %s3917_s29 = sshll.u32 (!%p269_p3), %s3979_s24, 6 }
   0x7   : > { %272 = sbr.rel (%p269_p3) target bundleno = 1187 (0x4a3), region = 48  ;;  %p312_p4 = scmp.lt.s32.totalorder (!%p269_p3), %s3915_s28, 23 }
   0x8   : > { %p320_p5 = scmp.lt.s32.totalorder (!%p269_p3), %s3917_s29, 383  ;;  %p3919_p6 = scmp.ne.s32.totalorder (!%p269_p3), %s3979_s24, 0 }
   0xc   : > { %s7429_s28 = smov (!%p312_p4, %s3915_s28), 23  ;;  %s7431_s29 = smov (!%p320_p5, %s3917_s29), 383 }
   0xd   : > { %s3916_s30 = sshll.u32 %s7429_s28, 3  ;;  %s3930_s11 = smul.u32 80, %s7431_s29 }
   0xe   : > { %s4055_s10 = scalar_lea.vmem %s7416_s0, %s3916_s30  ;;  %333 = sbr.rel (%p3919_p6) target bundleno = 30 (0x1e), region = 52 }
   0xf   : > { %s4060_s14 = scalar_lea.vmem %s7417_s1, %s3930_s11 }
  0x13   : > { %v3989_v0 = vmov 0.0   ;;  %vm343_vm0 = vcmask 392192  }
  0x14   : > { %334 = vst [vmem:[#allocation2] sm:$0xff] %v3989_v0 }
  0x15   : > { %335 = vst [vmem:[#allocation2 + $0x8] sm:$0xff] %v3989_v0 }
  0x16   : > { %336 = vst [vmem:[#allocation2 + $0x10] sm:$0xff] %v3989_v0 }
  0x17   : > { %337 = vst [vmem:[#allocation2 + $0x18] sm:$0xff] %v3989_v0 }
  0x18   : > { %338 = vst [vmem:[#allocation2 + $0x20] sm:$0xff] %v3989_v0 }
  0x19   : > { %339 = vst [vmem:[#allocation2 + $0x28] sm:$0xff] %v3989_v0 }
  0x1a   : > { %340 = vst [vmem:[#allocation2 + $0x30] sm:$0xff] %v3989_v0 }
  0x1b   : > { %341 = vst [vmem:[#allocation2 + $0x38] sm:$0xff] %v3989_v0 }
  0x1c   : > { %342 = vst [vmem:[#allocation2 + $0x40] sm:$0xff] %v3989_v0 }
  0x1d   : > { %344 = vst.msk [vmem:[#allocation2 + $0x48] sm:$0xff] %vm343_vm0, %v3989_v0 }
  0x1e PF: > { %v829_v1 = vld [vmem:[%s4060_s14 + $0xeb0] sm:$0xff]  ;;  %v819_v2 = vld [vmem:[%s4060_s14 + $0xe60] sm:$0xff]  ;;  %v830_v63 = vld [vmem:[%s4060_s14 + $0xeb8] sm:$0xff]  ;;  %vm1818_vm1 = vcmask 392192   ;;  %p3920_p7 = scmp.ne.s32.totalorder %s3979_s24, 5 }
  0x1f   : > { %v989_v3 = vld [vmem:[%s4060_s14 + $0x13b0] sm:$0xff]  ;;  %1039 = vmatpush.msra.mxu2 %v829_v1  ;;  %v979_v7 = vld [vmem:[%s4060_s14 + $0x1360] sm:$0xff]  ;;  %v990_v0 = vld [vmem:[%s4060_s14 + $0x13b8] sm:$0xff] }
  0x20   : > { %1059 = vmatpush.msra.mxu3 %v989_v3  ;;  %v509_v4 = vld [vmem:[%s4060_s14 + $0x4b0] sm:$0xff]  ;;  %v499_v8 = vld [vmem:[%s4060_s14 + $0x460] sm:$0xff]  ;;  %v820_v3 = vld [vmem:[%s4060_s14 + $0xe68] sm:$0xff] }
  0x21   : > { %v669_v5 = vld [vmem:[%s4060_s14 + $0x9b0] sm:$0xff]  ;;  %999 = vmatpush.msra.mxu0 %v509_v4  ;;  %v659_v9 = vld [vmem:[%s4060_s14 + $0x960] sm:$0xff]  ;;  %1040 = vmatpush.msra.mxu2 %v819_v2  ;;  %v510_v4 = vld [vmem:[%s4060_s14 + $0x4b8] sm:$0xff] }
  0x22   : > { %v809_v6 = vld [vmem:[%s4060_s14 + $0xe10] sm:$0xff]  ;;  %1019 = vmatpush.msra.mxu1 %v669_v5  ;;  %1060 = vmatpush.msra.mxu3 %v979_v7  ;;  %v799_v12 = vld [vmem:[%s4060_s14 + $0xdc0] sm:$0xff]  ;;  %v670_v5 = vld [vmem:[%s4060_s14 + $0x9b8] sm:$0xff] }
  0x23   : > { %v969_v10 = vld [vmem:[%s4060_s14 + $0x1310] sm:$0xff]  ;;  %1000 = vmatpush.msra.mxu0 %v499_v8  ;;  %v959_v14 = vld [vmem:[%s4060_s14 + $0x12c0] sm:$0xff]  ;;  %1041 = vmatpush.msra.mxu2 %v809_v6  ;;  %v980_v6 = vld [vmem:[%s4060_s14 + $0x1368] sm:$0xff] }
  0x24   : > { %v489_v11 = vld [vmem:[%s4060_s14 + $0x410] sm:$0xff]  ;;  %1020 = vmatpush.msra.mxu1 %v659_v9  ;;  %1061 = vmatpush.msra.mxu3 %v969_v10  ;;  %v479_v15 = vld [vmem:[%s4060_s14 + $0x3c0] sm:$0xff]  ;;  %v810_v7 = vld [vmem:[%s4060_s14 + $0xe18] sm:$0xff] }
  0x25   : > { %v649_v13 = vld [vmem:[%s4060_s14 + $0x910] sm:$0xff]  ;;  %v639_v16 = vld [vmem:[%s4060_s14 + $0x8c0] sm:$0xff]  ;;  %1001 = vmatpush.msra.mxu0 %v489_v11  ;;  %1042 = vmatpush.msra.mxu2 %v799_v12  ;;  %v500_v8 = vld [vmem:[%s4060_s14 + $0x468] sm:$0xff] }
  0x26   : > { %1021 = vmatpush.msra.mxu1 %v649_v13  ;;  %v789_v17 = vld [vmem:[%s4060_s14 + $0xd70] sm:$0xff]  ;;  %1062 = vmatpush.msra.mxu3 %v959_v14  ;;  %v779_v21 = vld [vmem:[%s4060_s14 + $0xd20] sm:$0xff]  ;;  %v660_v9 = vld [vmem:[%s4060_s14 + $0x968] sm:$0xff] }
  0x27   : > { %v949_v18 = vld [vmem:[%s4060_s14 + $0x1270] sm:$0xff]  ;;  %1002 = vmatpush.msra.mxu0 %v479_v15  ;;  %v939_v22 = vld [vmem:[%s4060_s14 + $0x1220] sm:$0xff]  ;;  %1043 = vmatpush.msra.mxu2 %v789_v17  ;;  %v970_v10 = vld [vmem:[%s4060_s14 + $0x1318] sm:$0xff] }
  0x28   : > { %v469_v19 = vld [vmem:[%s4060_s14 + $0x370] sm:$0xff]  ;;  %1022 = vmatpush.msra.mxu1 %v639_v16  ;;  %1063 = vmatpush.msra.mxu3 %v949_v18  ;;  %v459_v23 = vld [vmem:[%s4060_s14 + $0x320] sm:$0xff]  ;;  %v800_v11 = vld [vmem:[%s4060_s14 + $0xdc8] sm:$0xff] }
  0x29   : > { %v629_v20 = vld [vmem:[%s4060_s14 + $0x870] sm:$0xff]  ;;  %v619_v24 = vld [vmem:[%s4060_s14 + $0x820] sm:$0xff]  ;;  %1003 = vmatpush.msra.mxu0 %v469_v19  ;;  %1044 = vmatpush.msra.mxu2 %v779_v21  ;;  %v490_v12 = vld [vmem:[%s4060_s14 + $0x418] sm:$0xff] }
  0x2a   : > { %1023 = vmatpush.msra.mxu1 %v629_v20  ;;  %v769_v25 = vld [vmem:[%s4060_s14 + $0xcd0] sm:$0xff]  ;;  %1064 = vmatpush.msra.mxu3 %v939_v22  ;;  %v759_v29 = vld [vmem:[%s4060_s14 + $0xc80] sm:$0xff]  ;;  %v650_v13 = vld [vmem:[%s4060_s14 + $0x918] sm:$0xff] }
  0x2b   : > { %v929_v26 = vld [vmem:[%s4060_s14 + $0x11d0] sm:$0xff]  ;;  %1004 = vmatpush.msra.mxu0 %v459_v23  ;;  %v919_v30 = vld [vmem:[%s4060_s14 + $0x1180] sm:$0xff]  ;;  %1045 = vmatpush.msra.mxu2 %v769_v25  ;;  %v960_v14 = vld [vmem:[%s4060_s14 + $0x12c8] sm:$0xff] }
  0x2c   : > { %v449_v27 = vld [vmem:[%s4060_s14 + $0x2d0] sm:$0xff]  ;;  %1024 = vmatpush.msra.mxu1 %v619_v24  ;;  %1065 = vmatpush.msra.mxu3 %v929_v26  ;;  %v439_v31 = vld [vmem:[%s4060_s14 + $0x280] sm:$0xff]  ;;  %v790_v15 = vld [vmem:[%s4060_s14 + $0xd78] sm:$0xff] }
  0x2d   : > { %v609_v28 = vld [vmem:[%s4060_s14 + $0x7d0] sm:$0xff]  ;;  %v599_v32 = vld [vmem:[%s4060_s14 + $0x780] sm:$0xff]  ;;  %1005 = vmatpush.msra.mxu0 %v449_v27  ;;  %1046 = vmatpush.msra.mxu2 %v759_v29  ;;  %v480_v16 = vld [vmem:[%s4060_s14 + $0x3c8] sm:$0xff] }
  0x2e   : > { %1025 = vmatpush.msra.mxu1 %v609_v28  ;;  %v749_v33 = vld [vmem:[%s4060_s14 + $0xc30] sm:$0xff]  ;;  %1066 = vmatpush.msra.mxu3 %v919_v30  ;;  %v739_v37 = vld [vmem:[%s4060_s14 + $0xbe0] sm:$0xff]  ;;  %v640_v17 = vld [vmem:[%s4060_s14 + $0x8c8] sm:$0xff] }
  0x2f   : > { %v909_v34 = vld [vmem:[%s4060_s14 + $0x1130] sm:$0xff]  ;;  %1006 = vmatpush.msra.mxu0 %v439_v31  ;;  %v899_v38 = vld [vmem:[%s4060_s14 + $0x10e0] sm:$0xff]  ;;  %1047 = vmatpush.msra.mxu2 %v749_v33  ;;  %v950_v18 = vld [vmem:[%s4060_s14 + $0x1278] sm:$0xff] }
  0x30   : > { %v429_v35 = vld [vmem:[%s4060_s14 + $0x230] sm:$0xff]  ;;  %1026 = vmatpush.msra.mxu1 %v599_v32  ;;  %1067 = vmatpush.msra.mxu3 %v909_v34  ;;  %v419_v39 = vld [vmem:[%s4060_s14 + $0x1e0] sm:$0xff]  ;;  %v780_v19 = vld [vmem:[%s4060_s14 + $0xd28] sm:$0xff] }
  0x31   : > { %v589_v36 = vld [vmem:[%s4060_s14 + $0x730] sm:$0xff]  ;;  %v579_v40 = vld [vmem:[%s4060_s14 + $0x6e0] sm:$0xff]  ;;  %1007 = vmatpush.msra.mxu0 %v429_v35  ;;  %1048 = vmatpush.msra.mxu2 %v739_v37  ;;  %v470_v20 = vld [vmem:[%s4060_s14 + $0x378] sm:$0xff] }
  0x32   : > { %1027 = vmatpush.msra.mxu1 %v589_v36  ;;  %v729_v41 = vld [vmem:[%s4060_s14 + $0xb90] sm:$0xff]  ;;  %1068 = vmatpush.msra.mxu3 %v899_v38  ;;  %v719_v45 = vld [vmem:[%s4060_s14 + $0xb40] sm:$0xff]  ;;  %v630_v21 = vld [vmem:[%s4060_s14 + $0x878] sm:$0xff] }
  0x33   : > { %v889_v42 = vld [vmem:[%s4060_s14 + $0x1090] sm:$0xff]  ;;  %1008 = vmatpush.msra.mxu0 %v419_v39  ;;  %v879_v46 = vld [vmem:[%s4060_s14 + $0x1040] sm:$0xff]  ;;  %1049 = vmatpush.msra.mxu2 %v729_v41  ;;  %v940_v22 = vld [vmem:[%s4060_s14 + $0x1228] sm:$0xff] }
  0x34   : > { %v409_v43 = vld [vmem:[%s4060_s14 + $0x190] sm:$0xff]  ;;  %1028 = vmatpush.msra.mxu1 %v579_v40  ;;  %1069 = vmatpush.msra.mxu3 %v889_v42  ;;  %v399_v47 = vld [vmem:[%s4060_s14 + $0x140] sm:$0xff]  ;;  %v770_v23 = vld [vmem:[%s4060_s14 + $0xcd8] sm:$0xff] }
  0x35   : > { %v569_v44 = vld [vmem:[%s4060_s14 + $0x690] sm:$0xff]  ;;  %v559_v48 = vld [vmem:[%s4060_s14 + $0x640] sm:$0xff]  ;;  %1009 = vmatpush.msra.mxu0 %v409_v43  ;;  %1050 = vmatpush.msra.mxu2 %v719_v45  ;;  %v460_v24 = vld [vmem:[%s4060_s14 + $0x328] sm:$0xff] }
  0x36   : > { %1029 = vmatpush.msra.mxu1 %v569_v44  ;;  %v709_v49 = vld [vmem:[%s4060_s14 + $0xaf0] sm:$0xff]  ;;  %1070 = vmatpush.msra.mxu3 %v879_v46  ;;  %v699_v53 = vld [vmem:[%s4060_s14 + $0xaa0] sm:$0xff]  ;;  %v620_v25 = vld [vmem:[%s4060_s14 + $0x828] sm:$0xff] }
  0x37   : > { %v869_v50 = vld [vmem:[%s4060_s14 + $0xff0] sm:$0xff]  ;;  %1010 = vmatpush.msra.mxu0 %v399_v47  ;;  %v859_v54 = vld [vmem:[%s4060_s14 + $0xfa0] sm:$0xff]  ;;  %1051 = vmatpush.msra.mxu2 %v709_v49  ;;  %v930_v26 = vld [vmem:[%s4060_s14 + $0x11d8] sm:$0xff] }
  0x38   : > { %v389_v51 = vld [vmem:[%s4060_s14 + $0xf0] sm:$0xff]  ;;  %1030 = vmatpush.msra.mxu1 %v559_v48  ;;  %1071 = vmatpush.msra.mxu3 %v869_v50  ;;  %v379_v55 = vld [vmem:[%s4060_s14 + $0xa0] sm:$0xff]  ;;  %v760_v27 = vld [vmem:[%s4060_s14 + $0xc88] sm:$0xff] }
  0x39   : > { %v549_v52 = vld [vmem:[%s4060_s14 + $0x5f0] sm:$0xff]  ;;  %v539_v56 = vld [vmem:[%s4060_s14 + $0x5a0] sm:$0xff]  ;;  %1011 = vmatpush.msra.mxu0 %v389_v51  ;;  %1052 = vmatpush.msra.mxu2 %v699_v53  ;;  %v450_v28 = vld [vmem:[%s4060_s14 + $0x2d8] sm:$0xff] }
  0x3a   : > { %1031 = vmatpush.msra.mxu1 %v549_v52  ;;  %v689_v57 = vld [vmem:[%s4060_s14 + $0xa50] sm:$0xff]  ;;  %1072 = vmatpush.msra.mxu3 %v859_v54  ;;  %v679_v61 = vld [vmem:[%s4060_s14 + $0xa00] sm:$0xff]  ;;  %v610_v29 = vld [vmem:[%s4060_s14 + $0x7d8] sm:$0xff] }
  0x3b   : > { %v849_v58 = vld [vmem:[%s4060_s14 + $0xf50] sm:$0xff]  ;;  %1012 = vmatpush.msra.mxu0 %v379_v55  ;;  %v839_v62 = vld [vmem:[%s4060_s14 + $0xf00] sm:$0xff]  ;;  %1053 = vmatpush.msra.mxu2 %v689_v57  ;;  %v920_v30 = vld [vmem:[%s4060_s14 + $0x1188] sm:$0xff] }
  0x3c   : > { %v369_v59 = vld [vmem:[%s4060_s14 + $0x50] sm:$0xff]  ;;  %1032 = vmatpush.msra.mxu1 %v539_v56  ;;  %1073 = vmatpush.msra.mxu3 %v849_v58  ;;  %v359_v1 = vld [vmem:[%s4060_s14] sm:$0xff]  ;;  %v750_v31 = vld [vmem:[%s4060_s14 + $0xc38] sm:$0xff] }
  0x3d   : > { %v529_v60 = vld [vmem:[%s4060_s14 + $0x550] sm:$0xff]  ;;  %1013 = vmatpush.msra.mxu0 %v369_v59  ;;  %v519_v2 = vld [vmem:[%s4060_s14 + $0x500] sm:$0xff]  ;;  %1054 = vmatpush.msra.mxu2 %v679_v61  ;;  %v440_v32 = vld [vmem:[%s4060_s14 + $0x288] sm:$0xff] }
  0x3e   : > { %1033 = vmatpush.msra.mxu1 %v529_v60  ;;  %1074 = vmatpush.msra.mxu3 %v839_v62  ;;  %v600_v33 = vld [vmem:[%s4060_s14 + $0x788] sm:$0xff]  ;;  %v910_v34 = vld [vmem:[%s4060_s14 + $0x1138] sm:$0xff]  ;;  %v4188_v61 = vld [vmem:[%s4055_s10 + $0x10] sm:$0xff] }
  0x3f   : > { %1119 = vmatpush.msrb.mxu2 %v830_v63  ;;  %1014 = vmatpush.msra.mxu0 %v359_v1  ;;  %v740_v35 = vld [vmem:[%s4060_s14 + $0xbe8] sm:$0xff]  ;;  %v430_v36 = vld [vmem:[%s4060_s14 + $0x238] sm:$0xff]  ;;  %v831_v63 = vld [vmem:[%s4060_s14 + $0xec0] sm:$0xff] }
  0x40   : > { %1139 = vmatpush.msrb.mxu3 %v990_v0  ;;  %1034 = vmatpush.msra.mxu1 %v519_v2  ;;  %v590_v37 = vld [vmem:[%s4060_s14 + $0x738] sm:$0xff]  ;;  %v900_v38 = vld [vmem:[%s4060_s14 + $0x10e8] sm:$0xff] }
  0x41   : > { %1120 = vmatpush.msrb.mxu2 %v820_v3  ;;  %1079 = vmatpush.msrb.mxu0 %v510_v4  ;;  %v730_v39 = vld [vmem:[%s4060_s14 + $0xb98] sm:$0xff]  ;;  %v420_v40 = vld [vmem:[%s4060_s14 + $0x1e8] sm:$0xff]  ;;  %v821_v3 = vld [vmem:[%s4060_s14 + $0xe70] sm:$0xff] }
  0x42   : > { %1099 = vmatpush.msrb.mxu1 %v670_v5  ;;  %1140 = vmatpush.msrb.mxu3 %v980_v6  ;;  %v580_v41 = vld [vmem:[%s4060_s14 + $0x6e8] sm:$0xff]  ;;  %v890_v42 = vld [vmem:[%s4060_s14 + $0x1098] sm:$0xff]  ;;  %v991_v4 = vld [vmem:[%s4060_s14 + $0x13c0] sm:$0xff] }
  0x43   : > { %1121 = vmatpush.msrb.mxu2 %v810_v7  ;;  %1080 = vmatpush.msrb.mxu0 %v500_v8  ;;  %v720_v43 = vld [vmem:[%s4060_s14 + $0xb48] sm:$0xff]  ;;  %v410_v44 = vld [vmem:[%s4060_s14 + $0x198] sm:$0xff]  ;;  %v4202_v6 = vld [vmem:[%s4055_s10] sm:$0xff] }
  0x44   : > { %1100 = vmatpush.msrb.mxu1 %v660_v9  ;;  %1141 = vmatpush.msrb.mxu3 %v970_v10  ;;  %v570_v45 = vld [vmem:[%s4060_s14 + $0x698] sm:$0xff]  ;;  %v880_v46 = vld [vmem:[%s4060_s14 + $0x1048] sm:$0xff]  ;;  %v511_v8 = vld [vmem:[%s4060_s14 + $0x4c0] sm:$0xff] }
  0x45   : > { %1122 = vmatpush.msrb.mxu2 %v800_v11  ;;  %1081 = vmatpush.msrb.mxu0 %v490_v12  ;;  %v710_v47 = vld [vmem:[%s4060_s14 + $0xaf8] sm:$0xff]  ;;  %v400_v48 = vld [vmem:[%s4060_s14 + $0x148] sm:$0xff]  ;;  %v671_v9 = vld [vmem:[%s4060_s14 + $0x9c0] sm:$0xff] }
  0x46   : > { %1101 = vmatpush.msrb.mxu1 %v650_v13  ;;  %1142 = vmatpush.msrb.mxu3 %v960_v14  ;;  %v560_v49 = vld [vmem:[%s4060_s14 + $0x648] sm:$0xff]  ;;  %v870_v50 = vld [vmem:[%s4060_s14 + $0xff8] sm:$0xff]  ;;  %v811_v10 = vld [vmem:[%s4060_s14 + $0xe20] sm:$0xff] }
  0x47   : > { %1123 = vmatpush.msrb.mxu2 %v790_v15  ;;  %1082 = vmatpush.msrb.mxu0 %v480_v16  ;;  %v700_v51 = vld [vmem:[%s4060_s14 + $0xaa8] sm:$0xff]  ;;  %v390_v52 = vld [vmem:[%s4060_s14 + $0xf8] sm:$0xff]  ;;  %v981_v11 = vld [vmem:[%s4060_s14 + $0x1370] sm:$0xff] }
  0x48   : > { %1102 = vmatpush.msrb.mxu1 %v640_v17  ;;  %1143 = vmatpush.msrb.mxu3 %v950_v18  ;;  %v550_v53 = vld [vmem:[%s4060_s14 + $0x5f8] sm:$0xff]  ;;  %v860_v54 = vld [vmem:[%s4060_s14 + $0xfa8] sm:$0xff]  ;;  %v501_v12 = vld [vmem:[%s4060_s14 + $0x470] sm:$0xff] }
  0x49   : > { %1124 = vmatpush.msrb.mxu2 %v780_v19  ;;  %1083 = vmatpush.msrb.mxu0 %v470_v20  ;;  %v690_v55 = vld [vmem:[%s4060_s14 + $0xa58] sm:$0xff]  ;;  %v380_v56 = vld [vmem:[%s4060_s14 + $0xa8] sm:$0xff]  ;;  %v661_v13 = vld [vmem:[%s4060_s14 + $0x970] sm:$0xff] }
  0x4a   : > { %1103 = vmatpush.msrb.mxu1 %v630_v21  ;;  %1144 = vmatpush.msrb.mxu3 %v940_v22  ;;  %v540_v57 = vld [vmem:[%s4060_s14 + $0x5a8] sm:$0xff]  ;;  %v850_v58 = vld [vmem:[%s4060_s14 + $0xf58] sm:$0xff]  ;;  %v801_v14 = vld [vmem:[%s4060_s14 + $0xdd0] sm:$0xff] }
  0x4b   : > { %1125 = vmatpush.msrb.mxu2 %v770_v23  ;;  %1084 = vmatpush.msrb.mxu0 %v460_v24  ;;  %v680_v59 = vld [vmem:[%s4060_s14 + $0xa08] sm:$0xff]  ;;  %v370_v60 = vld [vmem:[%s4060_s14 + $0x58] sm:$0xff]  ;;  %v971_v15 = vld [vmem:[%s4060_s14 + $0x1320] sm:$0xff] }
  0x4c   : > { %1104 = vmatpush.msrb.mxu1 %v620_v25  ;;  %1145 = vmatpush.msrb.mxu3 %v930_v26  ;;  %v530_v62 = vld [vmem:[%s4060_s14 + $0x558] sm:$0xff]  ;;  %v840_v0 = vld [vmem:[%s4060_s14 + $0xf08] sm:$0xff]  ;;  %v491_v16 = vld [vmem:[%s4060_s14 + $0x420] sm:$0xff] }
  0x4d   : > { %1126 = vmatpush.msrb.mxu2 %v760_v27  ;;  %1085 = vmatpush.msrb.mxu0 %v450_v28  ;;  %v4194_v1 = vld [vmem:[%s4055_s10 + $0x18] sm:$0xff]  ;;  %v360_v2 = vld [vmem:[%s4060_s14 + $0x8] sm:$0xff]  ;;  %v651_v17 = vld [vmem:[%s4060_s14 + $0x920] sm:$0xff] }
  0x4e   : > { %1105 = vmatpush.msrb.mxu1 %v610_v29  ;;  %1146 = vmatpush.msrb.mxu3 %v920_v30  ;;  %v520_v5 = vld [vmem:[%s4060_s14 + $0x508] sm:$0xff]  ;;  %v791_v18 = vld [vmem:[%s4060_s14 + $0xd80] sm:$0xff]  ;;  %v961_v19 = vld [vmem:[%s4060_s14 + $0x12d0] sm:$0xff] }
  0x4f   : > { %1127 = vmatpush.msrb.mxu2 %v750_v31  ;;  %1086 = vmatpush.msrb.mxu0 %v440_v32  ;;  %v4206_v7 = vld [vmem:[%s4055_s10 + $0x8] sm:$0xff]  ;;  %v481_v20 = vld [vmem:[%s4060_s14 + $0x3d0] sm:$0xff]  ;;  %v951_v23 = vld [vmem:[%s4060_s14 + $0x1280] sm:$0xff] }
  0x50   : > { %1106 = vmatpush.msrb.mxu1 %v600_v33  ;;  %1147 = vmatpush.msrb.mxu3 %v910_v34  ;;  %v641_v21 = vld [vmem:[%s4060_s14 + $0x8d0] sm:$0xff]  ;;  %v471_v24 = vld [vmem:[%s4060_s14 + $0x380] sm:$0xff] }
  0x51   : > { %1128 = vmatpush.msrb.mxu2 %v740_v35  ;;  %1087 = vmatpush.msrb.mxu0 %v430_v36  ;;  %v781_v22 = vld [vmem:[%s4060_s14 + $0xd30] sm:$0xff]  ;;  %v631_v25 = vld [vmem:[%s4060_s14 + $0x880] sm:$0xff] }
  0x52   : > { %1107 = vmatpush.msrb.mxu1 %v590_v37  ;;  %1148 = vmatpush.msrb.mxu3 %v900_v38  ;;  %v771_v26 = vld [vmem:[%s4060_s14 + $0xce0] sm:$0xff]  ;;  %v941_v27 = vld [vmem:[%s4060_s14 + $0x1230] sm:$0xff] }
  0x53   : > { %1129 = vmatpush.msrb.mxu2 %v730_v39  ;;  %1088 = vmatpush.msrb.mxu0 %v420_v40  ;;  %v461_v28 = vld [vmem:[%s4060_s14 + $0x330] sm:$0xff]  ;;  %v931_v31 = vld [vmem:[%s4060_s14 + $0x11e0] sm:$0xff] }
  0x54   : > { %1108 = vmatpush.msrb.mxu1 %v580_v41  ;;  %1149 = vmatpush.msrb.mxu3 %v890_v42  ;;  %v621_v29 = vld [vmem:[%s4060_s14 + $0x830] sm:$0xff]  ;;  %v451_v32 = vld [vmem:[%s4060_s14 + $0x2e0] sm:$0xff] }
  0x55   : > { %1130 = vmatpush.msrb.mxu2 %v720_v43  ;;  %1089 = vmatpush.msrb.mxu0 %v410_v44  ;;  %v761_v30 = vld [vmem:[%s4060_s14 + $0xc90] sm:$0xff]  ;;  %v611_v33 = vld [vmem:[%s4060_s14 + $0x7e0] sm:$0xff] }
  0x56   : > { %1109 = vmatpush.msrb.mxu1 %v570_v45  ;;  %1150 = vmatpush.msrb.mxu3 %v880_v46  ;;  %v751_v34 = vld [vmem:[%s4060_s14 + $0xc40] sm:$0xff]  ;;  %v921_v35 = vld [vmem:[%s4060_s14 + $0x1190] sm:$0xff] }
  0x57   : > { %1131 = vmatpush.msrb.mxu2 %v710_v47  ;;  %1090 = vmatpush.msrb.mxu0 %v400_v48  ;;  %v441_v36 = vld [vmem:[%s4060_s14 + $0x290] sm:$0xff]  ;;  %v911_v39 = vld [vmem:[%s4060_s14 + $0x1140] sm:$0xff] }
  0x58   : > { %1110 = vmatpush.msrb.mxu1 %v560_v49  ;;  %1151 = vmatpush.msrb.mxu3 %v870_v50  ;;  %v601_v37 = vld [vmem:[%s4060_s14 + $0x790] sm:$0xff]  ;;  %v431_v40 = vld [vmem:[%s4060_s14 + $0x240] sm:$0xff] }
  0x59   : > { %1132 = vmatpush.msrb.mxu2 %v700_v51  ;;  %1091 = vmatpush.msrb.mxu0 %v390_v52  ;;  %v741_v38 = vld [vmem:[%s4060_s14 + $0xbf0] sm:$0xff]  ;;  %v591_v41 = vld [vmem:[%s4060_s14 + $0x740] sm:$0xff] }
  0x5a   : > { %1111 = vmatpush.msrb.mxu1 %v550_v53  ;;  %1152 = vmatpush.msrb.mxu3 %v860_v54  ;;  %v731_v42 = vld [vmem:[%s4060_s14 + $0xba0] sm:$0xff]  ;;  %v901_v43 = vld [vmem:[%s4060_s14 + $0x10f0] sm:$0xff] }
  0x5b   : > { %1133 = vmatpush.msrb.mxu2 %v690_v55  ;;  %1092 = vmatpush.msrb.mxu0 %v380_v56  ;;  %v421_v44 = vld [vmem:[%s4060_s14 + $0x1f0] sm:$0xff]  ;;  %v891_v47 = vld [vmem:[%s4060_s14 + $0x10a0] sm:$0xff] }
  0x5c   : > { %1112 = vmatpush.msrb.mxu1 %v540_v57  ;;  %1153 = vmatpush.msrb.mxu3 %v850_v58  ;;  %v581_v45 = vld [vmem:[%s4060_s14 + $0x6f0] sm:$0xff]  ;;  %v411_v48 = vld [vmem:[%s4060_s14 + $0x1a0] sm:$0xff] }
  0x5d   : > { %1134 = vmatpush.msrb.mxu2 %v680_v59  ;;  %1093 = vmatpush.msrb.mxu0 %v370_v60  ;;  %v721_v46 = vld [vmem:[%s4060_s14 + $0xb50] sm:$0xff]  ;;  %v571_v49 = vld [vmem:[%s4060_s14 + $0x6a0] sm:$0xff] }
  0x5e   : > { %1055 = vmatmul.f32.vlgmr.msra.gmra.mxu2 %v4188_v61  ;;  %1113 = vmatpush.msrb.mxu1 %v530_v62  ;;  %v711_v50 = vld [vmem:[%s4060_s14 + $0xb00] sm:$0xff]  ;;  %v881_v51 = vld [vmem:[%s4060_s14 + $0x1050] sm:$0xff] }
  0x5f   : > { %1199 = vmatpush.msra.mxu2 %v831_v63  ;;  %1154 = vmatpush.msrb.mxu3 %v840_v0  ;;  %v401_v52 = vld [vmem:[%s4060_s14 + $0x150] sm:$0xff]  ;;  %v871_v55 = vld [vmem:[%s4060_s14 + $0x1000] sm:$0xff] }
  0x60   : > { %1075 = vmatmul.f32.vlgmr.msra.gmra.mxu3 %v4194_v1  ;;  %1094 = vmatpush.msrb.mxu0 %v360_v2  ;;  %v561_v53 = vld [vmem:[%s4060_s14 + $0x650] sm:$0xff]  ;;  %v391_v56 = vld [vmem:[%s4060_s14 + $0x100] sm:$0xff]  ;;  %v832_v2 = vld [vmem:[%s4060_s14 + $0xec8] sm:$0xff] }
  0x61   : > { %1200 = vmatpush.msra.mxu2 %v821_v3  ;;  %1219 = vmatpush.msra.mxu3 %v991_v4  ;;  %v701_v54 = vld [vmem:[%s4060_s14 + $0xab0] sm:$0xff]  ;;  %v551_v57 = vld [vmem:[%s4060_s14 + $0x600] sm:$0xff] }
  0x62   : > { %1114 = vmatpush.msrb.mxu1 %v520_v5  ;;  %1015 = vmatmul.f32.vlgmr.msra.gmra.mxu0 %v4202_v6  ;;  %v691_v58 = vld [vmem:[%s4060_s14 + $0xa60] sm:$0xff]  ;;  %v861_v59 = vld [vmem:[%s4060_s14 + $0xfb0] sm:$0xff] }
  0x63   : > { %1035 = vmatmul.f32.vlgmr.msra.gmra.mxu1 %v4206_v7  ;;  %1159 = vmatpush.msra.mxu0 %v511_v8  ;;  %v381_v60 = vld [vmem:[%s4060_s14 + $0xb0] sm:$0xff]  ;;  %v851_v0 = vld [vmem:[%s4060_s14 + $0xf60] sm:$0xff]  ;;  %v822_v8 = vld [vmem:[%s4060_s14 + $0xe78] sm:$0xff] }
  0x64   : > { %1179 = vmatpush.msra.mxu1 %v671_v9  ;;  %1201 = vmatpush.msra.mxu2 %v811_v10  ;;  %v541_v62 = vld [vmem:[%s4060_s14 + $0x5b0] sm:$0xff]  ;;  %v371_v3 = vld [vmem:[%s4060_s14 + $0x60] sm:$0xff]  ;;  %v992_v9 = vld [vmem:[%s4060_s14 + $0x13c8] sm:$0xff] }
  0x65   : > { %1220 = vmatpush.msra.mxu3 %v981_v11  ;;  %1160 = vmatpush.msra.mxu0 %v501_v12  ;;  %v681_v63 = vld [vmem:[%s4060_s14 + $0xa10] sm:$0xff]  ;;  %v531_v4 = vld [vmem:[%s4060_s14 + $0x560] sm:$0xff]  ;;  %v512_v12 = vld [vmem:[%s4060_s14 + $0x4c8] sm:$0xff] }
  0x66   : > { %1180 = vmatpush.msra.mxu1 %v661_v13  ;;  %1202 = vmatpush.msra.mxu2 %v801_v14  ;;  %v841_v5 = vld [vmem:[%s4060_s14 + $0xf10] sm:$0xff]  ;;  %v672_v13 = vld [vmem:[%s4060_s14 + $0x9c8] sm:$0xff] }
  0x67   : > { %1221 = vmatpush.msra.mxu3 %v971_v15  ;;  %1161 = vmatpush.msra.mxu0 %v491_v16  ;;  %v361_v10 = vld [vmem:[%s4060_s14 + $0x10] sm:$0xff]  ;;  %v812_v14 = vld [vmem:[%s4060_s14 + $0xe28] sm:$0xff]  ;;  %v982_v15 = vld [vmem:[%s4060_s14 + $0x1378] sm:$0xff] }
  0x68   : > { %1181 = vmatpush.msra.mxu1 %v651_v17  ;;  %1203 = vmatpush.msra.mxu2 %v791_v18  ;;  %v521_v11 = vld [vmem:[%s4060_s14 + $0x510] sm:$0xff]  ;;  %v502_v16 = vld [vmem:[%s4060_s14 + $0x478] sm:$0xff] }
  0x69   : > { %1222 = vmatpush.msra.mxu3 %v961_v19  ;;  %1162 = vmatpush.msra.mxu0 %v481_v20  ;;  %v662_v17 = vld [vmem:[%s4060_s14 + $0x978] sm:$0xff]  ;;  %v972_v19 = vld [vmem:[%s4060_s14 + $0x1328] sm:$0xff] }
  0x6a   : > { %1182 = vmatpush.msra.mxu1 %v641_v21  ;;  %1204 = vmatpush.msra.mxu2 %v781_v22  ;;  %v802_v18 = vld [vmem:[%s4060_s14 + $0xdd8] sm:$0xff]  ;;  %v492_v20 = vld [vmem:[%s4060_s14 + $0x428] sm:$0xff] }
  0x6b   : > { %1223 = vmatpush.msra.mxu3 %v951_v23  ;;  %1163 = vmatpush.msra.mxu0 %v471_v24  ;;  %v652_v21 = vld [vmem:[%s4060_s14 + $0x928] sm:$0xff]  ;;  %v962_v23 = vld [vmem:[%s4060_s14 + $0x12d8] sm:$0xff] }
  0x6c   : > { %1183 = vmatpush.msra.mxu1 %v631_v25  ;;  %1205 = vmatpush.msra.mxu2 %v771_v26  ;;  %v792_v22 = vld [vmem:[%s4060_s14 + $0xd88] sm:$0xff]  ;;  %v482_v24 = vld [vmem:[%s4060_s14 + $0x3d8] sm:$0xff] }
  0x6d   : > { %1224 = vmatpush.msra.mxu3 %v941_v27  ;;  %1164 = vmatpush.msra.mxu0 %v461_v28  ;;  %v642_v25 = vld [vmem:[%s4060_s14 + $0x8d8] sm:$0xff]  ;;  %v952_v27 = vld [vmem:[%s4060_s14 + $0x1288] sm:$0xff] }
  0x6e   : > { %1184 = vmatpush.msra.mxu1 %v621_v29  ;;  %1206 = vmatpush.msra.mxu2 %v761_v30  ;;  %v782_v26 = vld [vmem:[%s4060_s14 + $0xd38] sm:$0xff]  ;;  %v472_v28 = vld [vmem:[%s4060_s14 + $0x388] sm:$0xff] }
  0x6f   : > { %1225 = vmatpush.msra.mxu3 %v931_v31  ;;  %1165 = vmatpush.msra.mxu0 %v451_v32  ;;  %v632_v29 = vld [vmem:[%s4060_s14 + $0x888] sm:$0xff]  ;;  %v942_v31 = vld [vmem:[%s4060_s14 + $0x1238] sm:$0xff] }
  0x70   : > { %1185 = vmatpush.msra.mxu1 %v611_v33  ;;  %1207 = vmatpush.msra.mxu2 %v751_v34  ;;  %v772_v30 = vld [vmem:[%s4060_s14 + $0xce8] sm:$0xff]  ;;  %v462_v32 = vld [vmem:[%s4060_s14 + $0x338] sm:$0xff] }
  0x71   : > { %1226 = vmatpush.msra.mxu3 %v921_v35  ;;  %1166 = vmatpush.msra.mxu0 %v441_v36  ;;  %v622_v33 = vld [vmem:[%s4060_s14 + $0x838] sm:$0xff]  ;;  %v932_v35 = vld [vmem:[%s4060_s14 + $0x11e8] sm:$0xff] }
  0x72   : > { %1186 = vmatpush.msra.mxu1 %v601_v37  ;;  %1208 = vmatpush.msra.mxu2 %v741_v38  ;;  %v762_v34 = vld [vmem:[%s4060_s14 + $0xc98] sm:$0xff]  ;;  %v452_v36 = vld [vmem:[%s4060_s14 + $0x2e8] sm:$0xff] }
  0x73   : > { %1227 = vmatpush.msra.mxu3 %v911_v39  ;;  %1167 = vmatpush.msra.mxu0 %v431_v40  ;;  %v612_v37 = vld [vmem:[%s4060_s14 + $0x7e8] sm:$0xff]  ;;  %v922_v39 = vld [vmem:[%s4060_s14 + $0x1198] sm:$0xff] }
  0x74   : > { %1187 = vmatpush.msra.mxu1 %v591_v41  ;;  %1209 = vmatpush.msra.mxu2 %v731_v42  ;;  %v752_v38 = vld [vmem:[%s4060_s14 + $0xc48] sm:$0xff]  ;;  %v442_v40 = vld [vmem:[%s4060_s14 + $0x298] sm:$0xff] }
  0x75   : > { %1228 = vmatpush.msra.mxu3 %v901_v43  ;;  %1168 = vmatpush.msra.mxu0 %v421_v44  ;;  %v602_v41 = vld [vmem:[%s4060_s14 + $0x798] sm:$0xff]  ;;  %v912_v43 = vld [vmem:[%s4060_s14 + $0x1148] sm:$0xff] }
  0x76   : > { %1188 = vmatpush.msra.mxu1 %v581_v45  ;;  %1210 = vmatpush.msra.mxu2 %v721_v46  ;;  %v742_v42 = vld [vmem:[%s4060_s14 + $0xbf8] sm:$0xff]  ;;  %v432_v44 = vld [vmem:[%s4060_s14 + $0x248] sm:$0xff] }
  0x77   : > { %1229 = vmatpush.msra.mxu3 %v891_v47  ;;  %1169 = vmatpush.msra.mxu0 %v411_v48  ;;  %v592_v45 = vld [vmem:[%s4060_s14 + $0x748] sm:$0xff]  ;;  %v902_v47 = vld [vmem:[%s4060_s14 + $0x10f8] sm:$0xff] }
  0x78   : > { %1189 = vmatpush.msra.mxu1 %v571_v49  ;;  %1211 = vmatpush.msra.mxu2 %v711_v50  ;;  %v732_v46 = vld [vmem:[%s4060_s14 + $0xba8] sm:$0xff]  ;;  %v422_v48 = vld [vmem:[%s4060_s14 + $0x1f8] sm:$0xff] }
  0x79   : > { %1230 = vmatpush.msra.mxu3 %v881_v51  ;;  %1170 = vmatpush.msra.mxu0 %v401_v52  ;;  %v582_v49 = vld [vmem:[%s4060_s14 + $0x6f8] sm:$0xff]  ;;  %v892_v51 = vld [vmem:[%s4060_s14 + $0x10a8] sm:$0xff] }
  0x7a   : > { %1190 = vmatpush.msra.mxu1 %v561_v53  ;;  %1212 = vmatpush.msra.mxu2 %v701_v54  ;;  %v722_v50 = vld [vmem:[%s4060_s14 + $0xb58] sm:$0xff]  ;;  %v412_v52 = vld [vmem:[%s4060_s14 + $0x1a8] sm:$0xff] }
  0x7b   : > { %1231 = vmatpush.msra.mxu3 %v871_v55  ;;  %1171 = vmatpush.msra.mxu0 %v391_v56  ;;  %v572_v53 = vld [vmem:[%s4060_s14 + $0x6a8] sm:$0xff]  ;;  %v882_v55 = vld [vmem:[%s4060_s14 + $0x1058] sm:$0xff] }
  0x7c   : > { %1191 = vmatpush.msra.mxu1 %v551_v57  ;;  %1213 = vmatpush.msra.mxu2 %v691_v58  ;;  %v712_v54 = vld [vmem:[%s4060_s14 + $0xb08] sm:$0xff]  ;;  %v402_v56 = vld [vmem:[%s4060_s14 + $0x158] sm:$0xff] }
  0x7d   : > { %1232 = vmatpush.msra.mxu3 %v861_v59  ;;  %1172 = vmatpush.msra.mxu0 %v381_v60  ;;  %v562_v57 = vld [vmem:[%s4060_s14 + $0x658] sm:$0xff]  ;;  %v872_v59 = vld [vmem:[%s4060_s14 + $0x1008] sm:$0xff] }
  0x7e   : > { %1192 = vmatpush.msra.mxu1 %v541_v62  ;;  %1214 = vmatpush.msra.mxu2 %v681_v63  ;;  %v702_v58 = vld [vmem:[%s4060_s14 + $0xab8] sm:$0xff]  ;;  %v392_v60 = vld [vmem:[%s4060_s14 + $0x108] sm:$0xff] }
  0x7f   : > { %1233 = vmatpush.msra.mxu3 %v851_v0  ;;  %1135 = vmatmul.f32.vlgmr.msrb.gmra.mxu2 %v4188_v61  ;;  %v552_v62 = vld [vmem:[%s4060_s14 + $0x608] sm:$0xff]  ;;  %v862_v0 = vld [vmem:[%s4060_s14 + $0xfb8] sm:$0xff] }
  0x80   : > { %1279 = vmatpush.msrb.mxu2 %v832_v2  ;;  %1173 = vmatpush.msra.mxu0 %v371_v3  ;;  %v692_v63 = vld [vmem:[%s4060_s14 + $0xa68] sm:$0xff]  ;;  %v382_v2 = vld [vmem:[%s4060_s14 + $0xb8] sm:$0xff] }
  0x81   : > { %1193 = vmatpush.msra.mxu1 %v531_v4  ;;  %1234 = vmatpush.msra.mxu3 %v841_v5  ;;  %v542_v3 = vld [vmem:[%s4060_s14 + $0x5b8] sm:$0xff]  ;;  %v852_v5 = vld [vmem:[%s4060_s14 + $0xf68] sm:$0xff] }
  0x82   : > { %1155 = vmatmul.f32.vlgmr.msrb.gmra.mxu3 %v4194_v1  ;;  %1280 = vmatpush.msrb.mxu2 %v822_v8  ;;  %v682_v4 = vld [vmem:[%s4060_s14 + $0xa18] sm:$0xff]  ;;  %v833_v8 = vld [vmem:[%s4060_s14 + $0xed0] sm:$0xff] }
  0x83   : > { %1299 = vmatpush.msrb.mxu3 %v992_v9  ;;  %1174 = vmatpush.msra.mxu0 %v361_v10  ;;  %v372_v9 = vld [vmem:[%s4060_s14 + $0x68] sm:$0xff] }
  0x84   : > { %1194 = vmatpush.msra.mxu1 %v521_v11  ;;  %1095 = vmatmul.f32.vlgmr.msrb.gmra.mxu0 %v4202_v6  ;;  %v532_v10 = vld [vmem:[%s4060_s14 + $0x568] sm:$0xff]  ;;  %v842_v11 = vld [vmem:[%s4060_s14 + $0xf18] sm:$0xff] }
  0x85   : > { %1115 = vmatmul.f32.vlgmr.msrb.gmra.mxu1 %v4206_v7  ;;  %1239 = vmatpush.msrb.mxu0 %v512_v12  ;;  %v823_v12 = vld [vmem:[%s4060_s14 + $0xe80] sm:$0xff] }
  0x86   : > { %1259 = vmatpush.msrb.mxu1 %v672_v13  ;;  %1281 = vmatpush.msrb.mxu2 %v812_v14  ;;  %v993_v13 = vld [vmem:[%s4060_s14 + $0x13d0] sm:$0xff]  ;;  %v362_v14 = vld [vmem:[%s4060_s14 + $0x18] sm:$0xff] }
  0x87   : > { %1300 = vmatpush.msrb.mxu3 %v982_v15  ;;  %1240 = vmatpush.msrb.mxu0 %v502_v16  ;;  %v522_v15 = vld [vmem:[%s4060_s14 + $0x518] sm:$0xff]  ;;  %v513_v16 = vld [vmem:[%s4060_s14 + $0x4d0] sm:$0xff] }
  0x88   : > { %1260 = vmatpush.msrb.mxu1 %v662_v17  ;;  %1282 = vmatpush.msrb.mxu2 %v802_v18  ;;  %v673_v17 = vld [vmem:[%s4060_s14 + $0x9d0] sm:$0xff] }
  0x89   : > { %1301 = vmatpush.msrb.mxu3 %v972_v19  ;;  %1241 = vmatpush.msrb.mxu0 %v492_v20  ;;  %v813_v18 = vld [vmem:[%s4060_s14 + $0xe30] sm:$0xff]  ;;  %v983_v19 = vld [vmem:[%s4060_s14 + $0x1380] sm:$0xff] }
  0x8a   : > { %1261 = vmatpush.msrb.mxu1 %v652_v21  ;;  %1283 = vmatpush.msrb.mxu2 %v792_v22  ;;  %v503_v20 = vld [vmem:[%s4060_s14 + $0x480] sm:$0xff] }
  0x8b   : > { %1302 = vmatpush.msrb.mxu3 %v962_v23  ;;  %1242 = vmatpush.msrb.mxu0 %v482_v24  ;;  %v663_v21 = vld [vmem:[%s4060_s14 + $0x980] sm:$0xff]  ;;  %v973_v23 = vld [vmem:[%s4060_s14 + $0x1330] sm:$0xff] }
  0x8c   : > { %1262 = vmatpush.msrb.mxu1 %v642_v25  ;;  %1284 = vmatpush.msrb.mxu2 %v782_v26  ;;  %v803_v22 = vld [vmem:[%s4060_s14 + $0xde0] sm:$0xff]  ;;  %v493_v24 = vld [vmem:[%s4060_s14 + $0x430] sm:$0xff] }
  0x8d   : > { %1303 = vmatpush.msrb.mxu3 %v952_v27  ;;  %1243 = vmatpush.msrb.mxu0 %v472_v28  ;;  %v653_v25 = vld [vmem:[%s4060_s14 + $0x930] sm:$0xff]  ;;  %v963_v27 = vld [vmem:[%s4060_s14 + $0x12e0] sm:$0xff] }
  0x8e   : > { %1263 = vmatpush.msrb.mxu1 %v632_v29  ;;  %1285 = vmatpush.msrb.mxu2 %v772_v30  ;;  %v793_v26 = vld [vmem:[%s4060_s14 + $0xd90] sm:$0xff]  ;;  %v483_v28 = vld [vmem:[%s4060_s14 + $0x3e0] sm:$0xff] }
  0x8f   : > { %1304 = vmatpush.msrb.mxu3 %v942_v31  ;;  %1244 = vmatpush.msrb.mxu0 %v462_v32  ;;  %v643_v29 = vld [vmem:[%s4060_s14 + $0x8e0] sm:$0xff]  ;;  %v953_v31 = vld [vmem:[%s4060_s14 + $0x1290] sm:$0xff] }
  0x90   : > { %1264 = vmatpush.msrb.mxu1 %v622_v33  ;;  %1286 = vmatpush.msrb.mxu2 %v762_v34  ;;  %v783_v30 = vld [vmem:[%s4060_s14 + $0xd40] sm:$0xff]  ;;  %v473_v32 = vld [vmem:[%s4060_s14 + $0x390] sm:$0xff] }
  0x91   : > { %1305 = vmatpush.msrb.mxu3 %v932_v35  ;;  %1245 = vmatpush.msrb.mxu0 %v452_v36  ;;  %v633_v33 = vld [vmem:[%s4060_s14 + $0x890] sm:$0xff]  ;;  %v943_v35 = vld [vmem:[%s4060_s14 + $0x1240] sm:$0xff] }
  0x92   : > { %1265 = vmatpush.msrb.mxu1 %v612_v37  ;;  %1287 = vmatpush.msrb.mxu2 %v752_v38  ;;  %v773_v34 = vld [vmem:[%s4060_s14 + $0xcf0] sm:$0xff]  ;;  %v463_v36 = vld [vmem:[%s4060_s14 + $0x340] sm:$0xff] }
  0x93   : > { %1306 = vmatpush.msrb.mxu3 %v922_v39  ;;  %1246 = vmatpush.msrb.mxu0 %v442_v40  ;;  %v623_v37 = vld [vmem:[%s4060_s14 + $0x840] sm:$0xff]  ;;  %v933_v39 = vld [vmem:[%s4060_s14 + $0x11f0] sm:$0xff] }
  0x94   : > { %1266 = vmatpush.msrb.mxu1 %v602_v41  ;;  %1288 = vmatpush.msrb.mxu2 %v742_v42  ;;  %v763_v38 = vld [vmem:[%s4060_s14 + $0xca0] sm:$0xff]  ;;  %v453_v40 = vld [vmem:[%s4060_s14 + $0x2f0] sm:$0xff] }
  0x95   : > { %1307 = vmatpush.msrb.mxu3 %v912_v43  ;;  %1247 = vmatpush.msrb.mxu0 %v432_v44  ;;  %v613_v41 = vld [vmem:[%s4060_s14 + $0x7f0] sm:$0xff]  ;;  %v923_v43 = vld [vmem:[%s4060_s14 + $0x11a0] sm:$0xff] }
  0x96   : > { %1267 = vmatpush.msrb.mxu1 %v592_v45  ;;  %1289 = vmatpush.msrb.mxu2 %v732_v46  ;;  %v753_v42 = vld [vmem:[%s4060_s14 + $0xc50] sm:$0xff]  ;;  %v443_v44 = vld [vmem:[%s4060_s14 + $0x2a0] sm:$0xff] }
  0x97   : > { %1308 = vmatpush.msrb.mxu3 %v902_v47  ;;  %1248 = vmatpush.msrb.mxu0 %v422_v48  ;;  %v603_v45 = vld [vmem:[%s4060_s14 + $0x7a0] sm:$0xff]  ;;  %v913_v47 = vld [vmem:[%s4060_s14 + $0x1150] sm:$0xff] }
  0x98   : > { %1268 = vmatpush.msrb.mxu1 %v582_v49  ;;  %1290 = vmatpush.msrb.mxu2 %v722_v50  ;;  %v743_v46 = vld [vmem:[%s4060_s14 + $0xc00] sm:$0xff]  ;;  %v433_v48 = vld [vmem:[%s4060_s14 + $0x250] sm:$0xff] }
  0x99   : > { %1309 = vmatpush.msrb.mxu3 %v892_v51  ;;  %1249 = vmatpush.msrb.mxu0 %v412_v52  ;;  %v593_v49 = vld [vmem:[%s4060_s14 + $0x750] sm:$0xff]  ;;  %v903_v51 = vld [vmem:[%s4060_s14 + $0x1100] sm:$0xff] }
  0x9a   : > { %1269 = vmatpush.msrb.mxu1 %v572_v53  ;;  %1291 = vmatpush.msrb.mxu2 %v712_v54  ;;  %v733_v50 = vld [vmem:[%s4060_s14 + $0xbb0] sm:$0xff]  ;;  %v423_v52 = vld [vmem:[%s4060_s14 + $0x200] sm:$0xff] }
  0x9b   : > { %1310 = vmatpush.msrb.mxu3 %v882_v55  ;;  %1250 = vmatpush.msrb.mxu0 %v402_v56  ;;  %v583_v53 = vld [vmem:[%s4060_s14 + $0x700] sm:$0xff]  ;;  %v893_v55 = vld [vmem:[%s4060_s14 + $0x10b0] sm:$0xff] }
  0x9c   : > { %1270 = vmatpush.msrb.mxu1 %v562_v57  ;;  %1292 = vmatpush.msrb.mxu2 %v702_v58  ;;  %v723_v54 = vld [vmem:[%s4060_s14 + $0xb60] sm:$0xff]  ;;  %v413_v56 = vld [vmem:[%s4060_s14 + $0x1b0] sm:$0xff] }
  0x9d   : > { %1311 = vmatpush.msrb.mxu3 %v872_v59  ;;  %1251 = vmatpush.msrb.mxu0 %v392_v60  ;;  %v573_v57 = vld [vmem:[%s4060_s14 + $0x6b0] sm:$0xff]  ;;  %v883_v59 = vld [vmem:[%s4060_s14 + $0x1060] sm:$0xff] }
  0x9e   : > { %1271 = vmatpush.msrb.mxu1 %v552_v62  ;;  %1293 = vmatpush.msrb.mxu2 %v692_v63  ;;  %v713_v58 = vld [vmem:[%s4060_s14 + $0xb10] sm:$0xff]  ;;  %v403_v60 = vld [vmem:[%s4060_s14 + $0x160] sm:$0xff] }
  0x9f   : > { %1312 = vmatpush.msrb.mxu3 %v862_v0  ;;  %1252 = vmatpush.msrb.mxu0 %v382_v2  ;;  %v563_v62 = vld [vmem:[%s4060_s14 + $0x660] sm:$0xff]  ;;  %v873_v0 = vld [vmem:[%s4060_s14 + $0x1010] sm:$0xff] }
  0xa0   : > { %1272 = vmatpush.msrb.mxu1 %v542_v3  ;;  %1294 = vmatpush.msrb.mxu2 %v682_v4  ;;  %v703_v63 = vld [vmem:[%s4060_s14 + $0xac0] sm:$0xff]  ;;  %v393_v2 = vld [vmem:[%s4060_s14 + $0x110] sm:$0xff] }
  0xa1   : > { %1313 = vmatpush.msrb.mxu3 %v852_v5  ;;  %1215 = vmatmul.f32.vlgmr.msra.gmra.mxu2 %v4188_v61  ;;  %v553_v3 = vld [vmem:[%s4060_s14 + $0x610] sm:$0xff]  ;;  %v863_v5 = vld [vmem:[%s4060_s14 + $0xfc0] sm:$0xff] }
  0xa2   : > { %1359 = vmatpush.msra.mxu2 %v833_v8  ;;  %1253 = vmatpush.msrb.mxu0 %v372_v9  ;;  %v693_v4 = vld [vmem:[%s4060_s14 + $0xa70] sm:$0xff]  ;;  %v383_v8 = vld [vmem:[%s4060_s14 + $0xc0] sm:$0xff] }
  0xa3   : > { %1273 = vmatpush.msrb.mxu1 %v532_v10  ;;  %1314 = vmatpush.msrb.mxu3 %v842_v11  ;;  %v543_v9 = vld [vmem:[%s4060_s14 + $0x5c0] sm:$0xff]  ;;  %v853_v11 = vld [vmem:[%s4060_s14 + $0xf70] sm:$0xff] }
  0xa4   : > { %1235 = vmatmul.f32.vlgmr.msra.gmra.mxu3 %v4194_v1  ;;  %1360 = vmatpush.msra.mxu2 %v823_v12  ;;  %v683_v10 = vld [vmem:[%s4060_s14 + $0xa20] sm:$0xff]  ;;  %v834_v12 = vld [vmem:[%s4060_s14 + $0xed8] sm:$0xff] }
  0xa5   : > { %1379 = vmatpush.msra.mxu3 %v993_v13  ;;  %1254 = vmatpush.msrb.mxu0 %v362_v14  ;;  %v373_v13 = vld [vmem:[%s4060_s14 + $0x70] sm:$0xff] }
  0xa6   : > { %1274 = vmatpush.msrb.mxu1 %v522_v15  ;;  %1175 = vmatmul.f32.vlgmr.msra.gmra.mxu0 %v4202_v6  ;;  %v533_v14 = vld [vmem:[%s4060_s14 + $0x570] sm:$0xff]  ;;  %v843_v15 = vld [vmem:[%s4060_s14 + $0xf20] sm:$0xff] }
  0xa7   : > { %1195 = vmatmul.f32.vlgmr.msra.gmra.mxu1 %v4206_v7  ;;  %1319 = vmatpush.msra.mxu0 %v513_v16  ;;  %v824_v16 = vld [vmem:[%s4060_s14 + $0xe88] sm:$0xff] }
  0xa8   : > { %1339 = vmatpush.msra.mxu1 %v673_v17  ;;  %1361 = vmatpush.msra.mxu2 %v813_v18  ;;  %v994_v17 = vld [vmem:[%s4060_s14 + $0x13d8] sm:$0xff]  ;;  %v363_v18 = vld [vmem:[%s4060_s14 + $0x20] sm:$0xff] }
  0xa9   : > { %1380 = vmatpush.msra.mxu3 %v983_v19  ;;  %1320 = vmatpush.msra.mxu0 %v503_v20  ;;  %v523_v19 = vld [vmem:[%s4060_s14 + $0x520] sm:$0xff]  ;;  %v514_v20 = vld [vmem:[%s4060_s14 + $0x4d8] sm:$0xff] }
  0xaa   : > { %1340 = vmatpush.msra.mxu1 %v663_v21  ;;  %1362 = vmatpush.msra.mxu2 %v803_v22  ;;  %v814_v21 = vld [vmem:[%s4060_s14 + $0xe38] sm:$0xff]  ;;  %v984_v22 = vld [vmem:[%s4060_s14 + $0x1388] sm:$0xff] }
  0xab   : > { %1381 = vmatpush.msra.mxu3 %v973_v23  ;;  %1321 = vmatpush.msra.mxu0 %v493_v24  ;;  %v504_v23 = vld [vmem:[%s4060_s14 + $0x488] sm:$0xff] }
  0xac   : > { %1341 = vmatpush.msra.mxu1 %v653_v25  ;;  %1363 = vmatpush.msra.mxu2 %v793_v26  ;;  %v804_v24 = vld [vmem:[%s4060_s14 + $0xde8] sm:$0xff]  ;;  %v974_v25 = vld [vmem:[%s4060_s14 + $0x1338] sm:$0xff] }
  0xad   : > { %1382 = vmatpush.msra.mxu3 %v963_v27  ;;  %1322 = vmatpush.msra.mxu0 %v483_v28  ;;  %v494_v26 = vld [vmem:[%s4060_s14 + $0x438] sm:$0xff]  ;;  %v484_v28 = vld [vmem:[%s4060_s14 + $0x3e8] sm:$0xff] }
  0xae   : > { %1342 = vmatpush.msra.mxu1 %v643_v29  ;;  %1364 = vmatpush.msra.mxu2 %v783_v30  ;;  %v794_v27 = vld [vmem:[%s4060_s14 + $0xd98] sm:$0xff]  ;;  %v644_v29 = vld [vmem:[%s4060_s14 + $0x8e8] sm:$0xff] }
  0xaf   : > { %1383 = vmatpush.msra.mxu3 %v953_v31  ;;  %1323 = vmatpush.msra.mxu0 %v473_v32  ;;  %v784_v30 = vld [vmem:[%s4060_s14 + $0xd48] sm:$0xff]  ;;  %v954_v31 = vld [vmem:[%s4060_s14 + $0x1298] sm:$0xff] }
  0xb0   : > { %1343 = vmatpush.msra.mxu1 %v633_v33  ;;  %1365 = vmatpush.msra.mxu2 %v773_v34  ;;  %v474_v32 = vld [vmem:[%s4060_s14 + $0x398] sm:$0xff] }
  0xb1   : > { %1384 = vmatpush.msra.mxu3 %v943_v35  ;;  %1324 = vmatpush.msra.mxu0 %v463_v36  ;;  %v634_v33 = vld [vmem:[%s4060_s14 + $0x898] sm:$0xff]  ;;  %v944_v35 = vld [vmem:[%s4060_s14 + $0x1248] sm:$0xff] }
  0xb2   : > { %1344 = vmatpush.msra.mxu1 %v623_v37  ;;  %1366 = vmatpush.msra.mxu2 %v763_v38  ;;  %v774_v34 = vld [vmem:[%s4060_s14 + $0xcf8] sm:$0xff]  ;;  %v464_v36 = vld [vmem:[%s4060_s14 + $0x348] sm:$0xff] }
  0xb3   : > { %1385 = vmatpush.msra.mxu3 %v933_v39  ;;  %1325 = vmatpush.msra.mxu0 %v453_v40  ;;  %v624_v37 = vld [vmem:[%s4060_s14 + $0x848] sm:$0xff]  ;;  %v934_v39 = vld [vmem:[%s4060_s14 + $0x11f8] sm:$0xff] }
  0xb4   : > { %1345 = vmatpush.msra.mxu1 %v613_v41  ;;  %1367 = vmatpush.msra.mxu2 %v753_v42  ;;  %v764_v38 = vld [vmem:[%s4060_s14 + $0xca8] sm:$0xff]  ;;  %v454_v40 = vld [vmem:[%s4060_s14 + $0x2f8] sm:$0xff] }
  0xb5   : > { %1386 = vmatpush.msra.mxu3 %v923_v43  ;;  %1326 = vmatpush.msra.mxu0 %v443_v44  ;;  %v614_v41 = vld [vmem:[%s4060_s14 + $0x7f8] sm:$0xff]  ;;  %v924_v43 = vld [vmem:[%s4060_s14 + $0x11a8] sm:$0xff] }
  0xb6   : > { %1346 = vmatpush.msra.mxu1 %v603_v45  ;;  %1368 = vmatpush.msra.mxu2 %v743_v46  ;;  %v754_v42 = vld [vmem:[%s4060_s14 + $0xc58] sm:$0xff]  ;;  %v444_v44 = vld [vmem:[%s4060_s14 + $0x2a8] sm:$0xff] }
  0xb7   : > { %1387 = vmatpush.msra.mxu3 %v913_v47  ;;  %1327 = vmatpush.msra.mxu0 %v433_v48  ;;  %v604_v45 = vld [vmem:[%s4060_s14 + $0x7a8] sm:$0xff]  ;;  %v914_v47 = vld [vmem:[%s4060_s14 + $0x1158] sm:$0xff] }
  0xb8   : > { %1347 = vmatpush.msra.mxu1 %v593_v49  ;;  %1369 = vmatpush.msra.mxu2 %v733_v50  ;;  %v744_v46 = vld [vmem:[%s4060_s14 + $0xc08] sm:$0xff]  ;;  %v434_v48 = vld [vmem:[%s4060_s14 + $0x258] sm:$0xff] }
  0xb9   : > { %1388 = vmatpush.msra.mxu3 %v903_v51  ;;  %1328 = vmatpush.msra.mxu0 %v423_v52  ;;  %v594_v49 = vld [vmem:[%s4060_s14 + $0x758] sm:$0xff]  ;;  %v904_v51 = vld [vmem:[%s4060_s14 + $0x1108] sm:$0xff] }
  0xba   : > { %1348 = vmatpush.msra.mxu1 %v583_v53  ;;  %1370 = vmatpush.msra.mxu2 %v723_v54  ;;  %v734_v50 = vld [vmem:[%s4060_s14 + $0xbb8] sm:$0xff]  ;;  %v424_v52 = vld [vmem:[%s4060_s14 + $0x208] sm:$0xff] }
  0xbb   : > { %1389 = vmatpush.msra.mxu3 %v893_v55  ;;  %1329 = vmatpush.msra.mxu0 %v413_v56  ;;  %v584_v53 = vld [vmem:[%s4060_s14 + $0x708] sm:$0xff]  ;;  %v894_v55 = vld [vmem:[%s4060_s14 + $0x10b8] sm:$0xff] }
  0xbc   : > { %1349 = vmatpush.msra.mxu1 %v573_v57  ;;  %1371 = vmatpush.msra.mxu2 %v713_v58  ;;  %v724_v54 = vld [vmem:[%s4060_s14 + $0xb68] sm:$0xff]  ;;  %v414_v56 = vld [vmem:[%s4060_s14 + $0x1b8] sm:$0xff] }
  0xbd   : > { %1390 = vmatpush.msra.mxu3 %v883_v59  ;;  %1330 = vmatpush.msra.mxu0 %v403_v60  ;;  %v574_v57 = vld [vmem:[%s4060_s14 + $0x6b8] sm:$0xff]  ;;  %v884_v59 = vld [vmem:[%s4060_s14 + $0x1068] sm:$0xff] }
  0xbe   : > { %1350 = vmatpush.msra.mxu1 %v563_v62  ;;  %1372 = vmatpush.msra.mxu2 %v703_v63  ;;  %v714_v58 = vld [vmem:[%s4060_s14 + $0xb18] sm:$0xff]  ;;  %v404_v60 = vld [vmem:[%s4060_s14 + $0x168] sm:$0xff] }
  0xbf   : > { %1391 = vmatpush.msra.mxu3 %v873_v0  ;;  %1331 = vmatpush.msra.mxu0 %v393_v2  ;;  %v564_v62 = vld [vmem:[%s4060_s14 + $0x668] sm:$0xff]  ;;  %v874_v0 = vld [vmem:[%s4060_s14 + $0x1018] sm:$0xff] }
  0xc0   : > { %1351 = vmatpush.msra.mxu1 %v553_v3  ;;  %1373 = vmatpush.msra.mxu2 %v693_v4  ;;  %v704_v63 = vld [vmem:[%s4060_s14 + $0xac8] sm:$0xff]  ;;  %v394_v2 = vld [vmem:[%s4060_s14 + $0x118] sm:$0xff] }
  0xc1   : > { %1392 = vmatpush.msra.mxu3 %v863_v5  ;;  %1332 = vmatpush.msra.mxu0 %v383_v8  ;;  %v554_v3 = vld [vmem:[%s4060_s14 + $0x618] sm:$0xff]  ;;  %v864_v8 = vld [vmem:[%s4060_s14 + $0xfc8] sm:$0xff] }
  0xc2   : > { %1352 = vmatpush.msra.mxu1 %v543_v9  ;;  %1374 = vmatpush.msra.mxu2 %v683_v10  ;;  %v694_v4 = vld [vmem:[%s4060_s14 + $0xa78] sm:$0xff]  ;;  %v384_v9 = vld [vmem:[%s4060_s14 + $0xc8] sm:$0xff] }
  0xc3   : > { %1393 = vmatpush.msra.mxu3 %v853_v11  ;;  %1295 = vmatmul.f32.vlgmr.msrb.gmra.mxu2 %v4188_v61  ;;  %v674_v61 = vld [vmem:[%s4060_s14 + $0x9d8] sm:$0xff]  ;;  %v544_v11 = vld [vmem:[%s4060_s14 + $0x5c8] sm:$0xff] }
  0xc4   : > { %1439 = vmatpush.msrb.mxu2 %v834_v12  ;;  %1333 = vmatpush.msra.mxu0 %v373_v13  ;;  %v684_v12 = vld [vmem:[%s4060_s14 + $0xa28] sm:$0xff] }
  0xc5   : > { %1353 = vmatpush.msra.mxu1 %v533_v14  ;;  %1394 = vmatpush.msra.mxu3 %v843_v15  ;;  %v854_v15 = vld [vmem:[%s4060_s14 + $0xf78] sm:$0xff] }
  0xc6   : > { %1315 = vmatmul.f32.vlgmr.msrb.gmra.mxu3 %v4194_v1  ;;  %1440 = vmatpush.msrb.mxu2 %v824_v16  ;;  %v664_v1 = vld [vmem:[%s4060_s14 + $0x988] sm:$0xff]  ;;  %v835_v16 = vld [vmem:[%s4060_s14 + $0xee0] sm:$0xff] }
  0xc7   : > { %1459 = vmatpush.msrb.mxu3 %v994_v17  ;;  %1334 = vmatpush.msra.mxu0 %v363_v18  ;;  %v374_v17 = vld [vmem:[%s4060_s14 + $0x78] sm:$0xff] }
  0xc8   : > { %1354 = vmatpush.msra.mxu1 %v523_v19  ;;  %1255 = vmatmul.f32.vlgmr.msrb.gmra.mxu0 %v4202_v6  ;;  %v654_v6 = vld [vmem:[%s4060_s14 + $0x938] sm:$0xff] }
  0xc9   : > { %1275 = vmatmul.f32.vlgmr.msrb.gmra.mxu1 %v4206_v7  ;;  %1399 = vmatpush.msrb.mxu0 %v514_v20  ;;  %v964_v7 = vld [vmem:[%s4060_s14 + $0x12e8] sm:$0xff]  ;;  %v534_v20 = vld [vmem:[%s4060_s14 + $0x578] sm:$0xff] }
  0xca   : > { %1419 = vmatpush.msrb.mxu1 %v674_v61  ;;  %1441 = vmatpush.msrb.mxu2 %v814_v21  ;;  %v844_v61 = vld [vmem:[%s4060_s14 + $0xf28] sm:$0xff]  ;;  %v345_v21 = vld [vmem:[#allocation2] sm:$0xff] }
  0xcb   : > { %1460 = vmatpush.msrb.mxu3 %v984_v22  ;;  %1400 = vmatpush.msrb.mxu0 %v504_v23  ;;  %v4475_v22 = vld [vmem:[%s4055_s10 + $0x10] sm:$0xff] }
  0xcc   : > { %1420 = vmatpush.msrb.mxu1 %v664_v1  ;;  %1442 = vmatpush.msrb.mxu2 %v804_v24  ;;  %v825_v23 = vld [vmem:[%s4060_s14 + $0xe90] sm:$0xff]  ;;  %v995_v24 = vld [vmem:[%s4060_s14 + $0x13e0] sm:$0xff] }
  0xcd   : > { %1461 = vmatpush.msrb.mxu3 %v974_v25  ;;  %1401 = vmatpush.msrb.mxu0 %v494_v26  ;;  %v364_v25 = vld [vmem:[%s4060_s14 + $0x28] sm:$0xff] }
  0xce   : > { %1421 = vmatpush.msrb.mxu1 %v654_v6  ;;  %1443 = vmatpush.msrb.mxu2 %v794_v27  ;;  %v524_v26 = vld [vmem:[%s4060_s14 + $0x528] sm:$0xff]  ;;  %v4483_v27 = vld [vmem:[%s4055_s10 + $0x18] sm:$0xff] }
  0xcf   : > { %1462 = vmatpush.msrb.mxu3 %v964_v7  ;;  %1402 = vmatpush.msrb.mxu0 %v484_v28  ;;  %v515_v7 = vld [vmem:[%s4060_s14 + $0x4e0] sm:$0xff] }
  0xd0   : > { %1422 = vmatpush.msrb.mxu1 %v644_v29  ;;  %1444 = vmatpush.msrb.mxu2 %v784_v30  ;;  %v675_v28 = vld [vmem:[%s4060_s14 + $0x9e0] sm:$0xff] }
  0xd1   : > { %1463 = vmatpush.msrb.mxu3 %v954_v31  ;;  %1403 = vmatpush.msrb.mxu0 %v474_v32  ;;  %v815_v29 = vld [vmem:[%s4060_s14 + $0xe40] sm:$0xff]  ;;  %v985_v31 = vld [vmem:[%s4060_s14 + $0x1390] sm:$0xff] }
  0xd2   : > { %1423 = vmatpush.msrb.mxu1 %v634_v33  ;;  %1445 = vmatpush.msrb.mxu2 %v774_v34  ;;  %v4490_v30 = vld [vmem:[%s4055_s10] sm:$0xff]  ;;  %v505_v32 = vld [vmem:[%s4060_s14 + $0x490] sm:$0xff]  ;;  %v4496_v33 = vld [vmem:[%s4055_s10 + $0x8] sm:$0xff] }
  0xd3   : > { %1464 = vmatpush.msrb.mxu3 %v944_v35  ;;  %1404 = vmatpush.msrb.mxu0 %v464_v36  ;;  %v665_v34 = vld [vmem:[%s4060_s14 + $0x990] sm:$0xff]  ;;  %v975_v36 = vld [vmem:[%s4060_s14 + $0x1340] sm:$0xff] }
  0xd4   : > { %1424 = vmatpush.msrb.mxu1 %v624_v37  ;;  %1446 = vmatpush.msrb.mxu2 %v764_v38  ;;  %v805_v35 = vld [vmem:[%s4060_s14 + $0xdf0] sm:$0xff]  ;;  %v495_v37 = vld [vmem:[%s4060_s14 + $0x440] sm:$0xff] }
  0xd5   : > { %1465 = vmatpush.msrb.mxu3 %v934_v39  ;;  %1405 = vmatpush.msrb.mxu0 %v454_v40  ;;  %v655_v38 = vld [vmem:[%s4060_s14 + $0x940] sm:$0xff]  ;;  %v965_v40 = vld [vmem:[%s4060_s14 + $0x12f0] sm:$0xff] }
  0xd6   : > { %1425 = vmatpush.msrb.mxu1 %v614_v41  ;;  %1447 = vmatpush.msrb.mxu2 %v754_v42  ;;  %v795_v39 = vld [vmem:[%s4060_s14 + $0xda0] sm:$0xff]  ;;  %v485_v41 = vld [vmem:[%s4060_s14 + $0x3f0] sm:$0xff] }
  0xd7   : > { %1466 = vmatpush.msrb.mxu3 %v924_v43  ;;  %1406 = vmatpush.msrb.mxu0 %v444_v44  ;;  %v645_v42 = vld [vmem:[%s4060_s14 + $0x8f0] sm:$0xff]  ;;  %v955_v44 = vld [vmem:[%s4060_s14 + $0x12a0] sm:$0xff] }
  0xd8   : > { %1426 = vmatpush.msrb.mxu1 %v604_v45  ;;  %1448 = vmatpush.msrb.mxu2 %v744_v46  ;;  %v785_v43 = vld [vmem:[%s4060_s14 + $0xd50] sm:$0xff]  ;;  %v475_v45 = vld [vmem:[%s4060_s14 + $0x3a0] sm:$0xff] }
  0xd9   : > { %1467 = vmatpush.msrb.mxu3 %v914_v47  ;;  %1407 = vmatpush.msrb.mxu0 %v434_v48  ;;  %v635_v46 = vld [vmem:[%s4060_s14 + $0x8a0] sm:$0xff]  ;;  %v945_v48 = vld [vmem:[%s4060_s14 + $0x1250] sm:$0xff] }
  0xda   : > { %1427 = vmatpush.msrb.mxu1 %v594_v49  ;;  %1449 = vmatpush.msrb.mxu2 %v734_v50  ;;  %v775_v47 = vld [vmem:[%s4060_s14 + $0xd00] sm:$0xff]  ;;  %v465_v49 = vld [vmem:[%s4060_s14 + $0x350] sm:$0xff] }
  0xdb   : > { %1468 = vmatpush.msrb.mxu3 %v904_v51  ;;  %1408 = vmatpush.msrb.mxu0 %v424_v52  ;;  %v625_v50 = vld [vmem:[%s4060_s14 + $0x850] sm:$0xff]  ;;  %v935_v52 = vld [vmem:[%s4060_s14 + $0x1200] sm:$0xff] }
  0xdc   : > { %1428 = vmatpush.msrb.mxu1 %v584_v53  ;;  %1450 = vmatpush.msrb.mxu2 %v724_v54  ;;  %v765_v51 = vld [vmem:[%s4060_s14 + $0xcb0] sm:$0xff]  ;;  %v455_v53 = vld [vmem:[%s4060_s14 + $0x300] sm:$0xff] }
  0xdd   : > { %1469 = vmatpush.msrb.mxu3 %v894_v55  ;;  %1409 = vmatpush.msrb.mxu0 %v414_v56  ;;  %v615_v54 = vld [vmem:[%s4060_s14 + $0x800] sm:$0xff]  ;;  %v925_v56 = vld [vmem:[%s4060_s14 + $0x11b0] sm:$0xff] }
  0xde   : > { %1429 = vmatpush.msrb.mxu1 %v574_v57  ;;  %1451 = vmatpush.msrb.mxu2 %v714_v58  ;;  %v755_v55 = vld [vmem:[%s4060_s14 + $0xc60] sm:$0xff]  ;;  %v445_v57 = vld [vmem:[%s4060_s14 + $0x2b0] sm:$0xff] }
  0xdf   : > { %1470 = vmatpush.msrb.mxu3 %v884_v59  ;;  %1410 = vmatpush.msrb.mxu0 %v404_v60  ;;  %v1016_v5 = vpop.f32.mrf.mxu0  ;;  %v605_v58 = vld [vmem:[%s4060_s14 + $0x7b0] sm:$0xff]  ;;  %v915_v60 = vld [vmem:[%s4060_s14 + $0x1160] sm:$0xff] }
  0xe0   : > { %1430 = vmatpush.msrb.mxu1 %v564_v62  ;;  %1452 = vmatpush.msrb.mxu2 %v704_v63  ;;  %v1036_v10 = vpop.f32.mrf.mxu1  ;;  %v745_v59 = vld [vmem:[%s4060_s14 + $0xc10] sm:$0xff]  ;;  %v435_v62 = vld [vmem:[%s4060_s14 + $0x260] sm:$0xff] }
  0xe1   : > { %1471 = vmatpush.msrb.mxu3 %v874_v0  ;;  %1411 = vmatpush.msrb.mxu0 %v394_v2  ;;  %v1037_v13 = vadd.f32 %v1036_v10, %v1016_v5  ;;  %v1056_v14 = vpop.f32.mrf.mxu2  ;;  %v595_v63 = vld [vmem:[%s4060_s14 + $0x760] sm:$0xff]  ;;  %v905_v2 = vld [vmem:[%s4060_s14 + $0x1110] sm:$0xff] }
  0xe2   : > { %1431 = vmatpush.msrb.mxu1 %v554_v3  ;;  %1453 = vmatpush.msrb.mxu2 %v694_v4  ;;  %v735_v0 = vld [vmem:[%s4060_s14 + $0xbc0] sm:$0xff]  ;;  %v425_v3 = vld [vmem:[%s4060_s14 + $0x210] sm:$0xff] }
  0xe3   : > { %1472 = vmatpush.msrb.mxu3 %v864_v8  ;;  %1412 = vmatpush.msrb.mxu0 %v384_v9  ;;  %v1057_v18 = vadd.f32 %v1056_v14, %v1037_v13  ;;  %v1076_v19 = vpop.f32.mrf.mxu3  ;;  %v585_v4 = vld [vmem:[%s4060_s14 + $0x710] sm:$0xff]  ;;  %v895_v8 = vld [vmem:[%s4060_s14 + $0x10c0] sm:$0xff] }
  0xe4   : > { %1432 = vmatpush.msrb.mxu1 %v544_v11  ;;  %1454 = vmatpush.msrb.mxu2 %v684_v12  ;;  %v725_v5 = vld [vmem:[%s4060_s14 + $0xb70] sm:$0xff]  ;;  %v415_v9 = vld [vmem:[%s4060_s14 + $0x1c0] sm:$0xff] }
  0xe5   : > { %1473 = vmatpush.msrb.mxu3 %v854_v15  ;;  %1375 = vmatmul.f32.vlgmr.msra.gmra.mxu2 %v4475_v22  ;;  %v1077_v1 = vadd.f32 %v1076_v19, %v1057_v18  ;;  %v575_v10 = vld [vmem:[%s4060_s14 + $0x6c0] sm:$0xff]  ;;  %v885_v12 = vld [vmem:[%s4060_s14 + $0x1070] sm:$0xff] }
  0xe6   : > { %1519 = vmatpush.msra.mxu2 %v835_v16  ;;  %1413 = vmatpush.msrb.mxu0 %v374_v17  ;;  %v715_v11 = vld [vmem:[%s4060_s14 + $0xb20] sm:$0xff]  ;;  %v405_v13 = vld [vmem:[%s4060_s14 + $0x170] sm:$0xff] }
  0xe7   : > { %1433 = vmatpush.msrb.mxu1 %v534_v20  ;;  %1474 = vmatpush.msrb.mxu3 %v844_v61  ;;  %v1799_v6 = vadd.f32 %v1077_v1, %v345_v21  ;;  %v565_v14 = vld [vmem:[%s4060_s14 + $0x670] sm:$0xff]  ;;  %v875_v16 = vld [vmem:[%s4060_s14 + $0x1020] sm:$0xff] }
  0xe8   : > { %1395 = vmatmul.f32.vlgmr.msra.gmra.mxu3 %v4483_v27  ;;  %1520 = vmatpush.msra.mxu2 %v825_v23  ;;  %v705_v15 = vld [vmem:[%s4060_s14 + $0xad0] sm:$0xff]  ;;  %v395_v17 = vld [vmem:[%s4060_s14 + $0x120] sm:$0xff] }
  0xe9   : > { %1539 = vmatpush.msra.mxu3 %v995_v24  ;;  %1414 = vmatpush.msrb.mxu0 %v364_v25  ;;  %1809 = vst [vmem:[#allocation2] sm:$0xff] %v1799_v6  ;;  %v555_v18 = vld [vmem:[%s4060_s14 + $0x620] sm:$0xff]  ;;  %v865_v61 = vld [vmem:[%s4060_s14 + $0xfd0] sm:$0xff] }
  0xea   : > { %1434 = vmatpush.msrb.mxu1 %v524_v26  ;;  %1335 = vmatmul.f32.vlgmr.msra.gmra.mxu0 %v4490_v30  ;;  %v695_v19 = vld [vmem:[%s4060_s14 + $0xa80] sm:$0xff]  ;;  %v385_v21 = vld [vmem:[%s4060_s14 + $0xd0] sm:$0xff] }
  0xeb   : > { %1355 = vmatmul.f32.vlgmr.msra.gmra.mxu1 %v4496_v33  ;;  %1479 = vmatpush.msra.mxu0 %v515_v7  ;;  %v545_v24 = vld [vmem:[%s4060_s14 + $0x5d0] sm:$0xff]  ;;  %v855_v6 = vld [vmem:[%s4060_s14 + $0xf80] sm:$0xff]  ;;  %v836_v7 = vld [vmem:[%s4060_s14 + $0xee8] sm:$0xff] }
  0xec   : > { %1499 = vmatpush.msra.mxu1 %v675_v28  ;;  %1521 = vmatpush.msra.mxu2 %v815_v29  ;;  %v685_v25 = vld [vmem:[%s4060_s14 + $0xa30] sm:$0xff]  ;;  %v375_v28 = vld [vmem:[%s4060_s14 + $0x80] sm:$0xff] }
  0xed   : > { %1540 = vmatpush.msra.mxu3 %v985_v31  ;;  %1480 = vmatpush.msra.mxu0 %v505_v32  ;;  %v535_v32 = vld [vmem:[%s4060_s14 + $0x580] sm:$0xff] }
  0xee   : > { %1500 = vmatpush.msra.mxu1 %v665_v34  ;;  %1522 = vmatpush.msra.mxu2 %v805_v35  ;;  %v845_v34 = vld [vmem:[%s4060_s14 + $0xf30] sm:$0xff]  ;;  %v346_v35 = vld [vmem:[#allocation2 + $0x8] sm:$0xff] }
  0xef   : > { %1541 = vmatpush.msra.mxu3 %v975_v36  ;;  %1481 = vmatpush.msra.mxu0 %v495_v37  ;;  %v826_v36 = vld [vmem:[%s4060_s14 + $0xe98] sm:$0xff] }
  0xf0   : > { %1501 = vmatpush.msra.mxu1 %v655_v38  ;;  %1523 = vmatpush.msra.mxu2 %v795_v39  ;;  %v996_v38 = vld [vmem:[%s4060_s14 + $0x13e8] sm:$0xff]  ;;  %v365_v39 = vld [vmem:[%s4060_s14 + $0x30] sm:$0xff] }
  0xf1   : > { %1542 = vmatpush.msra.mxu3 %v965_v40  ;;  %1482 = vmatpush.msra.mxu0 %v485_v41  ;;  %v525_v40 = vld [vmem:[%s4060_s14 + $0x530] sm:$0xff] }
  0xf2   : > { %1502 = vmatpush.msra.mxu1 %v645_v42  ;;  %1524 = vmatpush.msra.mxu2 %v785_v43  ;;  %v516_v42 = vld [vmem:[%s4060_s14 + $0x4e8] sm:$0xff] }
  0xf3   : > { %1543 = vmatpush.msra.mxu3 %v955_v44  ;;  %1483 = vmatpush.msra.mxu0 %v475_v45  ;;  %v676_v43 = vld [vmem:[%s4060_s14 + $0x9e8] sm:$0xff]  ;;  %v986_v45 = vld [vmem:[%s4060_s14 + $0x1398] sm:$0xff] }
  0xf4   : > { %1503 = vmatpush.msra.mxu1 %v635_v46  ;;  %1525 = vmatpush.msra.mxu2 %v775_v47  ;;  %v816_v44 = vld [vmem:[%s4060_s14 + $0xe48] sm:$0xff]  ;;  %v506_v46 = vld [vmem:[%s4060_s14 + $0x498] sm:$0xff] }
  0xf5   : > { %1544 = vmatpush.msra.mxu3 %v945_v48  ;;  %1484 = vmatpush.msra.mxu0 %v465_v49  ;;  %v666_v47 = vld [vmem:[%s4060_s14 + $0x998] sm:$0xff]  ;;  %v976_v49 = vld [vmem:[%s4060_s14 + $0x1348] sm:$0xff] }
  0xf6   : > { %1504 = vmatpush.msra.mxu1 %v625_v50  ;;  %1526 = vmatpush.msra.mxu2 %v765_v51  ;;  %v806_v48 = vld [vmem:[%s4060_s14 + $0xdf8] sm:$0xff]  ;;  %v496_v50 = vld [vmem:[%s4060_s14 + $0x448] sm:$0xff] }
  0xf7   : > { %1545 = vmatpush.msra.mxu3 %v935_v52  ;;  %1485 = vmatpush.msra.mxu0 %v455_v53  ;;  %v656_v51 = vld [vmem:[%s4060_s14 + $0x948] sm:$0xff]  ;;  %v966_v53 = vld [vmem:[%s4060_s14 + $0x12f8] sm:$0xff] }
  0xf8   : > { %1505 = vmatpush.msra.mxu1 %v615_v54  ;;  %1527 = vmatpush.msra.mxu2 %v755_v55  ;;  %v796_v52 = vld [vmem:[%s4060_s14 + $0xda8] sm:$0xff]  ;;  %v486_v54 = vld [vmem:[%s4060_s14 + $0x3f8] sm:$0xff] }
  0xf9   : > { %1546 = vmatpush.msra.mxu3 %v925_v56  ;;  %1486 = vmatpush.msra.mxu0 %v445_v57  ;;  %v646_v55 = vld [vmem:[%s4060_s14 + $0x8f8] sm:$0xff]  ;;  %v956_v57 = vld [vmem:[%s4060_s14 + $0x12a8] sm:$0xff] }
  0xfa   : > { %1506 = vmatpush.msra.mxu1 %v605_v58  ;;  %1528 = vmatpush.msra.mxu2 %v745_v59  ;;  %v786_v56 = vld [vmem:[%s4060_s14 + $0xd58] sm:$0xff]  ;;  %v476_v58 = vld [vmem:[%s4060_s14 + $0x3a8] sm:$0xff] }
  0xfb   : > { %1547 = vmatpush.msra.mxu3 %v915_v60  ;;  %1487 = vmatpush.msra.mxu0 %v435_v62  ;;  %v636_v59 = vld [vmem:[%s4060_s14 + $0x8a8] sm:$0xff]  ;;  %v946_v62 = vld [vmem:[%s4060_s14 + $0x1258] sm:$0xff] }
  0xfc   : > { %1507 = vmatpush.msra.mxu1 %v595_v63  ;;  %1529 = vmatpush.msra.mxu2 %v735_v0  ;;  %v776_v60 = vld [vmem:[%s4060_s14 + $0xd08] sm:$0xff]  ;;  %v466_v63 = vld [vmem:[%s4060_s14 + $0x358] sm:$0xff] }
  0xfd   : > { %1548 = vmatpush.msra.mxu3 %v905_v2  ;;  %1488 = vmatpush.msra.mxu0 %v425_v3  ;;  %v626_v0 = vld [vmem:[%s4060_s14 + $0x858] sm:$0xff]  ;;  %v936_v3 = vld [vmem:[%s4060_s14 + $0x1208] sm:$0xff] }
  0xfe   : > { %1508 = vmatpush.msra.mxu1 %v585_v4  ;;  %1530 = vmatpush.msra.mxu2 %v725_v5  ;;  %v766_v2 = vld [vmem:[%s4060_s14 + $0xcb8] sm:$0xff]  ;;  %v456_v4 = vld [vmem:[%s4060_s14 + $0x308] sm:$0xff] }
  0xff   : > { %1549 = vmatpush.msra.mxu3 %v895_v8  ;;  %1489 = vmatpush.msra.mxu0 %v415_v9  ;;  %v616_v5 = vld [vmem:[%s4060_s14 + $0x808] sm:$0xff]  ;;  %v926_v9 = vld [vmem:[%s4060_s14 + $0x11b8] sm:$0xff] }
 0x100   : > { %1509 = vmatpush.msra.mxu1 %v575_v10  ;;  %1531 = vmatpush.msra.mxu2 %v715_v11  ;;  %v756_v8 = vld [vmem:[%s4060_s14 + $0xc68] sm:$0xff]  ;;  %v446_v10 = vld [vmem:[%s4060_s14 + $0x2b8] sm:$0xff] }
 0x101   : > { %1550 = vmatpush.msra.mxu3 %v885_v12  ;;  %1490 = vmatpush.msra.mxu0 %v405_v13  ;;  %v1096_v20 = vpop.f32.mrf.mxu0  ;;  %v606_v11 = vld [vmem:[%s4060_s14 + $0x7b8] sm:$0xff]  ;;  %v916_v13 = vld [vmem:[%s4060_s14 + $0x1168] sm:$0xff] }
 0x102   : > { %1510 = vmatpush.msra.mxu1 %v565_v14  ;;  %1532 = vmatpush.msra.mxu2 %v705_v15  ;;  %v1116_v23 = vpop.f32.mrf.mxu1  ;;  %v1136_v1 = vpop.f32.mrf.mxu2  ;;  %v746_v12 = vld [vmem:[%s4060_s14 + $0xc18] sm:$0xff]  ;;  %v436_v14 = vld [vmem:[%s4060_s14 + $0x268] sm:$0xff] }
 0x103   : > { %1551 = vmatpush.msra.mxu3 %v875_v16  ;;  %1491 = vmatpush.msra.mxu0 %v395_v17  ;;  %v1117_v26 = vadd.f32 %v1116_v23, %v1096_v20  ;;  %v596_v15 = vld [vmem:[%s4060_s14 + $0x768] sm:$0xff]  ;;  %v906_v17 = vld [vmem:[%s4060_s14 + $0x1118] sm:$0xff] }
 0x104   : > { %1511 = vmatpush.msra.mxu1 %v555_v18  ;;  %1533 = vmatpush.msra.mxu2 %v695_v19  ;;  %v736_v16 = vld [vmem:[%s4060_s14 + $0xbc8] sm:$0xff]  ;;  %v426_v18 = vld [vmem:[%s4060_s14 + $0x218] sm:$0xff] }
 0x105   : > { %1552 = vmatpush.msra.mxu3 %v865_v61  ;;  %1492 = vmatpush.msra.mxu0 %v385_v21  ;;  %v1137_v29 = vadd.f32 %v1136_v1, %v1117_v26  ;;  %v1156_v31 = vpop.f32.mrf.mxu3  ;;  %v586_v19 = vld [vmem:[%s4060_s14 + $0x718] sm:$0xff]  ;;  %v896_v61 = vld [vmem:[%s4060_s14 + $0x10c8] sm:$0xff] }
 0x106   : > { %1512 = vmatpush.msra.mxu1 %v545_v24  ;;  %1534 = vmatpush.msra.mxu2 %v685_v25  ;;  %v726_v20 = vld [vmem:[%s4060_s14 + $0xb78] sm:$0xff]  ;;  %v416_v21 = vld [vmem:[%s4060_s14 + $0x1c8] sm:$0xff] }
 0x107   : > { %1553 = vmatpush.msra.mxu3 %v855_v6  ;;  %1455 = vmatmul.f32.vlgmr.msrb.gmra.mxu2 %v4475_v22  ;;  %v1157_v37 = vadd.f32 %v1156_v31, %v1137_v29  ;;  %v576_v23 = vld [vmem:[%s4060_s14 + $0x6c8] sm:$0xff]  ;;  %v886_v24 = vld [vmem:[%s4060_s14 + $0x1078] sm:$0xff] }
 0x108   : > { %1599 = vmatpush.msrb.mxu2 %v836_v7  ;;  %1493 = vmatpush.msra.mxu0 %v375_v28  ;;  %v716_v1 = vld [vmem:[%s4060_s14 + $0xb28] sm:$0xff]  ;;  %v406_v25 = vld [vmem:[%s4060_s14 + $0x178] sm:$0xff] }
 0x109   : > { %1513 = vmatpush.msra.mxu1 %v535_v32  ;;  %1554 = vmatpush.msra.mxu3 %v845_v34  ;;  %v1800_v41 = vadd.f32 %v1157_v37, %v346_v35  ;;  %v566_v26 = vld [vmem:[%s4060_s14 + $0x678] sm:$0xff]  ;;  %v876_v7 = vld [vmem:[%s4060_s14 + $0x1028] sm:$0xff] }
 0x10a   : > { %1475 = vmatmul.f32.vlgmr.msrb.gmra.mxu3 %v4483_v27  ;;  %1600 = vmatpush.msrb.mxu2 %v826_v36  ;;  %v706_v6 = vld [vmem:[%s4060_s14 + $0xad8] sm:$0xff]  ;;  %v396_v28 = vld [vmem:[%s4060_s14 + $0x128] sm:$0xff] }
 0x10b   : > { %1619 = vmatpush.msrb.mxu3 %v996_v38  ;;  %1494 = vmatpush.msra.mxu0 %v365_v39  ;;  %1810 = vst [vmem:[#allocation2 + $0x8] sm:$0xff] %v1800_v41  ;;  %v556_v29 = vld [vmem:[%s4060_s14 + $0x628] sm:$0xff]  ;;  %v866_v34 = vld [vmem:[%s4060_s14 + $0xfd8] sm:$0xff] }
 0x10c   : > { %1514 = vmatpush.msra.mxu1 %v525_v40  ;;  %1415 = vmatmul.f32.vlgmr.msrb.gmra.mxu0 %v4490_v30  ;;  %v696_v31 = vld [vmem:[%s4060_s14 + $0xa88] sm:$0xff]  ;;  %v386_v35 = vld [vmem:[%s4060_s14 + $0xd8] sm:$0xff] }
 0x10d   : > { %1435 = vmatmul.f32.vlgmr.msrb.gmra.mxu1 %v4496_v33  ;;  %1559 = vmatpush.msrb.mxu0 %v516_v42  ;;  %v546_v38 = vld [vmem:[%s4060_s14 + $0x5d8] sm:$0xff]  ;;  %v856_v41 = vld [vmem:[%s4060_s14 + $0xf88] sm:$0xff]  ;;  %v837_v42 = vld [vmem:[%s4060_s14 + $0xef0] sm:$0xff] }
 0x10e   : > { %1579 = vmatpush.msrb.mxu1 %v676_v43  ;;  %1601 = vmatpush.msrb.mxu2 %v816_v44  ;;  %v686_v39 = vld [vmem:[%s4060_s14 + $0xa38] sm:$0xff]  ;;  %v376_v43 = vld [vmem:[%s4060_s14 + $0x88] sm:$0xff] }
 0x10f   : > { %1620 = vmatpush.msrb.mxu3 %v986_v45  ;;  %1560 = vmatpush.msrb.mxu0 %v506_v46  ;;  %v536_v46 = vld [vmem:[%s4060_s14 + $0x588] sm:$0xff] }
 0x110   : > { %1580 = vmatpush.msrb.mxu1 %v666_v47  ;;  %1602 = vmatpush.msrb.mxu2 %v806_v48  ;;  %v846_v47 = vld [vmem:[%s4060_s14 + $0xf38] sm:$0xff]  ;;  %v347_v48 = vld [vmem:[#allocation2 + $0x10] sm:$0xff] }
 0x111   : > { %1621 = vmatpush.msrb.mxu3 %v976_v49  ;;  %1561 = vmatpush.msrb.mxu0 %v496_v50  ;;  %v827_v49 = vld [vmem:[%s4060_s14 + $0xea0] sm:$0xff] }
 0x112   : > { %1581 = vmatpush.msrb.mxu1 %v656_v51  ;;  %1603 = vmatpush.msrb.mxu2 %v796_v52  ;;  %v997_v51 = vld [vmem:[%s4060_s14 + $0x13f0] sm:$0xff]  ;;  %v366_v52 = vld [vmem:[%s4060_s14 + $0x38] sm:$0xff] }
 0x113   : > { %1622 = vmatpush.msrb.mxu3 %v966_v53  ;;  %1562 = vmatpush.msrb.mxu0 %v486_v54  ;;  %v526_v53 = vld [vmem:[%s4060_s14 + $0x538] sm:$0xff] }
 0x114   : > { %1582 = vmatpush.msrb.mxu1 %v646_v55  ;;  %1604 = vmatpush.msrb.mxu2 %v786_v56  ;;  %v517_v55 = vld [vmem:[%s4060_s14 + $0x4f0] sm:$0xff] }
 0x115   : > { %1623 = vmatpush.msrb.mxu3 %v956_v57  ;;  %1563 = vmatpush.msrb.mxu0 %v476_v58  ;;  %v677_v56 = vld [vmem:[%s4060_s14 + $0x9f0] sm:$0xff]  ;;  %v987_v58 = vld [vmem:[%s4060_s14 + $0x13a0] sm:$0xff] }
 0x116   : > { %1583 = vmatpush.msrb.mxu1 %v636_v59  ;;  %1605 = vmatpush.msrb.mxu2 %v776_v60  ;;  %v817_v57 = vld [vmem:[%s4060_s14 + $0xe50] sm:$0xff]  ;;  %v507_v59 = vld [vmem:[%s4060_s14 + $0x4a0] sm:$0xff] }
 0x117   : > { %1624 = vmatpush.msrb.mxu3 %v946_v62  ;;  %1564 = vmatpush.msrb.mxu0 %v466_v63  ;;  %v667_v60 = vld [vmem:[%s4060_s14 + $0x9a0] sm:$0xff]  ;;  %v977_v63 = vld [vmem:[%s4060_s14 + $0x1350] sm:$0xff] }
 0x118   : > { %1584 = vmatpush.msrb.mxu1 %v626_v0  ;;  %1606 = vmatpush.msrb.mxu2 %v766_v2  ;;  %v807_v62 = vld [vmem:[%s4060_s14 + $0xe00] sm:$0xff]  ;;  %v497_v0 = vld [vmem:[%s4060_s14 + $0x450] sm:$0xff] }
 0x119   : > { %1625 = vmatpush.msrb.mxu3 %v936_v3  ;;  %1565 = vmatpush.msrb.mxu0 %v456_v4  ;;  %v657_v2 = vld [vmem:[%s4060_s14 + $0x950] sm:$0xff]  ;;  %v967_v4 = vld [vmem:[%s4060_s14 + $0x1300] sm:$0xff] }
 0x11a   : > { %1585 = vmatpush.msrb.mxu1 %v616_v5  ;;  %1607 = vmatpush.msrb.mxu2 %v756_v8  ;;  %v797_v3 = vld [vmem:[%s4060_s14 + $0xdb0] sm:$0xff]  ;;  %v487_v5 = vld [vmem:[%s4060_s14 + $0x400] sm:$0xff] }
 0x11b   : > { %1626 = vmatpush.msrb.mxu3 %v926_v9  ;;  %1566 = vmatpush.msrb.mxu0 %v446_v10  ;;  %v647_v8 = vld [vmem:[%s4060_s14 + $0x900] sm:$0xff]  ;;  %v957_v10 = vld [vmem:[%s4060_s14 + $0x12b0] sm:$0xff] }
 0x11c   : > { %1586 = vmatpush.msrb.mxu1 %v606_v11  ;;  %1608 = vmatpush.msrb.mxu2 %v746_v12  ;;  %v787_v9 = vld [vmem:[%s4060_s14 + $0xd60] sm:$0xff]  ;;  %v477_v11 = vld [vmem:[%s4060_s14 + $0x3b0] sm:$0xff] }
 0x11d   : > { %1627 = vmatpush.msrb.mxu3 %v916_v13  ;;  %1567 = vmatpush.msrb.mxu0 %v436_v14  ;;  %v637_v12 = vld [vmem:[%s4060_s14 + $0x8b0] sm:$0xff]  ;;  %v947_v14 = vld [vmem:[%s4060_s14 + $0x1260] sm:$0xff] }
 0x11e   : > { %1587 = vmatpush.msrb.mxu1 %v596_v15  ;;  %1609 = vmatpush.msrb.mxu2 %v736_v16  ;;  %v777_v13 = vld [vmem:[%s4060_s14 + $0xd10] sm:$0xff]  ;;  %v467_v15 = vld [vmem:[%s4060_s14 + $0x360] sm:$0xff] }
 0x11f   : > { %1628 = vmatpush.msrb.mxu3 %v906_v17  ;;  %1568 = vmatpush.msrb.mxu0 %v426_v18  ;;  %v627_v16 = vld [vmem:[%s4060_s14 + $0x860] sm:$0xff]  ;;  %v937_v18 = vld [vmem:[%s4060_s14 + $0x1210] sm:$0xff] }
 0x120   : > { %1588 = vmatpush.msrb.mxu1 %v586_v19  ;;  %1610 = vmatpush.msrb.mxu2 %v726_v20  ;;  %v767_v17 = vld [vmem:[%s4060_s14 + $0xcc0] sm:$0xff]  ;;  %v457_v19 = vld [vmem:[%s4060_s14 + $0x310] sm:$0xff] }
 0x121   : > { %1629 = vmatpush.msrb.mxu3 %v896_v61  ;;  %1569 = vmatpush.msrb.mxu0 %v416_v21  ;;  %v617_v20 = vld [vmem:[%s4060_s14 + $0x810] sm:$0xff]  ;;  %v927_v21 = vld [vmem:[%s4060_s14 + $0x11c0] sm:$0xff] }
 0x122   : > { %1589 = vmatpush.msrb.mxu1 %v576_v23  ;;  %1611 = vmatpush.msrb.mxu2 %v716_v1  ;;  %v757_v61 = vld [vmem:[%s4060_s14 + $0xc70] sm:$0xff]  ;;  %v447_v23 = vld [vmem:[%s4060_s14 + $0x2c0] sm:$0xff] }
 0x123   : > { %1630 = vmatpush.msrb.mxu3 %v886_v24  ;;  %1570 = vmatpush.msrb.mxu0 %v406_v25  ;;  %v1176_v32 = vpop.f32.mrf.mxu0  ;;  %v607_v1 = vld [vmem:[%s4060_s14 + $0x7c0] sm:$0xff]  ;;  %v917_v25 = vld [vmem:[%s4060_s14 + $0x1170] sm:$0xff] }
 0x124   : > { %1590 = vmatpush.msrb.mxu1 %v566_v26  ;;  %1612 = vmatpush.msrb.mxu2 %v706_v6  ;;  %v1196_v36 = vpop.f32.mrf.mxu1  ;;  %v1216_v37 = vpop.f32.mrf.mxu2  ;;  %v747_v24 = vld [vmem:[%s4060_s14 + $0xc20] sm:$0xff]  ;;  %v437_v26 = vld [vmem:[%s4060_s14 + $0x270] sm:$0xff] }
 0x125   : > { %1631 = vmatpush.msrb.mxu3 %v876_v7  ;;  %1571 = vmatpush.msrb.mxu0 %v396_v28  ;;  %v1197_v40 = vadd.f32 %v1196_v36, %v1176_v32  ;;  %v597_v6 = vld [vmem:[%s4060_s14 + $0x770] sm:$0xff]  ;;  %v907_v28 = vld [vmem:[%s4060_s14 + $0x1120] sm:$0xff] }
 0x126   : > { %1591 = vmatpush.msrb.mxu1 %v556_v29  ;;  %1613 = vmatpush.msrb.mxu2 %v696_v31  ;;  %v737_v7 = vld [vmem:[%s4060_s14 + $0xbd0] sm:$0xff]  ;;  %v427_v29 = vld [vmem:[%s4060_s14 + $0x220] sm:$0xff] }
 0x127   : > { %1632 = vmatpush.msrb.mxu3 %v866_v34  ;;  %1572 = vmatpush.msrb.mxu0 %v386_v35  ;;  %v1217_v44 = vadd.f32 %v1216_v37, %v1197_v40  ;;  %v1236_v45 = vpop.f32.mrf.mxu3  ;;  %v587_v31 = vld [vmem:[%s4060_s14 + $0x720] sm:$0xff]  ;;  %v897_v34 = vld [vmem:[%s4060_s14 + $0x10d0] sm:$0xff] }
 0x128   : > { %1592 = vmatpush.msrb.mxu1 %v546_v38  ;;  %1614 = vmatpush.msrb.mxu2 %v686_v39  ;;  %v727_v32 = vld [vmem:[%s4060_s14 + $0xb80] sm:$0xff]  ;;  %v417_v35 = vld [vmem:[%s4060_s14 + $0x1d0] sm:$0xff] }
 0x129   : > { %1633 = vmatpush.msrb.mxu3 %v856_v41  ;;  %1535 = vmatmul.f32.vlgmr.msra.gmra.mxu2 %v4475_v22  ;;  %v1237_v50 = vadd.f32 %v1236_v45, %v1217_v44  ;;  %v577_v36 = vld [vmem:[%s4060_s14 + $0x6d0] sm:$0xff]  ;;  %v887_v38 = vld [vmem:[%s4060_s14 + $0x1080] sm:$0xff] }
 0x12a   : > { %1679 = vmatpush.msra.mxu2 %v837_v42  ;;  %1573 = vmatpush.msrb.mxu0 %v376_v43  ;;  %v717_v37 = vld [vmem:[%s4060_s14 + $0xb30] sm:$0xff]  ;;  %v407_v39 = vld [vmem:[%s4060_s14 + $0x180] sm:$0xff] }
 0x12b   : > { %1593 = vmatpush.msrb.mxu1 %v536_v46  ;;  %1634 = vmatpush.msrb.mxu3 %v846_v47  ;;  %v1801_v54 = vadd.f32 %v1237_v50, %v347_v48  ;;  %v567_v40 = vld [vmem:[%s4060_s14 + $0x680] sm:$0xff]  ;;  %v877_v42 = vld [vmem:[%s4060_s14 + $0x1030] sm:$0xff] }
 0x12c   : > { %1555 = vmatmul.f32.vlgmr.msra.gmra.mxu3 %v4483_v27  ;;  %1680 = vmatpush.msra.mxu2 %v827_v49  ;;  %v707_v41 = vld [vmem:[%s4060_s14 + $0xae0] sm:$0xff]  ;;  %v397_v43 = vld [vmem:[%s4060_s14 + $0x130] sm:$0xff] }
 0x12d   : > { %1699 = vmatpush.msra.mxu3 %v997_v51  ;;  %1574 = vmatpush.msrb.mxu0 %v366_v52  ;;  %1811 = vst [vmem:[#allocation2 + $0x10] sm:$0xff] %v1801_v54  ;;  %v557_v44 = vld [vmem:[%s4060_s14 + $0x630] sm:$0xff]  ;;  %v867_v47 = vld [vmem:[%s4060_s14 + $0xfe0] sm:$0xff] }
 0x12e   : > { %1594 = vmatpush.msrb.mxu1 %v526_v53  ;;  %1495 = vmatmul.f32.vlgmr.msra.gmra.mxu0 %v4490_v30  ;;  %v697_v45 = vld [vmem:[%s4060_s14 + $0xa90] sm:$0xff]  ;;  %v387_v48 = vld [vmem:[%s4060_s14 + $0xe0] sm:$0xff] }
 0x12f   : > { %1515 = vmatmul.f32.vlgmr.msra.gmra.mxu1 %v4496_v33  ;;  %1639 = vmatpush.msra.mxu0 %v517_v55  ;;  %v547_v51 = vld [vmem:[%s4060_s14 + $0x5e0] sm:$0xff]  ;;  %v857_v54 = vld [vmem:[%s4060_s14 + $0xf90] sm:$0xff]  ;;  %v838_v55 = vld [vmem:[%s4060_s14 + $0xef8] sm:$0xff] }
 0x130   : > { %1659 = vmatpush.msra.mxu1 %v677_v56  ;;  %1681 = vmatpush.msra.mxu2 %v817_v57  ;;  %v687_v52 = vld [vmem:[%s4060_s14 + $0xa40] sm:$0xff]  ;;  %v377_v56 = vld [vmem:[%s4060_s14 + $0x90] sm:$0xff] }
 0x131   : > { %1700 = vmatpush.msra.mxu3 %v987_v58  ;;  %1640 = vmatpush.msra.mxu0 %v507_v59  ;;  %v537_v59 = vld [vmem:[%s4060_s14 + $0x590] sm:$0xff] }
 0x132   : > { %1660 = vmatpush.msra.mxu1 %v667_v60  ;;  %1682 = vmatpush.msra.mxu2 %v807_v62  ;;  %v847_v60 = vld [vmem:[%s4060_s14 + $0xf40] sm:$0xff]  ;;  %v348_v62 = vld [vmem:[#allocation2 + $0x18] sm:$0xff] }
 0x133   : > { %1701 = vmatpush.msra.mxu3 %v977_v63  ;;  %1641 = vmatpush.msra.mxu0 %v497_v0  ;;  %v828_v63 = vld [vmem:[%s4060_s14 + $0xea8] sm:$0xff] }
 0x134   : > { %1661 = vmatpush.msra.mxu1 %v657_v2  ;;  %1683 = vmatpush.msra.mxu2 %v797_v3  ;;  %v998_v2 = vld [vmem:[%s4060_s14 + $0x13f8] sm:$0xff]  ;;  %v367_v3 = vld [vmem:[%s4060_s14 + $0x40] sm:$0xff] }
 0x135   : > { %1702 = vmatpush.msra.mxu3 %v967_v4  ;;  %1642 = vmatpush.msra.mxu0 %v487_v5  ;;  %v527_v4 = vld [vmem:[%s4060_s14 + $0x540] sm:$0xff] }
 0x136   : > { %1662 = vmatpush.msra.mxu1 %v647_v8  ;;  %1684 = vmatpush.msra.mxu2 %v787_v9  ;;  %v678_v8 = vld [vmem:[%s4060_s14 + $0x9f8] sm:$0xff] }
 0x137   : > { %1703 = vmatpush.msra.mxu3 %v957_v10  ;;  %1643 = vmatpush.msra.mxu0 %v477_v11  ;;  %v818_v9 = vld [vmem:[%s4060_s14 + $0xe58] sm:$0xff]  ;;  %v988_v10 = vld [vmem:[%s4060_s14 + $0x13a8] sm:$0xff] }
 0x138   : > { %1663 = vmatpush.msra.mxu1 %v637_v12  ;;  %1685 = vmatpush.msra.mxu2 %v777_v13  ;;  %v508_v11 = vld [vmem:[%s4060_s14 + $0x4a8] sm:$0xff]  ;;  %v978_v13 = vld [vmem:[%s4060_s14 + $0x1358] sm:$0xff] }
 0x139   : > { %1704 = vmatpush.msra.mxu3 %v947_v14  ;;  %1644 = vmatpush.msra.mxu0 %v467_v15  ;;  %v808_v12 = vld [vmem:[%s4060_s14 + $0xe08] sm:$0xff]  ;;  %v498_v14 = vld [vmem:[%s4060_s14 + $0x458] sm:$0xff] }
 0x13a   : > { %1664 = vmatpush.msra.mxu1 %v627_v16  ;;  %1686 = vmatpush.msra.mxu2 %v767_v17  ;;  %v798_v15 = vld [vmem:[%s4060_s14 + $0xdb8] sm:$0xff]  ;;  %v488_v16 = vld [vmem:[%s4060_s14 + $0x408] sm:$0xff] }
 0x13b   : > { %1705 = vmatpush.msra.mxu3 %v937_v18  ;;  %1645 = vmatpush.msra.mxu0 %v457_v19  ;;  %v648_v17 = vld [vmem:[%s4060_s14 + $0x908] sm:$0xff]  ;;  %v958_v19 = vld [vmem:[%s4060_s14 + $0x12b8] sm:$0xff] }
 0x13c   : > { %1665 = vmatpush.msra.mxu1 %v617_v20  ;;  %1687 = vmatpush.msra.mxu2 %v757_v61  ;;  %v788_v18 = vld [vmem:[%s4060_s14 + $0xd68] sm:$0xff]  ;;  %v478_v20 = vld [vmem:[%s4060_s14 + $0x3b8] sm:$0xff] }
 0x13d   : > { %1706 = vmatpush.msra.mxu3 %v927_v21  ;;  %1646 = vmatpush.msra.mxu0 %v447_v23  ;;  %v638_v61 = vld [vmem:[%s4060_s14 + $0x8b8] sm:$0xff]  ;;  %v948_v23 = vld [vmem:[%s4060_s14 + $0x1268] sm:$0xff] }
 0x13e   : > { %1666 = vmatpush.msra.mxu1 %v607_v1  ;;  %1688 = vmatpush.msra.mxu2 %v747_v24  ;;  %v778_v21 = vld [vmem:[%s4060_s14 + $0xd18] sm:$0xff]  ;;  %v468_v1 = vld [vmem:[%s4060_s14 + $0x368] sm:$0xff] }
 0x13f   : > { %1707 = vmatpush.msra.mxu3 %v917_v25  ;;  %1647 = vmatpush.msra.mxu0 %v437_v26  ;;  %v628_v24 = vld [vmem:[%s4060_s14 + $0x868] sm:$0xff]  ;;  %v938_v26 = vld [vmem:[%s4060_s14 + $0x1218] sm:$0xff] }
 0x140   : > { %1667 = vmatpush.msra.mxu1 %v597_v6  ;;  %1689 = vmatpush.msra.mxu2 %v737_v7  ;;  %v768_v25 = vld [vmem:[%s4060_s14 + $0xcc8] sm:$0xff]  ;;  %v458_v6 = vld [vmem:[%s4060_s14 + $0x318] sm:$0xff] }
 0x141   : > { %1708 = vmatpush.msra.mxu3 %v907_v28  ;;  %1648 = vmatpush.msra.mxu0 %v427_v29  ;;  %v618_v7 = vld [vmem:[%s4060_s14 + $0x818] sm:$0xff]  ;;  %v928_v29 = vld [vmem:[%s4060_s14 + $0x11c8] sm:$0xff] }
 0x142   : > { %1668 = vmatpush.msra.mxu1 %v587_v31  ;;  %1690 = vmatpush.msra.mxu2 %v727_v32  ;;  %v758_v28 = vld [vmem:[%s4060_s14 + $0xc78] sm:$0xff]  ;;  %v448_v31 = vld [vmem:[%s4060_s14 + $0x2c8] sm:$0xff] }
 0x143   : > { %1709 = vmatpush.msra.mxu3 %v897_v34  ;;  %1649 = vmatpush.msra.mxu0 %v417_v35  ;;  %v608_v32 = vld [vmem:[%s4060_s14 + $0x7c8] sm:$0xff]  ;;  %v918_v35 = vld [vmem:[%s4060_s14 + $0x1178] sm:$0xff] }
 0x144   : > { %1669 = vmatpush.msra.mxu1 %v577_v36  ;;  %1691 = vmatpush.msra.mxu2 %v717_v37  ;;  %v748_v34 = vld [vmem:[%s4060_s14 + $0xc28] sm:$0xff]  ;;  %v438_v36 = vld [vmem:[%s4060_s14 + $0x278] sm:$0xff] }
 0x145   : > { %1710 = vmatpush.msra.mxu3 %v887_v38  ;;  %1650 = vmatpush.msra.mxu0 %v407_v39  ;;  %v1256_v46 = vpop.f32.mrf.mxu0  ;;  %v598_v37 = vld [vmem:[%s4060_s14 + $0x778] sm:$0xff]  ;;  %v908_v39 = vld [vmem:[%s4060_s14 + $0x1128] sm:$0xff] }
 0x146   : > { %1670 = vmatpush.msra.mxu1 %v567_v40  ;;  %1692 = vmatpush.msra.mxu2 %v707_v41  ;;  %v1276_v49 = vpop.f32.mrf.mxu1  ;;  %v1296_v50 = vpop.f32.mrf.mxu2  ;;  %v738_v38 = vld [vmem:[%s4060_s14 + $0xbd8] sm:$0xff]  ;;  %v428_v40 = vld [vmem:[%s4060_s14 + $0x228] sm:$0xff] }
 0x147   : > { %1711 = vmatpush.msra.mxu3 %v877_v42  ;;  %1651 = vmatpush.msra.mxu0 %v397_v43  ;;  %v1277_v53 = vadd.f32 %v1276_v49, %v1256_v46  ;;  %v588_v41 = vld [vmem:[%s4060_s14 + $0x728] sm:$0xff]  ;;  %v898_v43 = vld [vmem:[%s4060_s14 + $0x10d8] sm:$0xff] }
 0x148   : > { %1671 = vmatpush.msra.mxu1 %v557_v44  ;;  %1693 = vmatpush.msra.mxu2 %v697_v45  ;;  %v728_v42 = vld [vmem:[%s4060_s14 + $0xb88] sm:$0xff]  ;;  %v418_v44 = vld [vmem:[%s4060_s14 + $0x1d8] sm:$0xff] }
 0x149   : > { %1712 = vmatpush.msra.mxu3 %v867_v47  ;;  %1652 = vmatpush.msra.mxu0 %v387_v48  ;;  %v1297_v57 = vadd.f32 %v1296_v50, %v1277_v53  ;;  %v1316_v58 = vpop.f32.mrf.mxu3  ;;  %v578_v45 = vld [vmem:[%s4060_s14 + $0x6d8] sm:$0xff]  ;;  %v888_v47 = vld [vmem:[%s4060_s14 + $0x1088] sm:$0xff]  ;;  %v3960_v48 = vld [vmem:[%s4055_s10 + $0x10] sm:$0xff] }
 0x14a   : > { %1672 = vmatpush.msra.mxu1 %v547_v51  ;;  %1694 = vmatpush.msra.mxu2 %v687_v52  ;;  %v718_v46 = vld [vmem:[%s4060_s14 + $0xb38] sm:$0xff]  ;;  %v408_v49 = vld [vmem:[%s4060_s14 + $0x188] sm:$0xff] }
 0x14b   : > { %1713 = vmatpush.msra.mxu3 %v857_v54  ;;  %1615 = vmatmul.f32.vlgmr.msrb.gmra.mxu2 %v4475_v22  ;;  %v1317_v0 = vadd.f32 %v1316_v58, %v1297_v57  ;;  %v518_v22 = vld [vmem:[%s4060_s14 + $0x4f8] sm:$0xff]  ;;  %v568_v50 = vld [vmem:[%s4060_s14 + $0x688] sm:$0xff] }
 0x14c   : > { %1759 = vmatpush.msrb.mxu2 %v838_v55  ;;  %1653 = vmatpush.msra.mxu0 %v377_v56  ;;  %v708_v51 = vld [vmem:[%s4060_s14 + $0xae8] sm:$0xff]  ;;  %v878_v52 = vld [vmem:[%s4060_s14 + $0x1038] sm:$0xff] }
 0x14d   : > { %1673 = vmatpush.msra.mxu1 %v537_v59  ;;  %1714 = vmatpush.msra.mxu3 %v847_v60  ;;  %v1802_v5 = vadd.f32 %v1317_v0, %v348_v62  ;;  %v3961_v54 = vld [vmem:[%s4055_s10 + $0x18] sm:$0xff]  ;;  %v3962_v62 = vld [vmem:[%s4055_s10] sm:$0xff]  ;;  %v388_v0 = vld [vmem:[%s4060_s14 + $0xe8] sm:$0xff] }
 0x14e   : > { %1635 = vmatmul.f32.vlgmr.msrb.gmra.mxu3 %v4483_v27  ;;  %1760 = vmatpush.msrb.mxu2 %v828_v63  ;;  %v668_v27 = vld [vmem:[%s4060_s14 + $0x9a8] sm:$0xff]  ;;  %v398_v55 = vld [vmem:[%s4060_s14 + $0x138] sm:$0xff] }
 0x14f   : > { %1779 = vmatpush.msrb.mxu3 %v998_v2  ;;  %1654 = vmatpush.msra.mxu0 %v367_v3  ;;  %1812 = vst [vmem:[#allocation2 + $0x18] sm:$0xff] %v1802_v5  ;;  %v558_v58 = vld [vmem:[%s4060_s14 + $0x638] sm:$0xff]  ;;  %v868_v63 = vld [vmem:[%s4060_s14 + $0xfe8] sm:$0xff] }
 0x150   : > { %1674 = vmatpush.msra.mxu1 %v527_v4  ;;  %1575 = vmatmul.f32.vlgmr.msrb.gmra.mxu0 %v4490_v30  ;;  %v658_v30 = vld [vmem:[%s4060_s14 + $0x958] sm:$0xff]  ;;  %v3963_v2 = vld [vmem:[%s4055_s10 + $0x8] sm:$0xff] }
 0x151   : > { %1595 = vmatmul.f32.vlgmr.msrb.gmra.mxu1 %v4496_v33  ;;  %1719 = vmatpush.msrb.mxu0 %v518_v22  ;;  %v968_v33 = vld [vmem:[%s4060_s14 + $0x1308] sm:$0xff]  ;;  %v698_v59 = vld [vmem:[%s4060_s14 + $0xa98] sm:$0xff] }
 0x152   : > { %1739 = vmatpush.msrb.mxu1 %v678_v8  ;;  %1761 = vmatpush.msrb.mxu2 %v818_v9  ;;  %v548_v3 = vld [vmem:[%s4060_s14 + $0x5e8] sm:$0xff]  ;;  %v858_v8 = vld [vmem:[%s4060_s14 + $0xf98] sm:$0xff]  ;;  %v349_v9 = vld [vmem:[#allocation2 + $0x20] sm:$0xff] }
 0x153   : > { %1780 = vmatpush.msrb.mxu3 %v988_v10  ;;  %1720 = vmatpush.msrb.mxu0 %v508_v11  ;;  %v688_v4 = vld [vmem:[%s4060_s14 + $0xa48] sm:$0xff]  ;;  %v378_v10 = vld [vmem:[%s4060_s14 + $0x98] sm:$0xff] }
 0x154   : > { %1740 = vmatpush.msrb.mxu1 %v668_v27  ;;  %1762 = vmatpush.msrb.mxu2 %v808_v12  ;;  %v538_v11 = vld [vmem:[%s4060_s14 + $0x598] sm:$0xff]  ;;  %v848_v12 = vld [vmem:[%s4060_s14 + $0xf48] sm:$0xff] }
 0x155   : > { %1781 = vmatpush.msrb.mxu3 %v978_v13  ;;  %1721 = vmatpush.msrb.mxu0 %v498_v14  ;;  %v368_v13 = vld [vmem:[%s4060_s14 + $0x48] sm:$0xff] }
 0x156   : > { %1741 = vmatpush.msrb.mxu1 %v658_v30  ;;  %1763 = vmatpush.msrb.mxu2 %v798_v15  ;;  %v528_v30 = vld [vmem:[%s4060_s14 + $0x548] sm:$0xff] }
 0x157   : > { %1782 = vmatpush.msrb.mxu3 %v968_v33  ;;  %1722 = vmatpush.msrb.mxu0 %v488_v16 }
 0x158   : > { %1742 = vmatpush.msrb.mxu1 %v648_v17  ;;  %1764 = vmatpush.msrb.mxu2 %v788_v18 }
 0x159   : > { %1783 = vmatpush.msrb.mxu3 %v958_v19  ;;  %1723 = vmatpush.msrb.mxu0 %v478_v20  ;;  %v350_v20 = vld [vmem:[#allocation2 + $0x28] sm:$0xff] }
 0x15a   : > { %1743 = vmatpush.msrb.mxu1 %v638_v61  ;;  %1765 = vmatpush.msrb.mxu2 %v778_v21 }
 0x15b   : > { %1784 = vmatpush.msrb.mxu3 %v948_v23  ;;  %1724 = vmatpush.msrb.mxu0 %v468_v1 }
 0x15c   : > { %1744 = vmatpush.msrb.mxu1 %v628_v24  ;;  %1766 = vmatpush.msrb.mxu2 %v768_v25 }
 0x15d   : > { %1785 = vmatpush.msrb.mxu3 %v938_v26  ;;  %1725 = vmatpush.msrb.mxu0 %v458_v6 }
 0x15e   : > { %1745 = vmatpush.msrb.mxu1 %v618_v7  ;;  %1767 = vmatpush.msrb.mxu2 %v758_v28  ;;  %v351_v7 = vld [vmem:[#allocation2 + $0x30] sm:$0xff] }
 0x15f   : > { %1786 = vmatpush.msrb.mxu3 %v928_v29  ;;  %1726 = vmatpush.msrb.mxu0 %v448_v31 }
 0x160   : > { %1746 = vmatpush.msrb.mxu1 %v608_v32  ;;  %1768 = vmatpush.msrb.mxu2 %v748_v34 }
 0x161   : > { %1787 = vmatpush.msrb.mxu3 %v918_v35  ;;  %1727 = vmatpush.msrb.mxu0 %v438_v36 }
 0x162   : > { %1747 = vmatpush.msrb.mxu1 %v598_v37  ;;  %1769 = vmatpush.msrb.mxu2 %v738_v38  ;;  %v352_v38 = vld [vmem:[#allocation2 + $0x38] sm:$0xff] }
 0x163   : > { %1788 = vmatpush.msrb.mxu3 %v908_v39  ;;  %1728 = vmatpush.msrb.mxu0 %v428_v40 }
 0x164   : > { %1748 = vmatpush.msrb.mxu1 %v588_v41  ;;  %1770 = vmatpush.msrb.mxu2 %v728_v42 }
 0x165   : > { %1789 = vmatpush.msrb.mxu3 %v898_v43  ;;  %1695 = vmatmul.f32.vlgmr.msra.gmra.mxu2 %v3960_v48 }
 0x166   : > { %1729 = vmatpush.msrb.mxu0 %v418_v44  ;;  %1749 = vmatpush.msrb.mxu1 %v578_v45 }
 0x167   : > { %1771 = vmatpush.msrb.mxu2 %v718_v46  ;;  %1790 = vmatpush.msrb.mxu3 %v888_v47  ;;  %v1336_v53 = vpop.f32.mrf.mxu0  ;;  %v353_v47 = vld [vmem:[#allocation2 + $0x40] sm:$0xff] }
 0x168   : > { %1715 = vmatmul.f32.vlgmr.msra.gmra.mxu3 %v3961_v54  ;;  %1730 = vmatpush.msrb.mxu0 %v408_v49  ;;  %v1356_v56 = vpop.f32.mrf.mxu1  ;;  %v1376_v57 = vpop.f32.mrf.mxu2 }
 0x169   : > { %1750 = vmatpush.msrb.mxu1 %v568_v50  ;;  %1772 = vmatpush.msrb.mxu2 %v708_v51  ;;  %v1357_v60 = vadd.f32 %v1356_v56, %v1336_v53 }
 0x16a   : > { %1791 = vmatpush.msrb.mxu3 %v878_v52  ;;  %1655 = vmatmul.f32.vlgmr.msra.gmra.mxu0 %v3962_v62 }
 0x16b   : > { %1675 = vmatmul.f32.vlgmr.msra.gmra.mxu1 %v3963_v2  ;;  %1731 = vmatpush.msrb.mxu0 %v398_v55  ;;  %v1377_v5 = vadd.f32 %v1376_v57, %v1357_v60  ;;  %v1396_v22 = vpop.f32.mrf.mxu3  ;;  %v354_v55 = vld [vmem:[#allocation2 + $0x48] sm:$0xff] }
 0x16c   : > { %1751 = vmatpush.msrb.mxu1 %v558_v58  ;;  %1773 = vmatpush.msrb.mxu2 %v698_v59 }
 0x16d   : > { %1792 = vmatpush.msrb.mxu3 %v868_v63  ;;  %1732 = vmatpush.msrb.mxu0 %v388_v0  ;;  %v1397_v27 = vadd.f32 %v1396_v22, %v1377_v5 }
 0x16e   : > { %1752 = vmatpush.msrb.mxu1 %v548_v3  ;;  %1774 = vmatpush.msrb.mxu2 %v688_v4 }
 0x16f   : > { %1793 = vmatpush.msrb.mxu3 %v858_v8  ;;  %1775 = vmatmul.f32.vlgmr.msrb.gmra.mxu2 %v3960_v48  ;;  %v1803_v14 = vadd.f32 %v1397_v27, %v349_v9 }
 0x170   : > { %1733 = vmatpush.msrb.mxu0 %v378_v10  ;;  %1753 = vmatpush.msrb.mxu1 %v538_v11 }
 0x171   : > { %1794 = vmatpush.msrb.mxu3 %v848_v12  ;;  %1813 = vst [vmem:[#allocation2 + $0x20] sm:$0xff] %v1803_v14 }
 0x172   : > { %1795 = vmatmul.f32.vlgmr.msrb.gmra.mxu3 %v3961_v54  ;;  %1734 = vmatpush.msrb.mxu0 %v368_v13 }
 0x173   : > { %1754 = vmatpush.msrb.mxu1 %v528_v30  ;;  %1735 = vmatmul.f32.vlgmr.msrb.gmra.mxu0 %v3962_v62 }
 0x174   : > { %1755 = vmatmul.f32.vlgmr.msrb.gmra.mxu1 %v3963_v2 }
 0x189   : > { %v1416_v15 = vpop.f32.mrf.mxu0 }
 0x18a   : > { %v1436_v33 = vpop.f32.mrf.mxu1  ;;  %v1456_v16 = vpop.f32.mrf.mxu2 }
 0x18b   : > { %v1437_v17 = vadd.f32 %v1436_v33, %v1416_v15 }
 0x18d   : > { %v1457_v18 = vadd.f32 %v1456_v16, %v1437_v17  ;;  %v1476_v19 = vpop.f32.mrf.mxu3 }
 0x18f   : > { %v1477_v61 = vadd.f32 %v1476_v19, %v1457_v18 }
 0x191   : > { %v1804_v21 = vadd.f32 %v1477_v61, %v350_v20 }
 0x193   : > { %1814 = vst [vmem:[#allocation2 + $0x28] sm:$0xff] %v1804_v21 }
 0x1ab   : > { %v1496_v23 = vpop.f32.mrf.mxu0 }
 0x1ac   : > { %v1516_v1 = vpop.f32.mrf.mxu1  ;;  %v1536_v24 = vpop.f32.mrf.mxu2 }
 0x1ad   : > { %v1517_v25 = vadd.f32 %v1516_v1, %v1496_v23 }
 0x1af   : > { %v1537_v26 = vadd.f32 %v1536_v24, %v1517_v25  ;;  %v1556_v6 = vpop.f32.mrf.mxu3 }
 0x1b1   : > { %v1557_v28 = vadd.f32 %v1556_v6, %v1537_v26 }
 0x1b3   : > { %v1805_v29 = vadd.f32 %v1557_v28, %v351_v7 }
 0x1b5   : > { %1815 = vst [vmem:[#allocation2 + $0x30] sm:$0xff] %v1805_v29 }
 0x1cd   : > { %v1576_v31 = vpop.f32.mrf.mxu0 }
 0x1ce   : > { %v1596_v32 = vpop.f32.mrf.mxu1  ;;  %v1616_v34 = vpop.f32.mrf.mxu2 }
 0x1cf   : > { %v1597_v35 = vadd.f32 %v1596_v32, %v1576_v31 }
 0x1d1   : > { %v1617_v36 = vadd.f32 %v1616_v34, %v1597_v35  ;;  %v1636_v37 = vpop.f32.mrf.mxu3 }
 0x1d3   : > { %v1637_v39 = vadd.f32 %v1636_v37, %v1617_v36 }
 0x1d5   : > { %v1806_v40 = vadd.f32 %v1637_v39, %v352_v38 }
 0x1d7   : > { %1816 = vst [vmem:[#allocation2 + $0x38] sm:$0xff] %v1806_v40 }
 0x1e7   : > { %v1656_v41 = vpop.f32.mrf.mxu0 }
 0x1e8   : > { %v1676_v42 = vpop.f32.mrf.mxu1  ;;  %v1696_v43 = vpop.f32.mrf.mxu2 }
 0x1e9   : > { %v1677_v44 = vadd.f32 %v1676_v42, %v1656_v41 }
 0x1eb   : > { %v1697_v45 = vadd.f32 %v1696_v43, %v1677_v44  ;;  %v1716_v46 = vpop.f32.mrf.mxu3 }
 0x1ed   : > { %v1717_v48 = vadd.f32 %v1716_v46, %v1697_v45 }
 0x1ef   : > { %v1807_v49 = vadd.f32 %v1717_v48, %v353_v47 }
 0x1f0   : > { %v1736_v50 = vpop.f32.mrf.mxu0 }
 0x1f1   : > { %1817 = vst [vmem:[#allocation2 + $0x40] sm:$0xff] %v1807_v49  ;;  %v1756_v51 = vpop.f32.mrf.mxu1 }
 0x1f2   : > { %v1757_v52 = vadd.f32 %v1756_v51, %v1736_v50  ;;  %v1776_v53 = vpop.f32.mrf.mxu2 }
 0x1f4   : > { %v1777_v54 = vadd.f32 %v1776_v53, %v1757_v52 }
 0x1f5   : > { %v1796_v56 = vpop.f32.mrf.mxu3 }
 0x1f6   : > { %v1797_v57 = vadd.f32 %v1796_v56, %v1777_v54  ;;  %1823 = sbr.rel (%p3920_p7) target bundleno = 1187 (0x4a3), region = 56 }
 0x1f8   : > { %v1808_v58 = vadd.f32 %v1797_v57, %v354_v55 }
 0x1fa   : > { %1819 = vst.msk [vmem:[#allocation2 + $0x48] sm:$0xff] %vm1818_vm1, %v1808_v58 }
 0x1fb   : > { %v1953_v59 = vld [vmem:[%s7419_s3 + $0x258] sm:$0xff]  ;;  %v1948_v0 = vld [vmem:[%s7419_s3 + $0x230] sm:$0xff]  ;;  %v1943_v5 = vld [vmem:[%s7419_s3 + $0x208] sm:$0xff]  ;;  %vm3727_vm2 = vcmask 719872   ;;  %vm3832_vm3 = vcmask 80896  }
 0x1fc   : > { %v2033_v60 = vld [vmem:[%s7419_s3 + $0x4d8] sm:$0xff]  ;;  %2643 = vmatpush.msra.mxu0 %v1953_v59  ;;  %v2028_v2 = vld [vmem:[%s7419_s3 + $0x4b0] sm:$0xff]  ;;  %v2023_v22 = vld [vmem:[%s7419_s3 + $0x488] sm:$0xff] }
 0x1fd   : > { %v2113_v62 = vld [vmem:[%s7419_s3 + $0x758] sm:$0xff]  ;;  %2663 = vmatpush.msra.mxu1 %v2033_v60  ;;  %v2108_v3 = vld [vmem:[%s7419_s3 + $0x730] sm:$0xff]  ;;  %v2103_v8 = vld [vmem:[%s7419_s3 + $0x708] sm:$0xff] }
 0x1fe   : > { %v2193_v63 = vld [vmem:[%s7419_s3 + $0x9d8] sm:$0xff]  ;;  %2683 = vmatpush.msra.mxu2 %v2113_v62  ;;  %v2188_v4 = vld [vmem:[%s7419_s3 + $0x9b0] sm:$0xff]  ;;  %2644 = vmatpush.msra.mxu0 %v1948_v0  ;;  %v2183_v9 = vld [vmem:[%s7419_s3 + $0x988] sm:$0xff] }
 0x1ff   : > { %2703 = vmatpush.msra.mxu3 %v2193_v63  ;;  %2664 = vmatpush.msra.mxu1 %v2028_v2  ;;  %v1938_v10 = vld [vmem:[%s7419_s3 + $0x1e0] sm:$0xff]  ;;  %v1933_v13 = vld [vmem:[%s7419_s3 + $0x1b8] sm:$0xff]  ;;  %v1928_v33 = vld [vmem:[%s7419_s3 + $0x190] sm:$0xff] }
 0x200   : > { %2684 = vmatpush.msra.mxu2 %v2108_v3  ;;  %v2018_v11 = vld [vmem:[%s7419_s3 + $0x460] sm:$0xff]  ;;  %2645 = vmatpush.msra.mxu0 %v1943_v5  ;;  %v2013_v14 = vld [vmem:[%s7419_s3 + $0x438] sm:$0xff]  ;;  %v2008_v16 = vld [vmem:[%s7419_s3 + $0x410] sm:$0xff] }
 0x201   : > { %2704 = vmatpush.msra.mxu3 %v2188_v4  ;;  %2665 = vmatpush.msra.mxu1 %v2023_v22  ;;  %v2098_v27 = vld [vmem:[%s7419_s3 + $0x6e0] sm:$0xff]  ;;  %v2093_v30 = vld [vmem:[%s7419_s3 + $0x6b8] sm:$0xff]  ;;  %v2088_v17 = vld [vmem:[%s7419_s3 + $0x690] sm:$0xff] }
 0x202   : > { %v2178_v12 = vld [vmem:[%s7419_s3 + $0x960] sm:$0xff]  ;;  %2685 = vmatpush.msra.mxu2 %v2103_v8  ;;  %2646 = vmatpush.msra.mxu0 %v1938_v10  ;;  %v2173_v15 = vld [vmem:[%s7419_s3 + $0x938] sm:$0xff]  ;;  %v2168_v18 = vld [vmem:[%s7419_s3 + $0x910] sm:$0xff] }
 0x203   : > { %2705 = vmatpush.msra.mxu3 %v2183_v9  ;;  %2666 = vmatpush.msra.mxu1 %v2018_v11  ;;  %v1923_v19 = vld [vmem:[%s7419_s3 + $0x168] sm:$0xff]  ;;  %v1918_v23 = vld [vmem:[%s7419_s3 + $0x140] sm:$0xff]  ;;  %v1913_v26 = vld [vmem:[%s7419_s3 + $0x118] sm:$0xff] }
 0x204   : > { %2686 = vmatpush.msra.mxu2 %v2098_v27  ;;  %2647 = vmatpush.msra.mxu0 %v1933_v13  ;;  %v2003_v20 = vld [vmem:[%s7419_s3 + $0x3e8] sm:$0xff]  ;;  %v1998_v1 = vld [vmem:[%s7419_s3 + $0x3c0] sm:$0xff]  ;;  %v1993_v6 = vld [vmem:[%s7419_s3 + $0x398] sm:$0xff] }
 0x205   : > { %2706 = vmatpush.msra.mxu3 %v2178_v12  ;;  %2667 = vmatpush.msra.mxu1 %v2013_v14  ;;  %v2083_v61 = vld [vmem:[%s7419_s3 + $0x668] sm:$0xff]  ;;  %v2078_v24 = vld [vmem:[%s7419_s3 + $0x640] sm:$0xff]  ;;  %v2073_v7 = vld [vmem:[%s7419_s3 + $0x618] sm:$0xff] }
 0x206   : > { %2687 = vmatpush.msra.mxu2 %v2093_v30  ;;  %2648 = vmatpush.msra.mxu0 %v1928_v33  ;;  %v2163_v21 = vld [vmem:[%s7419_s3 + $0x8e8] sm:$0xff]  ;;  %v2158_v25 = vld [vmem:[%s7419_s3 + $0x8c0] sm:$0xff]  ;;  %v2153_v28 = vld [vmem:[%s7419_s3 + $0x898] sm:$0xff] }
 0x207   : > { %2707 = vmatpush.msra.mxu3 %v2173_v15  ;;  %2668 = vmatpush.msra.mxu1 %v2008_v16  ;;  %v1908_v29 = vld [vmem:[%s7419_s3 + $0xf0] sm:$0xff]  ;;  %v1903_v35 = vld [vmem:[%s7419_s3 + $0xc8] sm:$0xff]  ;;  %v1898_v39 = vld [vmem:[%s7419_s3 + $0xa0] sm:$0xff] }
 0x208   : > { %2688 = vmatpush.msra.mxu2 %v2088_v17  ;;  %2649 = vmatpush.msra.mxu0 %v1923_v19  ;;  %v1988_v31 = vld [vmem:[%s7419_s3 + $0x370] sm:$0xff]  ;;  %v1983_v36 = vld [vmem:[%s7419_s3 + $0x348] sm:$0xff]  ;;  %v1978_v40 = vld [vmem:[%s7419_s3 + $0x320] sm:$0xff] }
 0x209   : > { %2708 = vmatpush.msra.mxu3 %v2168_v18  ;;  %2669 = vmatpush.msra.mxu1 %v2003_v20  ;;  %v2068_v32 = vld [vmem:[%s7419_s3 + $0x5f0] sm:$0xff]  ;;  %v2063_v37 = vld [vmem:[%s7419_s3 + $0x5c8] sm:$0xff]  ;;  %v2058_v41 = vld [vmem:[%s7419_s3 + $0x5a0] sm:$0xff] }
 0x20a   : > { %2689 = vmatpush.msra.mxu2 %v2083_v61  ;;  %2650 = vmatpush.msra.mxu0 %v1918_v23  ;;  %v2148_v34 = vld [vmem:[%s7419_s3 + $0x870] sm:$0xff]  ;;  %v2143_v38 = vld [vmem:[%s7419_s3 + $0x848] sm:$0xff]  ;;  %v2138_v42 = vld [vmem:[%s7419_s3 + $0x820] sm:$0xff] }
 0x20b   : > { %2709 = vmatpush.msra.mxu3 %v2163_v21  ;;  %2670 = vmatpush.msra.mxu1 %v1998_v1  ;;  %v1893_v43 = vld [vmem:[%s7419_s3 + $0x78] sm:$0xff]  ;;  %v1888_v47 = vld [vmem:[%s7419_s3 + $0x50] sm:$0xff]  ;;  %v1883_v51 = vld [vmem:[%s7419_s3 + $0x28] sm:$0xff] }
 0x20c   : > { %2690 = vmatpush.msra.mxu2 %v2078_v24  ;;  %2651 = vmatpush.msra.mxu0 %v1913_v26  ;;  %v1973_v44 = vld [vmem:[%s7419_s3 + $0x2f8] sm:$0xff]  ;;  %v1968_v48 = vld [vmem:[%s7419_s3 + $0x2d0] sm:$0xff]  ;;  %v1963_v52 = vld [vmem:[%s7419_s3 + $0x2a8] sm:$0xff] }
 0x20d   : > { %2710 = vmatpush.msra.mxu3 %v2158_v25  ;;  %2671 = vmatpush.msra.mxu1 %v1993_v6  ;;  %v2053_v45 = vld [vmem:[%s7419_s3 + $0x578] sm:$0xff]  ;;  %v2048_v49 = vld [vmem:[%s7419_s3 + $0x550] sm:$0xff]  ;;  %v2043_v53 = vld [vmem:[%s7419_s3 + $0x528] sm:$0xff] }
 0x20e   : > { %2691 = vmatpush.msra.mxu2 %v2073_v7  ;;  %2652 = vmatpush.msra.mxu0 %v1908_v29  ;;  %v2133_v46 = vld [vmem:[%s7419_s3 + $0x7f8] sm:$0xff]  ;;  %v2128_v50 = vld [vmem:[%s7419_s3 + $0x7d0] sm:$0xff]  ;;  %v2123_v54 = vld [vmem:[%s7419_s3 + $0x7a8] sm:$0xff] }
 0x20f   : > { %2711 = vmatpush.msra.mxu3 %v2153_v28  ;;  %2672 = vmatpush.msra.mxu1 %v1988_v31  ;;  %v1878_v55 = vld [vmem:[%s7419_s3] sm:$0xff]  ;;  %v2273_v59 = vld [vmem:[%s7419_s3 + $0xc58] sm:$0xff]  ;;  %v2268_v0 = vld [vmem:[%s7419_s3 + $0xc30] sm:$0xff] }
 0x210   : > { %2692 = vmatpush.msra.mxu2 %v2068_v32  ;;  %2653 = vmatpush.msra.mxu0 %v1903_v35  ;;  %v1958_v56 = vld [vmem:[%s7419_s3 + $0x280] sm:$0xff]  ;;  %v2353_v60 = vld [vmem:[%s7419_s3 + $0xed8] sm:$0xff]  ;;  %v2348_v2 = vld [vmem:[%s7419_s3 + $0xeb0] sm:$0xff] }
 0x211   : > { %2712 = vmatpush.msra.mxu3 %v2148_v34  ;;  %2673 = vmatpush.msra.mxu1 %v1983_v36  ;;  %v2038_v57 = vld [vmem:[%s7419_s3 + $0x500] sm:$0xff]  ;;  %v2433_v62 = vld [vmem:[%s7419_s3 + $0x1158] sm:$0xff]  ;;  %v2428_v3 = vld [vmem:[%s7419_s3 + $0x1130] sm:$0xff] }
 0x212   : > { %2693 = vmatpush.msra.mxu2 %v2063_v37  ;;  %2654 = vmatpush.msra.mxu0 %v1898_v39  ;;  %v2118_v58 = vld [vmem:[%s7419_s3 + $0x780] sm:$0xff]  ;;  %v2513_v63 = vld [vmem:[%s7419_s3 + $0x13d8] sm:$0xff]  ;;  %v2508_v4 = vld [vmem:[%s7419_s3 + $0x13b0] sm:$0xff] }
 0x213   : > { %2713 = vmatpush.msra.mxu3 %v2143_v38  ;;  %2674 = vmatpush.msra.mxu1 %v1978_v40  ;;  %v2263_v5 = vld [vmem:[%s7419_s3 + $0xc08] sm:$0xff]  ;;  %v2258_v10 = vld [vmem:[%s7419_s3 + $0xbe0] sm:$0xff]  ;;  %v2253_v13 = vld [vmem:[%s7419_s3 + $0xbb8] sm:$0xff] }
 0x214   : > { %2694 = vmatpush.msra.mxu2 %v2058_v41  ;;  %2655 = vmatpush.msra.mxu0 %v1893_v43  ;;  %v2343_v22 = vld [vmem:[%s7419_s3 + $0xe88] sm:$0xff]  ;;  %v2338_v11 = vld [vmem:[%s7419_s3 + $0xe60] sm:$0xff]  ;;  %v2333_v14 = vld [vmem:[%s7419_s3 + $0xe38] sm:$0xff] }
 0x215   : > { %2714 = vmatpush.msra.mxu3 %v2138_v42  ;;  %2675 = vmatpush.msra.mxu1 %v1973_v44  ;;  %v2423_v8 = vld [vmem:[%s7419_s3 + $0x1108] sm:$0xff]  ;;  %v2418_v27 = vld [vmem:[%s7419_s3 + $0x10e0] sm:$0xff]  ;;  %v2413_v30 = vld [vmem:[%s7419_s3 + $0x10b8] sm:$0xff] }
 0x216   : > { %2695 = vmatpush.msra.mxu2 %v2053_v45  ;;  %2656 = vmatpush.msra.mxu0 %v1888_v47  ;;  %v2503_v9 = vld [vmem:[%s7419_s3 + $0x1388] sm:$0xff]  ;;  %v2498_v12 = vld [vmem:[%s7419_s3 + $0x1360] sm:$0xff]  ;;  %v2493_v15 = vld [vmem:[%s7419_s3 + $0x1338] sm:$0xff] }
 0x217   : > { %2715 = vmatpush.msra.mxu3 %v2133_v46  ;;  %2676 = vmatpush.msra.mxu1 %v1968_v48  ;;  %v2248_v33 = vld [vmem:[%s7419_s3 + $0xb90] sm:$0xff]  ;;  %v2243_v19 = vld [vmem:[%s7419_s3 + $0xb68] sm:$0xff]  ;;  %v2238_v23 = vld [vmem:[%s7419_s3 + $0xb40] sm:$0xff] }
 0x218   : > { %2696 = vmatpush.msra.mxu2 %v2048_v49  ;;  %2657 = vmatpush.msra.mxu0 %v1883_v51  ;;  %v2328_v16 = vld [vmem:[%s7419_s3 + $0xe10] sm:$0xff]  ;;  %v2323_v20 = vld [vmem:[%s7419_s3 + $0xde8] sm:$0xff]  ;;  %v2318_v1 = vld [vmem:[%s7419_s3 + $0xdc0] sm:$0xff] }
 0x219   : > { %2716 = vmatpush.msra.mxu3 %v2128_v50  ;;  %2677 = vmatpush.msra.mxu1 %v1963_v52  ;;  %v2408_v17 = vld [vmem:[%s7419_s3 + $0x1090] sm:$0xff]  ;;  %v2403_v61 = vld [vmem:[%s7419_s3 + $0x1068] sm:$0xff]  ;;  %v2398_v24 = vld [vmem:[%s7419_s3 + $0x1040] sm:$0xff] }
 0x21a   : > { %2697 = vmatpush.msra.mxu2 %v2043_v53  ;;  %2658 = vmatpush.msra.mxu0 %v1878_v55  ;;  %v2488_v18 = vld [vmem:[%s7419_s3 + $0x1310] sm:$0xff]  ;;  %v2483_v21 = vld [vmem:[%s7419_s3 + $0x12e8] sm:$0xff]  ;;  %v2478_v25 = vld [vmem:[%s7419_s3 + $0x12c0] sm:$0xff] }
 0x21b   : > { %2717 = vmatpush.msra.mxu3 %v2123_v54  ;;  %2678 = vmatpush.msra.mxu1 %v1958_v56  ;;  %v2233_v26 = vld [vmem:[%s7419_s3 + $0xb18] sm:$0xff]  ;;  %v2228_v29 = vld [vmem:[%s7419_s3 + $0xaf0] sm:$0xff]  ;;  %v2223_v35 = vld [vmem:[%s7419_s3 + $0xac8] sm:$0xff] }
 0x21c   : > { %2698 = vmatpush.msra.mxu2 %v2038_v57  ;;  %2723 = vmatpush.msrb.mxu0 %v2273_v59  ;;  %v2313_v6 = vld [vmem:[%s7419_s3 + $0xd98] sm:$0xff]  ;;  %v2308_v31 = vld [vmem:[%s7419_s3 + $0xd70] sm:$0xff]  ;;  %v2303_v36 = vld [vmem:[%s7419_s3 + $0xd48] sm:$0xff] }
 0x21d   : > { %2718 = vmatpush.msra.mxu3 %v2118_v58  ;;  %2743 = vmatpush.msrb.mxu1 %v2353_v60  ;;  %v2393_v7 = vld [vmem:[%s7419_s3 + $0x1018] sm:$0xff]  ;;  %v2388_v32 = vld [vmem:[%s7419_s3 + $0xff0] sm:$0xff]  ;;  %v5086_v37 = vld [vmem:[%s7418_s2] sm:$0xff] }
 0x21e   : > { %2763 = vmatpush.msrb.mxu2 %v2433_v62  ;;  %2724 = vmatpush.msrb.mxu0 %v2268_v0  ;;  %v2473_v28 = vld [vmem:[%s7419_s3 + $0x1298] sm:$0xff]  ;;  %v2468_v34 = vld [vmem:[%s7419_s3 + $0x1270] sm:$0xff]  ;;  %v2383_v38 = vld [vmem:[%s7419_s3 + $0xfc8] sm:$0xff]  ;;  %v1838_v46 = vperm.slane %v5086_v37, 0  ;;  %v1839_v47 = vperm.slane %v5086_v37, 1  ;;  %v1840_v51 = vperm.slane %v5086_v37, 2 }
 0x21f   : > { %2783 = vmatpush.msrb.mxu3 %v2513_v63  ;;  %2744 = vmatpush.msrb.mxu1 %v2348_v2  ;;  %v2463_v39 = vld [vmem:[%s7419_s3 + $0x1248] sm:$0xff]  ;;  %v2218_v40 = vld [vmem:[%s7419_s3 + $0xaa0] sm:$0xff]  ;;  %v2213_v44 = vld [vmem:[%s7419_s3 + $0xa78] sm:$0xff]  ;;  %v1841_v52 = vperm.slane %v5086_v37, 3 }
 0x220   : > { %2764 = vmatpush.msrb.mxu2 %v2428_v3  ;;  %2725 = vmatpush.msrb.mxu0 %v2263_v5  ;;  %v2298_v41 = vld [vmem:[%s7419_s3 + $0xd20] sm:$0xff]  ;;  %v2293_v45 = vld [vmem:[%s7419_s3 + $0xcf8] sm:$0xff]  ;;  %v1825_v50 = vld [vmem:[#allocation2 + $0x8] sm:$0xff] }
 0x221   : > { %2784 = vmatpush.msrb.mxu3 %v2508_v4  ;;  %2745 = vmatpush.msrb.mxu1 %v2343_v22  ;;  %v2378_v42 = vld [vmem:[%s7419_s3 + $0xfa0] sm:$0xff]  ;;  %v2373_v48 = vld [vmem:[%s7419_s3 + $0xf78] sm:$0xff]  ;;  %v1826_v54 = vld [vmem:[#allocation2 + $0x10] sm:$0xff]  ;;  %v1859_v62 = vadd.f32 %v1839_v47, %v1825_v50 }
 0x222   : > { %2765 = vmatpush.msrb.mxu2 %v2423_v8  ;;  %2726 = vmatpush.msrb.mxu0 %v2258_v10  ;;  %v2458_v43 = vld [vmem:[%s7419_s3 + $0x1220] sm:$0xff]  ;;  %v2453_v53 = vld [vmem:[%s7419_s3 + $0x11f8] sm:$0xff]  ;;  %v2208_v56 = vld [vmem:[%s7419_s3 + $0xa50] sm:$0xff]  ;;  %v1860_v2 = vadd.f32 %v1840_v51, %v1826_v54 }
 0x223   : > { %2785 = vmatpush.msrb.mxu3 %v2503_v9  ;;  %2746 = vmatpush.msrb.mxu1 %v2338_v11  ;;  %v1824_v49 = vld [vmem:[#allocation2] sm:$0xff]  ;;  %v1827_v55 = vld [vmem:[#allocation2 + $0x18] sm:$0xff]  ;;  %v2288_v57 = vld [vmem:[%s7419_s3 + $0xcd0] sm:$0xff] }
 0x224   : > { %2766 = vmatpush.msrb.mxu2 %v2418_v27  ;;  %2727 = vmatpush.msrb.mxu0 %v2253_v13  ;;  %v2368_v58 = vld [vmem:[%s7419_s3 + $0xf50] sm:$0xff]  ;;  %v1858_v60 = vadd.f32 %v1838_v46, %v1824_v49  ;;  %v2203_v63 = vld [vmem:[%s7419_s3 + $0xa28] sm:$0xff]  ;;  %v1861_v3 = vadd.f32 %v1841_v52, %v1827_v55  ;;  %v2198_v22 = vld [vmem:[%s7419_s3 + $0xa00] sm:$0xff]  ;;  %v5160_v27 = vmax.f32 %v1859_v62, 0.0 }
 0x225   : > { %2786 = vmatpush.msrb.mxu3 %v2498_v12  ;;  %2747 = vmatpush.msrb.mxu1 %v2333_v14  ;;  %v2448_v59 = vld [vmem:[%s7419_s3 + $0x11d0] sm:$0xff]  ;;  %v2283_v0 = vld [vmem:[%s7419_s3 + $0xca8] sm:$0xff]  ;;  %v2278_v8 = vld [vmem:[%s7419_s3 + $0xc80] sm:$0xff]  ;;  %v5162_v12 = vmax.f32 %v1860_v2, 0.0  ;;  %v1844_v14 = vperm.slane %v5086_v37, 6 }
 0x226   : > { %2767 = vmatpush.msrb.mxu2 %v2413_v30  ;;  %2728 = vmatpush.msrb.mxu0 %v2248_v33  ;;  %v2363_v4 = vld [vmem:[%s7419_s3 + $0xf28] sm:$0xff]  ;;  %v2358_v9 = vld [vmem:[%s7419_s3 + $0xf00] sm:$0xff]  ;;  %v5158_v11 = vmax.f32 %v1858_v60, 0.0  ;;  %v5164_v13 = vmax.f32 %v1861_v3, 0.0  ;;  %v2593_v30 = vld [vmem:[%s7419_s3 + $0x1658] sm:$0xff] }
 0x227   : > { %2787 = vmatpush.msrb.mxu3 %v2493_v15  ;;  %2748 = vmatpush.msrb.mxu1 %v2328_v16  ;;  %v2443_v5 = vld [vmem:[%s7419_s3 + $0x11a8] sm:$0xff]  ;;  %v2438_v10 = vld [vmem:[%s7419_s3 + $0x1180] sm:$0xff]  ;;  %v1830_v33 = vld [vmem:[#allocation2 + $0x30] sm:$0xff] }
 0x228   : > { %2768 = vmatpush.msrb.mxu2 %v2408_v17  ;;  %2729 = vmatpush.msrb.mxu0 %v2243_v19  ;;  %v2623_v15 = vld [vmem:[%s7419_s3 + $0x1748] sm:$0xff]  ;;  %v1954_v16 = vld [vmem:[%s7419_s3 + $0x260] sm:$0xff]  ;;  %v2588_v19 = vld [vmem:[%s7419_s3 + $0x1630] sm:$0xff] }
 0x229   : > { %2788 = vmatpush.msrb.mxu3 %v2488_v18  ;;  %2749 = vmatpush.msrb.mxu1 %v2323_v20  ;;  %v2034_v17 = vld [vmem:[%s7419_s3 + $0x4e0] sm:$0xff]  ;;  %v1842_v18 = vperm.slane %v5086_v37, 4  ;;  %v2568_v47 = vld [vmem:[%s7419_s3 + $0x1590] sm:$0xff]  ;;  %v1929_v49 = vld [vmem:[%s7419_s3 + $0x198] sm:$0xff] }
 0x22a   : > { %2769 = vmatpush.msrb.mxu2 %v2403_v61  ;;  %2730 = vmatpush.msrb.mxu0 %v2238_v23  ;;  %v2618_v20 = vld [vmem:[%s7419_s3 + $0x1720] sm:$0xff]  ;;  %v1949_v23 = vld [vmem:[%s7419_s3 + $0x238] sm:$0xff]  ;;  %v1924_v54 = vld [vmem:[%s7419_s3 + $0x170] sm:$0xff] }
 0x22b   : > { %2789 = vmatpush.msrb.mxu3 %v2483_v21  ;;  %2750 = vmatpush.msrb.mxu1 %v2318_v1  ;;  %v1828_v61 = vld [vmem:[#allocation2 + $0x20] sm:$0xff]  ;;  %v1845_v21 = vperm.slane %v5086_v37, 7  ;;  %v2029_v1 = vld [vmem:[%s7419_s3 + $0x4b8] sm:$0xff]  ;;  %v2004_v55 = vld [vmem:[%s7419_s3 + $0x3f0] sm:$0xff] }
 0x22c   : > { %2770 = vmatpush.msrb.mxu2 %v2398_v24  ;;  %2731 = vmatpush.msrb.mxu0 %v2233_v26  ;;  %v1864_v24 = vadd.f32 %v1844_v14, %v1830_v33  ;;  %v2583_v26 = vld [vmem:[%s7419_s3 + $0x1608] sm:$0xff]  ;;  %v2009_v51 = vld [vmem:[%s7419_s3 + $0x418] sm:$0xff]  ;;  %v2114_v52 = vld [vmem:[%s7419_s3 + $0x760] sm:$0xff] }
 0x22d   : > { %2790 = vmatpush.msrb.mxu3 %v2478_v25  ;;  %2751 = vmatpush.msrb.mxu1 %v2313_v6  ;;  %v1831_v25 = vld [vmem:[#allocation2 + $0x38] sm:$0xff]  ;;  %v2104_v60 = vld [vmem:[%s7419_s3 + $0x710] sm:$0xff]  ;;  %v2099_v2 = vld [vmem:[%s7419_s3 + $0x6e8] sm:$0xff] }
 0x22e   : > { %2771 = vmatpush.msrb.mxu2 %v2393_v7  ;;  %2732 = vmatpush.msrb.mxu0 %v2228_v29  ;;  %v2613_v6 = vld [vmem:[%s7419_s3 + $0x16f8] sm:$0xff]  ;;  %v1944_v7 = vld [vmem:[%s7419_s3 + $0x210] sm:$0xff]  ;;  %v1899_v33 = vld [vmem:[%s7419_s3 + $0xa8] sm:$0xff] }
 0x22f   : > { %2791 = vmatpush.msrb.mxu3 %v2473_v28  ;;  %2752 = vmatpush.msrb.mxu1 %v2308_v31  ;;  %v1843_v28 = vperm.slane %v5086_v37, 5  ;;  %v2024_v29 = vld [vmem:[%s7419_s3 + $0x490] sm:$0xff]  ;;  %v1862_v31 = vadd.f32 %v1842_v18, %v1828_v61  ;;  %v1939_v37 = vld [vmem:[%s7419_s3 + $0x1e8] sm:$0xff]  ;;  %v2553_v62 = vld [vmem:[%s7419_s3 + $0x1518] sm:$0xff] }
 0x230   : > { %2772 = vmatpush.msrb.mxu2 %v2388_v32  ;;  %2733 = vmatpush.msrb.mxu0 %v2223_v35  ;;  %v1829_v32 = vld [vmem:[#allocation2 + $0x28] sm:$0xff]  ;;  %v2608_v35 = vld [vmem:[%s7419_s3 + $0x16d0] sm:$0xff]  ;;  %v1894_v61 = vld [vmem:[%s7419_s3 + $0x80] sm:$0xff] }
 0x231   : > { %2792 = vmatpush.msrb.mxu3 %v2468_v34  ;;  %2753 = vmatpush.msrb.mxu1 %v2303_v36  ;;  %v2578_v34 = vld [vmem:[%s7419_s3 + $0x15e0] sm:$0xff]  ;;  %v1865_v36 = vadd.f32 %v1845_v21, %v1831_v25  ;;  %v2548_v3 = vld [vmem:[%s7419_s3 + $0x14f0] sm:$0xff]  ;;  %v1833_v25 = vld [vmem:[#allocation2 + $0x48] sm:$0xff] }
 0x232   : > { %2773 = vmatpush.msrb.mxu2 %v2383_v38  ;;  %2734 = vmatpush.msrb.mxu0 %v2218_v40  ;;  %v2019_v38 = vld [vmem:[%s7419_s3 + $0x468] sm:$0xff]  ;;  %v2573_v40 = vld [vmem:[%s7419_s3 + $0x15b8] sm:$0xff]  ;;  %v1984_v14 = vld [vmem:[%s7419_s3 + $0x350] sm:$0xff] }
 0x233   : > { %2793 = vmatpush.msrb.mxu3 %v2463_v39  ;;  %2754 = vmatpush.msrb.mxu1 %v2298_v41  ;;  %v5222_v39 = vmax.f32 %v1864_v24, 0.0  ;;  %v1863_v41 = vadd.f32 %v1843_v28, %v1829_v32  ;;  %v5238_v46 = vmax.f32 %v1865_v36, 0.0  ;;  %v2084_v18 = vld [vmem:[%s7419_s3 + $0x670] sm:$0xff]  ;;  %v1974_v21 = vld [vmem:[%s7419_s3 + $0x300] sm:$0xff] }
 0x234   : > { %2774 = vmatpush.msrb.mxu2 %v2378_v42  ;;  %2735 = vmatpush.msrb.mxu0 %v2213_v44  ;;  %v2603_v42 = vld [vmem:[%s7419_s3 + $0x16a8] sm:$0xff]  ;;  %v5233_v44 = vmax.f32 %v1862_v31, 0.0  ;;  %v2528_v24 = vld [vmem:[%s7419_s3 + $0x1450] sm:$0xff]  ;;  %v2074_v28 = vld [vmem:[%s7419_s3 + $0x620] sm:$0xff] }
 0x235   : > { %2794 = vmatpush.msrb.mxu3 %v2458_v43  ;;  %2755 = vmatpush.msrb.mxu1 %v2293_v45  ;;  %v1934_v43 = vld [vmem:[%s7419_s3 + $0x1c0] sm:$0xff]  ;;  %v5250_v50 = vmax.f32 %v1863_v41, 0.0  ;;  %v1884_v31 = vld [vmem:[%s7419_s3 + $0x30] sm:$0xff] }
 0x236   : > { %2775 = vmatpush.msrb.mxu2 %v2373_v48  ;;  %2736 = vmatpush.msrb.mxu0 %v2208_v56  ;;  %v2014_v45 = vld [vmem:[%s7419_s3 + $0x440] sm:$0xff]  ;;  %v2109_v56 = vld [vmem:[%s7419_s3 + $0x738] sm:$0xff]  ;;  %v1964_v32 = vld [vmem:[%s7419_s3 + $0x2b0] sm:$0xff] }
 0x237   : > { %2795 = vmatpush.msrb.mxu3 %v2453_v53  ;;  %2756 = vmatpush.msrb.mxu1 %v2288_v57  ;;  %v2598_v48 = vld [vmem:[%s7419_s3 + $0x1680] sm:$0xff]  ;;  %v2563_v53 = vld [vmem:[%s7419_s3 + $0x1568] sm:$0xff]  ;;  %v2064_v41 = vld [vmem:[%s7419_s3 + $0x5d0] sm:$0xff] }
 0x238   : > { %2776 = vmatpush.msrb.mxu2 %v2368_v58  ;;  %2737 = vmatpush.msrb.mxu0 %v2203_v63  ;;  %v2558_v57 = vld [vmem:[%s7419_s3 + $0x1540] sm:$0xff]  ;;  %v1919_v58 = vld [vmem:[%s7419_s3 + $0x148] sm:$0xff] }
 0x239   : > { %2796 = vmatpush.msrb.mxu3 %v2448_v59  ;;  %2757 = vmatpush.msrb.mxu1 %v2283_v0  ;;  %v1999_v59 = vld [vmem:[%s7419_s3 + $0x3c8] sm:$0xff]  ;;  %v1914_v63 = vld [vmem:[%s7419_s3 + $0x120] sm:$0xff] }
 0x23a   : > { %2777 = vmatpush.msrb.mxu2 %v2363_v4  ;;  %2738 = vmatpush.msrb.mxu0 %v2198_v22  ;;  %v1994_v0 = vld [vmem:[%s7419_s3 + $0x3a0] sm:$0xff]  ;;  %v1909_v4 = vld [vmem:[%s7419_s3 + $0xf8] sm:$0xff] }
 0x23b   : > { %2797 = vmatpush.msrb.mxu3 %v2443_v5  ;;  %2758 = vmatpush.msrb.mxu1 %v2278_v8  ;;  %v1989_v5 = vld [vmem:[%s7419_s3 + $0x378] sm:$0xff]  ;;  %v2094_v22 = vld [vmem:[%s7419_s3 + $0x6c0] sm:$0xff]  ;;  %v2543_v8 = vld [vmem:[%s7419_s3 + $0x14c8] sm:$0xff] }
 0x23c   : > { %2778 = vmatpush.msrb.mxu2 %v2358_v9  ;;  %2659 = vmatmul.f32.vlgmr.msra.gmra.mxu0 %v5158_v11  ;;  %v1835_v9 = vld [vmem:[%s7418_s2 + $0x8] sm:$0x3]  ;;  %v2518_v36 = vld [vmem:[%s7419_s3 + $0x1400] sm:$0xff] }
 0x23d   : > { %2798 = vmatpush.msrb.mxu3 %v2438_v10  ;;  %2679 = vmatmul.f32.vlgmr.msra.gmra.mxu1 %v5160_v27  ;;  %v1904_v10 = vld [vmem:[%s7419_s3 + $0xd0] sm:$0xff] }
 0x23e   : > { %2699 = vmatmul.f32.vlgmr.msra.gmra.mxu2 %v5162_v12  ;;  %2719 = vmatmul.f32.vlgmr.msra.gmra.mxu3 %v5164_v13 }
 0x23f   : > { %2803 = vmatpush.msra.mxu0 %v2593_v30  ;;  %2833 = vmatpush.msra.mxu1 %v2623_v15  ;;  %v2089_v30 = vld [vmem:[%s7419_s3 + $0x698] sm:$0xff]  ;;  %v2538_v15 = vld [vmem:[%s7419_s3 + $0x14a0] sm:$0xff] }
 0x240   : > { %2843 = vmatpush.msra.mxu2 %v1954_v16  ;;  %2863 = vmatpush.msra.mxu3 %v2034_v17  ;;  %v1979_v16 = vld [vmem:[%s7419_s3 + $0x328] sm:$0xff]  ;;  %v1846_v17 = vperm.slane %v1835_v9, 0 }
 0x241   : > { %2804 = vmatpush.msra.mxu0 %v2588_v19  ;;  %2834 = vmatpush.msra.mxu1 %v2618_v20  ;;  %v2533_v19 = vld [vmem:[%s7419_s3 + $0x1478] sm:$0xff]  ;;  %v1832_v20 = vld [vmem:[#allocation2 + $0x40] sm:$0xff] }
 0x242   : > { %2844 = vmatpush.msra.mxu2 %v1949_v23  ;;  %2864 = vmatpush.msra.mxu3 %v2029_v1  ;;  %v1847_v23 = vperm.slane %v1835_v9, 1  ;;  %v2079_v1 = vld [vmem:[%s7419_s3 + $0x648] sm:$0xff]  ;;  %v2164_v9 = vld [vmem:[%s7419_s3 + $0x8f0] sm:$0xff] }
 0x243   : > { %2805 = vmatpush.msra.mxu0 %v2583_v26  ;;  %2835 = vmatpush.msra.mxu1 %v2613_v6  ;;  %v1889_v26 = vld [vmem:[%s7419_s3 + $0x58] sm:$0xff] }
 0x244   : > { %2845 = vmatpush.msra.mxu2 %v1944_v7  ;;  %2865 = vmatpush.msra.mxu3 %v2024_v29  ;;  %v1969_v6 = vld [vmem:[%s7419_s3 + $0x2d8] sm:$0xff]  ;;  %v1866_v7 = vadd.f32 %v1846_v17, %v1832_v20  ;;  %v2523_v29 = vld [vmem:[%s7419_s3 + $0x1428] sm:$0xff]  ;;  %v2424_v17 = vld [vmem:[%s7419_s3 + $0x1110] sm:$0xff] }
 0x245   : > { %2806 = vmatpush.msra.mxu0 %v2578_v34  ;;  %2836 = vmatpush.msra.mxu1 %v2608_v35  ;;  %v1867_v34 = vadd.f32 %v1847_v23, %v1833_v25  ;;  %v2069_v35 = vld [vmem:[%s7419_s3 + $0x5f8] sm:$0xff]  ;;  %v2314_v20 = vld [vmem:[%s7419_s3 + $0xda0] sm:$0xff]  ;;  %v2144_v25 = vld [vmem:[%s7419_s3 + $0x850] sm:$0xff] }
 0x246   : > { %2846 = vmatpush.msra.mxu2 %v1939_v37  ;;  %2866 = vmatpush.msra.mxu3 %v2019_v38  ;;  %v1879_v37 = vld [vmem:[%s7419_s3 + $0x8] sm:$0xff]  ;;  %v2229_v23 = vld [vmem:[%s7419_s3 + $0xaf8] sm:$0xff] }
 0x247   : > { %2779 = vmatmul.f32.vlgmr.msrb.gmra.mxu2 %v5222_v39  ;;  %2807 = vmatpush.msra.mxu0 %v2573_v40  ;;  %v1959_v38 = vld [vmem:[%s7419_s3 + $0x288] sm:$0xff]  ;;  %v5381_v40 = vmax.f32 %v1866_v7, 0.0  ;;  %v2409_v7 = vld [vmem:[%s7419_s3 + $0x1098] sm:$0xff] }
 0x248   : > { %2837 = vmatpush.msra.mxu1 %v2603_v42  ;;  %2847 = vmatpush.msra.mxu2 %v1934_v43  ;;  %v2194_v42 = vld [vmem:[%s7419_s3 + $0x9e0] sm:$0xff] }
 0x249   : > { %2867 = vmatpush.msra.mxu3 %v2014_v45  ;;  %2739 = vmatmul.f32.vlgmr.msrb.gmra.mxu0 %v5233_v44  ;;  %v2274_v43 = vld [vmem:[%s7419_s3 + $0xc60] sm:$0xff]  ;;  %v5392_v45 = vmax.f32 %v1867_v34, 0.0 }
 0x24a   : > { %2799 = vmatmul.f32.vlgmr.msrb.gmra.mxu3 %v5238_v46  ;;  %2808 = vmatpush.msra.mxu0 %v2568_v47  ;;  %v2354_v47 = vld [vmem:[%s7419_s3 + $0xee0] sm:$0xff] }
 0x24b   : > { %2838 = vmatpush.msra.mxu1 %v2598_v48  ;;  %2848 = vmatpush.msra.mxu2 %v1929_v49  ;;  %v2059_v48 = vld [vmem:[%s7419_s3 + $0x5a8] sm:$0xff]  ;;  %v2189_v49 = vld [vmem:[%s7419_s3 + $0x9b8] sm:$0xff]  ;;  %v2134_v34 = vld [vmem:[%s7419_s3 + $0x800] sm:$0xff] }
 0x24c   : > { %2868 = vmatpush.msra.mxu3 %v2009_v51  ;;  %2759 = vmatmul.f32.vlgmr.msrb.gmra.mxu1 %v5250_v50  ;;  %v2269_v51 = vld [vmem:[%s7419_s3 + $0xc38] sm:$0xff] }
 0x24d   : > { %2883 = vmatpush.msrb.mxu1 %v2114_v52  ;;  %2809 = vmatpush.msra.mxu0 %v2563_v53  ;;  %v2349_v52 = vld [vmem:[%s7419_s3 + $0xeb8] sm:$0xff]  ;;  %v2054_v53 = vld [vmem:[%s7419_s3 + $0x580] sm:$0xff] }
 0x24e   : > { %2849 = vmatpush.msra.mxu2 %v1924_v54  ;;  %2869 = vmatpush.msra.mxu3 %v2004_v55  ;;  %v2184_v54 = vld [vmem:[%s7419_s3 + $0x990] sm:$0xff] }
 0x24f   : > { %2884 = vmatpush.msrb.mxu1 %v2109_v56  ;;  %2810 = vmatpush.msra.mxu0 %v2558_v57  ;;  %v2264_v55 = vld [vmem:[%s7419_s3 + $0xc10] sm:$0xff]  ;;  %v2049_v57 = vld [vmem:[%s7419_s3 + $0x558] sm:$0xff] }
 0x250   : > { %2850 = vmatpush.msra.mxu2 %v1919_v58  ;;  %2870 = vmatpush.msra.mxu3 %v1999_v59  ;;  %v2344_v56 = vld [vmem:[%s7419_s3 + $0xe90] sm:$0xff]  ;;  %v2179_v58 = vld [vmem:[%s7419_s3 + $0x968] sm:$0xff] }
 0x251   : > { %2885 = vmatpush.msrb.mxu1 %v2104_v60  ;;  %2811 = vmatpush.msra.mxu0 %v2553_v62  ;;  %v2259_v59 = vld [vmem:[%s7419_s3 + $0xbe8] sm:$0xff]  ;;  %v2044_v62 = vld [vmem:[%s7419_s3 + $0x530] sm:$0xff] }
 0x252   : > { %2851 = vmatpush.msra.mxu2 %v1914_v63  ;;  %2871 = vmatpush.msra.mxu3 %v1994_v0  ;;  %v2339_v60 = vld [vmem:[%s7419_s3 + $0xe68] sm:$0xff]  ;;  %v2174_v63 = vld [vmem:[%s7419_s3 + $0x940] sm:$0xff] }
 0x253   : > { %2886 = vmatpush.msrb.mxu1 %v2099_v2  ;;  %2812 = vmatpush.msra.mxu0 %v2548_v3  ;;  %v2254_v0 = vld [vmem:[%s7419_s3 + $0xbc0] sm:$0xff]  ;;  %v2039_v3 = vld [vmem:[%s7419_s3 + $0x508] sm:$0xff] }
 0x254   : > { %2852 = vmatpush.msra.mxu2 %v1909_v4  ;;  %2872 = vmatpush.msra.mxu3 %v1989_v5  ;;  %v2334_v2 = vld [vmem:[%s7419_s3 + $0xe40] sm:$0xff]  ;;  %v2169_v4 = vld [vmem:[%s7419_s3 + $0x918] sm:$0xff] }
 0x255   : > { %2887 = vmatpush.msrb.mxu1 %v2094_v22  ;;  %2813 = vmatpush.msra.mxu0 %v2543_v8  ;;  %v2249_v5 = vld [vmem:[%s7419_s3 + $0xb98] sm:$0xff]  ;;  %v2434_v8 = vld [vmem:[%s7419_s3 + $0x1160] sm:$0xff] }
 0x256   : > { %2853 = vmatpush.msra.mxu2 %v1904_v10  ;;  %2873 = vmatpush.msra.mxu3 %v1984_v14  ;;  %v2329_v22 = vld [vmem:[%s7419_s3 + $0xe18] sm:$0xff]  ;;  %v2244_v10 = vld [vmem:[%s7419_s3 + $0xb70] sm:$0xff] }
 0x257   : > { %2888 = vmatpush.msrb.mxu1 %v2089_v30  ;;  %2814 = vmatpush.msra.mxu0 %v2538_v15  ;;  %v2324_v14 = vld [vmem:[%s7419_s3 + $0xdf0] sm:$0xff]  ;;  %v2429_v30 = vld [vmem:[%s7419_s3 + $0x1138] sm:$0xff]  ;;  %v2159_v15 = vld [vmem:[%s7419_s3 + $0x8c8] sm:$0xff] }
 0x258   : > { %2854 = vmatpush.msra.mxu2 %v1899_v33  ;;  %2874 = vmatpush.msra.mxu3 %v1979_v16  ;;  %v2239_v33 = vld [vmem:[%s7419_s3 + $0xb48] sm:$0xff] }
 0x259   : > { %2889 = vmatpush.msrb.mxu1 %v2084_v18  ;;  %2815 = vmatpush.msra.mxu0 %v2533_v19  ;;  %v2319_v16 = vld [vmem:[%s7419_s3 + $0xdc8] sm:$0xff]  ;;  %v2154_v18 = vld [vmem:[%s7419_s3 + $0x8a0] sm:$0xff] }
 0x25a   : > { %2855 = vmatpush.msra.mxu2 %v1894_v61  ;;  %2875 = vmatpush.msra.mxu3 %v1974_v21  ;;  %v2234_v19 = vld [vmem:[%s7419_s3 + $0xb20] sm:$0xff]  ;;  %v2419_v61 = vld [vmem:[%s7419_s3 + $0x10e8] sm:$0xff]  ;;  %v2149_v21 = vld [vmem:[%s7419_s3 + $0x878] sm:$0xff] }
 0x25b   : > { %2890 = vmatpush.msrb.mxu1 %v2079_v1  ;;  %2816 = vmatpush.msra.mxu0 %v2528_v24  ;;  %v2309_v1 = vld [vmem:[%s7419_s3 + $0xd78] sm:$0xff]  ;;  %v2414_v24 = vld [vmem:[%s7419_s3 + $0x10c0] sm:$0xff] }
 0x25c   : > { %2856 = vmatpush.msra.mxu2 %v1889_v26  ;;  %2876 = vmatpush.msra.mxu3 %v1969_v6  ;;  %v2224_v26 = vld [vmem:[%s7419_s3 + $0xad0] sm:$0xff] }
 0x25d   : > { %2891 = vmatpush.msrb.mxu1 %v2074_v28  ;;  %2817 = vmatpush.msra.mxu0 %v2523_v29  ;;  %v2304_v6 = vld [vmem:[%s7419_s3 + $0xd50] sm:$0xff]  ;;  %v2139_v28 = vld [vmem:[%s7419_s3 + $0x828] sm:$0xff] }
 0x25e   : > { %2857 = vmatpush.msra.mxu2 %v1884_v31  ;;  %2877 = vmatpush.msra.mxu3 %v1964_v32  ;;  %v2219_v29 = vld [vmem:[%s7419_s3 + $0xaa8] sm:$0xff]  ;;  %v2404_v32 = vld [vmem:[%s7419_s3 + $0x1070] sm:$0xff] }
 0x25f   : > { %2892 = vmatpush.msrb.mxu1 %v2069_v35  ;;  %2818 = vmatpush.msra.mxu0 %v2518_v36  ;;  %v2299_v31 = vld [vmem:[%s7419_s3 + $0xd28] sm:$0xff]  ;;  %v2214_v35 = vld [vmem:[%s7419_s3 + $0xa80] sm:$0xff] }
 0x260   : > { %2858 = vmatpush.msra.mxu2 %v1879_v37  ;;  %2878 = vmatpush.msra.mxu3 %v1959_v38  ;;  %v2294_v36 = vld [vmem:[%s7419_s3 + $0xd00] sm:$0xff]  ;;  %v2399_v37 = vld [vmem:[%s7419_s3 + $0x1048] sm:$0xff]  ;;  %v2129_v38 = vld [vmem:[%s7419_s3 + $0x7d8] sm:$0xff] }
 0x261   : > { %2819 = vmatmul.f32.vlgmr.msra.gmra.mxu0 %v5381_v40  ;;  %2893 = vmatpush.msrb.mxu1 %v2064_v41  ;;  %v2209_v41 = vld [vmem:[%s7419_s3 + $0xa58] sm:$0xff] }
 0x262   : > { %2903 = vmatpush.msrb.mxu0 %v2194_v42  ;;  %2923 = vmatpush.msrb.mxu2 %v2274_v43  ;;  %v2289_v42 = vld [vmem:[%s7419_s3 + $0xcd8] sm:$0xff]  ;;  %v2394_v43 = vld [vmem:[%s7419_s3 + $0x1020] sm:$0xff] }
 0x263   : > { %2943 = vmatpush.msrb.mxu3 %v2354_v47  ;;  %3921 = vmatmul.msk.f32.vlgmr.msra.gmra.mxu1 %vm1818_vm1, %v5392_v45  ;;  %v2124_v47 = vld [vmem:[%s7419_s3 + $0x7b0] sm:$0xff] }
 0x264   : > { %2894 = vmatpush.msrb.mxu1 %v2059_v48  ;;  %2904 = vmatpush.msrb.mxu0 %v2189_v49  ;;  %v2204_v48 = vld [vmem:[%s7419_s3 + $0xa30] sm:$0xff] }
 0x265   : > { %2924 = vmatpush.msrb.mxu2 %v2269_v51  ;;  %2944 = vmatpush.msrb.mxu3 %v2349_v52  ;;  %v2284_v49 = vld [vmem:[%s7419_s3 + $0xcb0] sm:$0xff]  ;;  %v2389_v51 = vld [vmem:[%s7419_s3 + $0xff8] sm:$0xff]  ;;  %v2119_v52 = vld [vmem:[%s7419_s3 + $0x788] sm:$0xff] }
 0x266   : > { %2895 = vmatpush.msrb.mxu1 %v2054_v53  ;;  %2905 = vmatpush.msrb.mxu0 %v2184_v54  ;;  %v2199_v53 = vld [vmem:[%s7419_s3 + $0xa08] sm:$0xff] }
 0x267   : > { %2925 = vmatpush.msrb.mxu2 %v2264_v55  ;;  %2945 = vmatpush.msrb.mxu3 %v2344_v56  ;;  %v2279_v54 = vld [vmem:[%s7419_s3 + $0xc88] sm:$0xff]  ;;  %v2384_v55 = vld [vmem:[%s7419_s3 + $0xfd0] sm:$0xff]  ;;  %v2514_v56 = vld [vmem:[%s7419_s3 + $0x13e0] sm:$0xff] }
 0x268   : > { %2896 = vmatpush.msrb.mxu1 %v2049_v57  ;;  %2906 = vmatpush.msrb.mxu0 %v2179_v58  ;;  %v2594_v57 = vld [vmem:[%s7419_s3 + $0x1660] sm:$0xff]  ;;  %v2624_v58 = vld [vmem:[%s7419_s3 + $0x1750] sm:$0xff] }
 0x269   : > { %2926 = vmatpush.msrb.mxu2 %v2259_v59  ;;  %2946 = vmatpush.msrb.mxu3 %v2339_v60  ;;  %v2379_v59 = vld [vmem:[%s7419_s3 + $0xfa8] sm:$0xff]  ;;  %v2509_v60 = vld [vmem:[%s7419_s3 + $0x13b8] sm:$0xff] }
 0x26a   : > { %2897 = vmatpush.msrb.mxu1 %v2044_v62  ;;  %2907 = vmatpush.msrb.mxu0 %v2174_v63  ;;  %v2589_v62 = vld [vmem:[%s7419_s3 + $0x1638] sm:$0xff]  ;;  %v2619_v63 = vld [vmem:[%s7419_s3 + $0x1728] sm:$0xff] }
 0x26b   : > { %2927 = vmatpush.msrb.mxu2 %v2254_v0  ;;  %2947 = vmatpush.msrb.mxu3 %v2334_v2  ;;  %v2374_v0 = vld [vmem:[%s7419_s3 + $0xf80] sm:$0xff]  ;;  %v2504_v2 = vld [vmem:[%s7419_s3 + $0x1390] sm:$0xff] }
 0x26c   : > { %2898 = vmatpush.msrb.mxu1 %v2039_v3  ;;  %2908 = vmatpush.msrb.mxu0 %v2169_v4  ;;  %v2584_v3 = vld [vmem:[%s7419_s3 + $0x1610] sm:$0xff]  ;;  %v2614_v4 = vld [vmem:[%s7419_s3 + $0x1700] sm:$0xff] }
 0x26d   : > { %2928 = vmatpush.msrb.mxu2 %v2249_v5  ;;  %2948 = vmatpush.msrb.mxu3 %v2329_v22  ;;  %v2369_v5 = vld [vmem:[%s7419_s3 + $0xf58] sm:$0xff]  ;;  %v2499_v22 = vld [vmem:[%s7419_s3 + $0x1368] sm:$0xff] }
 0x26e   : > { %2963 = vmatpush.msra.mxu1 %v2434_v8  ;;  %2909 = vmatpush.msrb.mxu0 %v2164_v9  ;;  %v2579_v8 = vld [vmem:[%s7419_s3 + $0x15e8] sm:$0xff]  ;;  %v2609_v9 = vld [vmem:[%s7419_s3 + $0x16d8] sm:$0xff] }
 0x26f   : > { %2929 = vmatpush.msrb.mxu2 %v2244_v10  ;;  %2949 = vmatpush.msrb.mxu3 %v2324_v14  ;;  %v2364_v10 = vld [vmem:[%s7419_s3 + $0xf30] sm:$0xff]  ;;  %v2494_v14 = vld [vmem:[%s7419_s3 + $0x1340] sm:$0xff] }
 0x270   : > { %2964 = vmatpush.msra.mxu1 %v2429_v30  ;;  %2910 = vmatpush.msrb.mxu0 %v2159_v15  ;;  %v2574_v30 = vld [vmem:[%s7419_s3 + $0x15c0] sm:$0xff]  ;;  %v2604_v15 = vld [vmem:[%s7419_s3 + $0x16b0] sm:$0xff] }
 0x271   : > { %2930 = vmatpush.msrb.mxu2 %v2239_v33  ;;  %2950 = vmatpush.msrb.mxu3 %v2319_v16  ;;  %v2359_v33 = vld [vmem:[%s7419_s3 + $0xf08] sm:$0xff]  ;;  %v2489_v16 = vld [vmem:[%s7419_s3 + $0x1318] sm:$0xff] }
 0x272   : > { %2965 = vmatpush.msra.mxu1 %v2424_v17  ;;  %2911 = vmatpush.msrb.mxu0 %v2154_v18  ;;  %v2569_v17 = vld [vmem:[%s7419_s3 + $0x1598] sm:$0xff]  ;;  %v2599_v18 = vld [vmem:[%s7419_s3 + $0x1688] sm:$0xff] }
 0x273   : > { %2931 = vmatpush.msrb.mxu2 %v2234_v19  ;;  %2951 = vmatpush.msrb.mxu3 %v2314_v20  ;;  %v1955_v19 = vld [vmem:[%s7419_s3 + $0x268] sm:$0xff] }
 0x274   : > { %2966 = vmatpush.msra.mxu1 %v2419_v61  ;;  %2912 = vmatpush.msrb.mxu0 %v2149_v21  ;;  %v2035_v20 = vld [vmem:[%s7419_s3 + $0x4e8] sm:$0xff]  ;;  %v2484_v61 = vld [vmem:[%s7419_s3 + $0x12f0] sm:$0xff] }
 0x275   : > { %2932 = vmatpush.msrb.mxu2 %v2229_v23  ;;  %2952 = vmatpush.msrb.mxu3 %v2309_v1  ;;  %v2564_v21 = vld [vmem:[%s7419_s3 + $0x1570] sm:$0xff]  ;;  %v1950_v23 = vld [vmem:[%s7419_s3 + $0x240] sm:$0xff] }
 0x276   : > { %2967 = vmatpush.msra.mxu1 %v2414_v24  ;;  %2913 = vmatpush.msrb.mxu0 %v2144_v25  ;;  %v2030_v1 = vld [vmem:[%s7419_s3 + $0x4c0] sm:$0xff]  ;;  %v2479_v24 = vld [vmem:[%s7419_s3 + $0x12c8] sm:$0xff] }
 0x277   : > { %2933 = vmatpush.msrb.mxu2 %v2224_v26  ;;  %2953 = vmatpush.msrb.mxu3 %v2304_v6  ;;  %v2559_v25 = vld [vmem:[%s7419_s3 + $0x1548] sm:$0xff]  ;;  %v1945_v26 = vld [vmem:[%s7419_s3 + $0x218] sm:$0xff] }
 0x278   : > { %2968 = vmatpush.msra.mxu1 %v2409_v7  ;;  %2914 = vmatpush.msrb.mxu0 %v2139_v28  ;;  %v2025_v6 = vld [vmem:[%s7419_s3 + $0x498] sm:$0xff]  ;;  %v2474_v7 = vld [vmem:[%s7419_s3 + $0x12a0] sm:$0xff] }
 0x279   : > { %2934 = vmatpush.msrb.mxu2 %v2219_v29  ;;  %2954 = vmatpush.msrb.mxu3 %v2299_v31  ;;  %v2554_v28 = vld [vmem:[%s7419_s3 + $0x1520] sm:$0xff]  ;;  %v1940_v29 = vld [vmem:[%s7419_s3 + $0x1f0] sm:$0xff] }
 0x27a   : > { %2969 = vmatpush.msra.mxu1 %v2404_v32  ;;  %2915 = vmatpush.msrb.mxu0 %v2134_v34  ;;  %v2020_v31 = vld [vmem:[%s7419_s3 + $0x470] sm:$0xff]  ;;  %v2469_v32 = vld [vmem:[%s7419_s3 + $0x1278] sm:$0xff] }
 0x27b   : > { %2935 = vmatpush.msrb.mxu2 %v2214_v35  ;;  %2955 = vmatpush.msrb.mxu3 %v2294_v36  ;;  %v2549_v34 = vld [vmem:[%s7419_s3 + $0x14f8] sm:$0xff]  ;;  %v1935_v35 = vld [vmem:[%s7419_s3 + $0x1c8] sm:$0xff] }
 0x27c   : > { %2970 = vmatpush.msra.mxu1 %v2399_v37  ;;  %2916 = vmatpush.msrb.mxu0 %v2129_v38  ;;  %v2015_v36 = vld [vmem:[%s7419_s3 + $0x448] sm:$0xff]  ;;  %v2464_v37 = vld [vmem:[%s7419_s3 + $0x1250] sm:$0xff] }
 0x27d   : > { %2936 = vmatpush.msrb.mxu2 %v2209_v41  ;;  %2956 = vmatpush.msrb.mxu3 %v2289_v42  ;;  %v2544_v38 = vld [vmem:[%s7419_s3 + $0x14d0] sm:$0xff]  ;;  %v1930_v41 = vld [vmem:[%s7419_s3 + $0x1a0] sm:$0xff] }
 0x27e   : > { %2971 = vmatpush.msra.mxu1 %v2394_v43  ;;  %2917 = vmatpush.msrb.mxu0 %v2124_v47  ;;  %v2010_v42 = vld [vmem:[%s7419_s3 + $0x420] sm:$0xff]  ;;  %v2459_v43 = vld [vmem:[%s7419_s3 + $0x1228] sm:$0xff] }
 0x27f   : > { %2937 = vmatpush.msrb.mxu2 %v2204_v48  ;;  %2957 = vmatpush.msrb.mxu3 %v2284_v49  ;;  %v2539_v47 = vld [vmem:[%s7419_s3 + $0x14a8] sm:$0xff]  ;;  %v1925_v48 = vld [vmem:[%s7419_s3 + $0x178] sm:$0xff] }
 0x280   : > { %2972 = vmatpush.msra.mxu1 %v2389_v51  ;;  %2918 = vmatpush.msrb.mxu0 %v2119_v52  ;;  %v2005_v49 = vld [vmem:[%s7419_s3 + $0x3f8] sm:$0xff]  ;;  %v2454_v51 = vld [vmem:[%s7419_s3 + $0x1200] sm:$0xff] }
 0x281   : > { %2938 = vmatpush.msrb.mxu2 %v2199_v53  ;;  %2958 = vmatpush.msrb.mxu3 %v2279_v54  ;;  %v2534_v52 = vld [vmem:[%s7419_s3 + $0x1480] sm:$0xff]  ;;  %v1920_v53 = vld [vmem:[%s7419_s3 + $0x150] sm:$0xff] }
 0x282   : > { %2859 = vmatmul.f32.vlgmr.msra.gmra.mxu2 %v5158_v11  ;;  %2879 = vmatmul.f32.vlgmr.msra.gmra.mxu3 %v5160_v27  ;;  %v2000_v54 = vld [vmem:[%s7419_s3 + $0x3d0] sm:$0xff] }
 0x283   : > { %2973 = vmatpush.msra.mxu1 %v2384_v55  ;;  %2983 = vmatpush.msra.mxu0 %v2514_v56  ;;  %v2449_v55 = vld [vmem:[%s7419_s3 + $0x11d8] sm:$0xff] }
 0x284   : > { %3003 = vmatpush.msra.mxu2 %v2594_v57  ;;  %3033 = vmatpush.msra.mxu3 %v2624_v58  ;;  %v2529_v56 = vld [vmem:[%s7419_s3 + $0x1458] sm:$0xff]  ;;  %v1915_v57 = vld [vmem:[%s7419_s3 + $0x128] sm:$0xff] }
 0x285   : > { %2974 = vmatpush.msra.mxu1 %v2379_v59  ;;  %2984 = vmatpush.msra.mxu0 %v2509_v60  ;;  %v1995_v58 = vld [vmem:[%s7419_s3 + $0x3a8] sm:$0xff]  ;;  %v2444_v59 = vld [vmem:[%s7419_s3 + $0x11b0] sm:$0xff] }
 0x286   : > { %3004 = vmatpush.msra.mxu2 %v2589_v62  ;;  %3034 = vmatpush.msra.mxu3 %v2619_v63  ;;  %v2524_v60 = vld [vmem:[%s7419_s3 + $0x1430] sm:$0xff]  ;;  %v1910_v62 = vld [vmem:[%s7419_s3 + $0x100] sm:$0xff] }
 0x287   : > { %2975 = vmatpush.msra.mxu1 %v2374_v0  ;;  %2985 = vmatpush.msra.mxu0 %v2504_v2  ;;  %v1990_v63 = vld [vmem:[%s7419_s3 + $0x380] sm:$0xff]  ;;  %v2439_v0 = vld [vmem:[%s7419_s3 + $0x1188] sm:$0xff] }
 0x288   : > { %3005 = vmatpush.msra.mxu2 %v2584_v3  ;;  %3035 = vmatpush.msra.mxu3 %v2614_v4  ;;  %v2519_v2 = vld [vmem:[%s7419_s3 + $0x1408] sm:$0xff]  ;;  %v1905_v3 = vld [vmem:[%s7419_s3 + $0xd8] sm:$0xff] }
 0x289   : > { %2976 = vmatpush.msra.mxu1 %v2369_v5  ;;  %2986 = vmatpush.msra.mxu0 %v2499_v22  ;;  %v1985_v4 = vld [vmem:[%s7419_s3 + $0x358] sm:$0xff]  ;;  %v2115_v5 = vld [vmem:[%s7419_s3 + $0x768] sm:$0xff] }
 0x28a   : > { %3006 = vmatpush.msra.mxu2 %v2579_v8  ;;  %3036 = vmatpush.msra.mxu3 %v2609_v9  ;;  %v2195_v22 = vld [vmem:[%s7419_s3 + $0x9e8] sm:$0xff]  ;;  %v1900_v8 = vld [vmem:[%s7419_s3 + $0xb0] sm:$0xff] }
 0x28b   : > { %2939 = vmatmul.f32.vlgmr.msrb.gmra.mxu2 %v5233_v44  ;;  %2977 = vmatpush.msra.mxu1 %v2364_v10  ;;  %v1980_v9 = vld [vmem:[%s7419_s3 + $0x330] sm:$0xff]  ;;  %v2110_v10 = vld [vmem:[%s7419_s3 + $0x740] sm:$0xff] }
 0x28c   : > { %2987 = vmatpush.msra.mxu0 %v2494_v14  ;;  %3007 = vmatpush.msra.mxu2 %v2574_v30  ;;  %v2190_v14 = vld [vmem:[%s7419_s3 + $0x9c0] sm:$0xff]  ;;  %v1895_v30 = vld [vmem:[%s7419_s3 + $0x88] sm:$0xff] }
 0x28d   : > { %3037 = vmatpush.msra.mxu3 %v2604_v15  ;;  %2899 = vmatmul.f32.vlgmr.msrb.gmra.mxu1 %v5162_v12  ;;  %v1975_v15 = vld [vmem:[%s7419_s3 + $0x308] sm:$0xff] }
 0x28e   : > { %2959 = vmatmul.f32.vlgmr.msrb.gmra.mxu3 %v5250_v50  ;;  %2978 = vmatpush.msra.mxu1 %v2359_v33  ;;  %v2105_v33 = vld [vmem:[%s7419_s3 + $0x718] sm:$0xff] }
 0x28f   : > { %2988 = vmatpush.msra.mxu0 %v2489_v16  ;;  %3008 = vmatpush.msra.mxu2 %v2569_v17  ;;  %v2185_v16 = vld [vmem:[%s7419_s3 + $0x998] sm:$0xff]  ;;  %v1890_v17 = vld [vmem:[%s7419_s3 + $0x60] sm:$0xff] }
 0x290   : > { %3038 = vmatpush.msra.mxu3 %v2599_v18  ;;  %3043 = vmatpush.msrb.mxu1 %v1955_v19  ;;  %v1970_v18 = vld [vmem:[%s7419_s3 + $0x2e0] sm:$0xff]  ;;  %v2100_v19 = vld [vmem:[%s7419_s3 + $0x6f0] sm:$0xff] }
 0x291   : > { %2919 = vmatmul.f32.vlgmr.msrb.gmra.mxu0 %v5164_v13  ;;  %3009 = vmatpush.msra.mxu2 %v2564_v21  ;;  %v1965_v21 = vld [vmem:[%s7419_s3 + $0x2b8] sm:$0xff] }
 0x292   : > { %3063 = vmatpush.msrb.mxu3 %v2035_v20  ;;  %2989 = vmatpush.msra.mxu0 %v2484_v61  ;;  %v2180_v20 = vld [vmem:[%s7419_s3 + $0x970] sm:$0xff]  ;;  %v1885_v61 = vld [vmem:[%s7419_s3 + $0x38] sm:$0xff] }
 0x293   : > { %3044 = vmatpush.msrb.mxu1 %v1950_v23  ;;  %3010 = vmatpush.msra.mxu2 %v2559_v25  ;;  %v2095_v23 = vld [vmem:[%s7419_s3 + $0x6c8] sm:$0xff]  ;;  %v1960_v25 = vld [vmem:[%s7419_s3 + $0x290] sm:$0xff] }
 0x294   : > { %3064 = vmatpush.msrb.mxu3 %v2030_v1  ;;  %2990 = vmatpush.msra.mxu0 %v2479_v24  ;;  %v2175_v1 = vld [vmem:[%s7419_s3 + $0x948] sm:$0xff]  ;;  %v1880_v24 = vld [vmem:[%s7419_s3 + $0x10] sm:$0xff] }
 0x295   : > { %3045 = vmatpush.msrb.mxu1 %v1945_v26  ;;  %3011 = vmatpush.msra.mxu2 %v2554_v28  ;;  %v2090_v26 = vld [vmem:[%s7419_s3 + $0x6a0] sm:$0xff]  ;;  %v2355_v28 = vld [vmem:[%s7419_s3 + $0xee8] sm:$0xff] }
 0x296   : > { %3065 = vmatpush.msrb.mxu3 %v2025_v6  ;;  %2991 = vmatpush.msra.mxu0 %v2474_v7  ;;  %v2170_v6 = vld [vmem:[%s7419_s3 + $0x920] sm:$0xff]  ;;  %v2275_v7 = vld [vmem:[%s7419_s3 + $0xc68] sm:$0xff] }
 0x297   : > { %3046 = vmatpush.msrb.mxu1 %v1940_v29  ;;  %3012 = vmatpush.msra.mxu2 %v2549_v34  ;;  %v2085_v29 = vld [vmem:[%s7419_s3 + $0x678] sm:$0xff]  ;;  %v2350_v34 = vld [vmem:[%s7419_s3 + $0xec0] sm:$0xff] }
 0x298   : > { %3066 = vmatpush.msrb.mxu3 %v2020_v31  ;;  %2979 = vmatmul.f32.vlgmr.msra.gmra.mxu1 %v5222_v39  ;;  %v2165_v31 = vld [vmem:[%s7419_s3 + $0x8f8] sm:$0xff] }
 0x299   : > { %2992 = vmatpush.msra.mxu0 %v2469_v32  ;;  %3047 = vmatpush.msrb.mxu1 %v1935_v35  ;;  %v2270_v32 = vld [vmem:[%s7419_s3 + $0xc40] sm:$0xff]  ;;  %v2080_v35 = vld [vmem:[%s7419_s3 + $0x650] sm:$0xff] }
 0x29a   : > { %3067 = vmatpush.msrb.mxu3 %v2015_v36  ;;  %3013 = vmatpush.msra.mxu2 %v2544_v38  ;;  %v2160_v36 = vld [vmem:[%s7419_s3 + $0x8d0] sm:$0xff]  ;;  %v2345_v38 = vld [vmem:[%s7419_s3 + $0xe98] sm:$0xff] }
 0x29b   : > { %2993 = vmatpush.msra.mxu0 %v2464_v37  ;;  %3048 = vmatpush.msrb.mxu1 %v1930_v41  ;;  %v2265_v37 = vld [vmem:[%s7419_s3 + $0xc18] sm:$0xff]  ;;  %v2075_v41 = vld [vmem:[%s7419_s3 + $0x628] sm:$0xff] }
 0x29c   : > { %3068 = vmatpush.msrb.mxu3 %v2010_v42  ;;  %3014 = vmatpush.msra.mxu2 %v2539_v47  ;;  %v2155_v42 = vld [vmem:[%s7419_s3 + $0x8a8] sm:$0xff]  ;;  %v2340_v47 = vld [vmem:[%s7419_s3 + $0xe70] sm:$0xff] }
 0x29d   : > { %2994 = vmatpush.msra.mxu0 %v2459_v43  ;;  %3049 = vmatpush.msrb.mxu1 %v1925_v48  ;;  %v2260_v43 = vld [vmem:[%s7419_s3 + $0xbf0] sm:$0xff]  ;;  %v2070_v48 = vld [vmem:[%s7419_s3 + $0x600] sm:$0xff] }
 0x29e   : > { %3069 = vmatpush.msrb.mxu3 %v2005_v49  ;;  %3015 = vmatpush.msra.mxu2 %v2534_v52  ;;  %v2150_v49 = vld [vmem:[%s7419_s3 + $0x880] sm:$0xff]  ;;  %v2335_v52 = vld [vmem:[%s7419_s3 + $0xe48] sm:$0xff] }
 0x29f   : > { %2995 = vmatpush.msra.mxu0 %v2454_v51  ;;  %3050 = vmatpush.msrb.mxu1 %v1920_v53  ;;  %v2255_v51 = vld [vmem:[%s7419_s3 + $0xbc8] sm:$0xff]  ;;  %v2065_v53 = vld [vmem:[%s7419_s3 + $0x5d8] sm:$0xff] }
 0x2a0   : > { %3070 = vmatpush.msrb.mxu3 %v2000_v54  ;;  %3016 = vmatpush.msra.mxu2 %v2529_v56  ;;  %v2145_v54 = vld [vmem:[%s7419_s3 + $0x858] sm:$0xff]  ;;  %v2330_v56 = vld [vmem:[%s7419_s3 + $0xe20] sm:$0xff] }
 0x2a1   : > { %2996 = vmatpush.msra.mxu0 %v2449_v55  ;;  %3051 = vmatpush.msrb.mxu1 %v1915_v57  ;;  %v2250_v55 = vld [vmem:[%s7419_s3 + $0xba0] sm:$0xff]  ;;  %v2060_v57 = vld [vmem:[%s7419_s3 + $0x5b0] sm:$0xff] }
 0x2a2   : > { %3071 = vmatpush.msrb.mxu3 %v1995_v58  ;;  %3017 = vmatpush.msra.mxu2 %v2524_v60  ;;  %v2140_v58 = vld [vmem:[%s7419_s3 + $0x830] sm:$0xff]  ;;  %v2325_v60 = vld [vmem:[%s7419_s3 + $0xdf8] sm:$0xff] }
 0x2a3   : > { %2997 = vmatpush.msra.mxu0 %v2444_v59  ;;  %3052 = vmatpush.msrb.mxu1 %v1910_v62  ;;  %v2245_v59 = vld [vmem:[%s7419_s3 + $0xb78] sm:$0xff]  ;;  %v2055_v62 = vld [vmem:[%s7419_s3 + $0x588] sm:$0xff] }
 0x2a4   : > { %3072 = vmatpush.msrb.mxu3 %v1990_v63  ;;  %3018 = vmatpush.msra.mxu2 %v2519_v2  ;;  %v2135_v63 = vld [vmem:[%s7419_s3 + $0x808] sm:$0xff]  ;;  %v2320_v2 = vld [vmem:[%s7419_s3 + $0xdd0] sm:$0xff] }
 0x2a5   : > { %2998 = vmatpush.msra.mxu0 %v2439_v0  ;;  %3019 = vmatmul.f32.vlgmr.msra.gmra.mxu2 %v5381_v40  ;;  %v2240_v0 = vld [vmem:[%s7419_s3 + $0xb50] sm:$0xff] }
 0x2a6   : > { %2999 = vmatmul.f32.vlgmr.msra.gmra.mxu0 %v5238_v46  ;;  %3053 = vmatpush.msrb.mxu1 %v1905_v3  ;;  %v2050_v3 = vld [vmem:[%s7419_s3 + $0x560] sm:$0xff] }
 0x2a7   : > { %3073 = vmatpush.msrb.mxu3 %v1985_v4  ;;  %3083 = vmatpush.msrb.mxu0 %v2115_v5  ;;  %v2130_v4 = vld [vmem:[%s7419_s3 + $0x7e0] sm:$0xff]  ;;  %v2235_v5 = vld [vmem:[%s7419_s3 + $0xb28] sm:$0xff] }
 0x2a8   : > { %3103 = vmatpush.msrb.mxu2 %v2195_v22  ;;  %3922 = vmatmul.msk.f32.vlgmr.msra.gmra.mxu3 %vm1818_vm1, %v5392_v45  ;;  %v2315_v22 = vld [vmem:[%s7419_s3 + $0xda8] sm:$0xff] }
 0x2a9   : > { %3054 = vmatpush.msrb.mxu1 %v1900_v8  ;;  %3074 = vmatpush.msrb.mxu3 %v1980_v9  ;;  %v2045_v8 = vld [vmem:[%s7419_s3 + $0x538] sm:$0xff] }
 0x2aa   : > { %3084 = vmatpush.msrb.mxu0 %v2110_v10  ;;  %3104 = vmatpush.msrb.mxu2 %v2190_v14  ;;  %v2125_v9 = vld [vmem:[%s7419_s3 + $0x7b8] sm:$0xff]  ;;  %v2230_v10 = vld [vmem:[%s7419_s3 + $0xb00] sm:$0xff] }
 0x2ab   : > { %3055 = vmatpush.msrb.mxu1 %v1895_v30  ;;  %3075 = vmatpush.msrb.mxu3 %v1975_v15  ;;  %v2310_v14 = vld [vmem:[%s7419_s3 + $0xd80] sm:$0xff]  ;;  %v2040_v30 = vld [vmem:[%s7419_s3 + $0x510] sm:$0xff] }
 0x2ac   : > { %3085 = vmatpush.msrb.mxu0 %v2105_v33  ;;  %3105 = vmatpush.msrb.mxu2 %v2185_v16  ;;  %v2120_v15 = vld [vmem:[%s7419_s3 + $0x790] sm:$0xff]  ;;  %v2225_v33 = vld [vmem:[%s7419_s3 + $0xad8] sm:$0xff] }
 0x2ad   : > { %3056 = vmatpush.msrb.mxu1 %v1890_v17  ;;  %3076 = vmatpush.msrb.mxu3 %v1970_v18  ;;  %v2305_v16 = vld [vmem:[%s7419_s3 + $0xd58] sm:$0xff]  ;;  %v2435_v17 = vld [vmem:[%s7419_s3 + $0x1168] sm:$0xff] }
 0x2ae   : > { %3086 = vmatpush.msrb.mxu0 %v2100_v19  ;;  %3106 = vmatpush.msrb.mxu2 %v2180_v20  ;;  %v2515_v18 = vld [vmem:[%s7419_s3 + $0x13e8] sm:$0xff]  ;;  %v2220_v19 = vld [vmem:[%s7419_s3 + $0xab0] sm:$0xff] }
 0x2af   : > { %3057 = vmatpush.msrb.mxu1 %v1885_v61  ;;  %3077 = vmatpush.msrb.mxu3 %v1965_v21  ;;  %v2300_v20 = vld [vmem:[%s7419_s3 + $0xd30] sm:$0xff]  ;;  %v2430_v61 = vld [vmem:[%s7419_s3 + $0x1140] sm:$0xff] }
 0x2b0   : > { %3087 = vmatpush.msrb.mxu0 %v2095_v23  ;;  %3107 = vmatpush.msrb.mxu2 %v2175_v1  ;;  %v2510_v21 = vld [vmem:[%s7419_s3 + $0x13c0] sm:$0xff]  ;;  %v2215_v23 = vld [vmem:[%s7419_s3 + $0xa88] sm:$0xff] }
 0x2b1   : > { %3058 = vmatpush.msrb.mxu1 %v1880_v24  ;;  %3078 = vmatpush.msrb.mxu3 %v1960_v25  ;;  %v2295_v1 = vld [vmem:[%s7419_s3 + $0xd08] sm:$0xff]  ;;  %v2425_v24 = vld [vmem:[%s7419_s3 + $0x1118] sm:$0xff] }
 0x2b2   : > { %3088 = vmatpush.msrb.mxu0 %v2090_v26  ;;  %3108 = vmatpush.msrb.mxu2 %v2170_v6  ;;  %v2505_v25 = vld [vmem:[%s7419_s3 + $0x1398] sm:$0xff]  ;;  %v2210_v26 = vld [vmem:[%s7419_s3 + $0xa60] sm:$0xff] }
 0x2b3   : > { %3123 = vmatpush.msra.mxu1 %v2275_v7  ;;  %3143 = vmatpush.msra.mxu3 %v2355_v28  ;;  %v2290_v6 = vld [vmem:[%s7419_s3 + $0xce0] sm:$0xff]  ;;  %v2420_v7 = vld [vmem:[%s7419_s3 + $0x10f0] sm:$0xff] }
 0x2b4   : > { %3089 = vmatpush.msrb.mxu0 %v2085_v29  ;;  %3109 = vmatpush.msrb.mxu2 %v2165_v31  ;;  %v2500_v28 = vld [vmem:[%s7419_s3 + $0x1370] sm:$0xff]  ;;  %v2205_v29 = vld [vmem:[%s7419_s3 + $0xa38] sm:$0xff] }
 0x2b5   : > { %3124 = vmatpush.msra.mxu1 %v2270_v32  ;;  %3144 = vmatpush.msra.mxu3 %v2350_v34  ;;  %v2285_v31 = vld [vmem:[%s7419_s3 + $0xcb8] sm:$0xff]  ;;  %v2415_v32 = vld [vmem:[%s7419_s3 + $0x10c8] sm:$0xff] }
 0x2b6   : > { %3090 = vmatpush.msrb.mxu0 %v2080_v35  ;;  %3110 = vmatpush.msrb.mxu2 %v2160_v36  ;;  %v2495_v34 = vld [vmem:[%s7419_s3 + $0x1348] sm:$0xff]  ;;  %v2200_v35 = vld [vmem:[%s7419_s3 + $0xa10] sm:$0xff] }
 0x2b7   : > { %3125 = vmatpush.msra.mxu1 %v2265_v37  ;;  %3145 = vmatpush.msra.mxu3 %v2345_v38  ;;  %v2280_v36 = vld [vmem:[%s7419_s3 + $0xc90] sm:$0xff]  ;;  %v2410_v37 = vld [vmem:[%s7419_s3 + $0x10a0] sm:$0xff] }
 0x2b8   : > { %3091 = vmatpush.msrb.mxu0 %v2075_v41  ;;  %3111 = vmatpush.msrb.mxu2 %v2155_v42  ;;  %v2490_v38 = vld [vmem:[%s7419_s3 + $0x1320] sm:$0xff]  ;;  %v2595_v41 = vld [vmem:[%s7419_s3 + $0x1668] sm:$0xff]  ;;  %v2625_v42 = vld [vmem:[%s7419_s3 + $0x1758] sm:$0xff] }
 0x2b9   : > { %3126 = vmatpush.msra.mxu1 %v2260_v43  ;;  %3146 = vmatpush.msra.mxu3 %v2340_v47  ;;  %v2405_v43 = vld [vmem:[%s7419_s3 + $0x1078] sm:$0xff] }
 0x2ba   : > { %3092 = vmatpush.msrb.mxu0 %v2070_v48  ;;  %3112 = vmatpush.msrb.mxu2 %v2150_v49  ;;  %v2485_v47 = vld [vmem:[%s7419_s3 + $0x12f8] sm:$0xff]  ;;  %v2590_v48 = vld [vmem:[%s7419_s3 + $0x1640] sm:$0xff]  ;;  %v2620_v49 = vld [vmem:[%s7419_s3 + $0x1730] sm:$0xff] }
 0x2bb   : > { %3127 = vmatpush.msra.mxu1 %v2255_v51  ;;  %3147 = vmatpush.msra.mxu3 %v2335_v52  ;;  %v2400_v51 = vld [vmem:[%s7419_s3 + $0x1050] sm:$0xff] }
 0x2bc   : > { %3093 = vmatpush.msrb.mxu0 %v2065_v53  ;;  %3113 = vmatpush.msrb.mxu2 %v2145_v54  ;;  %v2480_v52 = vld [vmem:[%s7419_s3 + $0x12d0] sm:$0xff]  ;;  %v2585_v53 = vld [vmem:[%s7419_s3 + $0x1618] sm:$0xff]  ;;  %v2615_v54 = vld [vmem:[%s7419_s3 + $0x1708] sm:$0xff] }
 0x2bd   : > { %3128 = vmatpush.msra.mxu1 %v2250_v55  ;;  %3148 = vmatpush.msra.mxu3 %v2330_v56  ;;  %v2395_v55 = vld [vmem:[%s7419_s3 + $0x1028] sm:$0xff] }
 0x2be   : > { %3094 = vmatpush.msrb.mxu0 %v2060_v57  ;;  %3114 = vmatpush.msrb.mxu2 %v2140_v58  ;;  %v2475_v56 = vld [vmem:[%s7419_s3 + $0x12a8] sm:$0xff]  ;;  %v2580_v57 = vld [vmem:[%s7419_s3 + $0x15f0] sm:$0xff]  ;;  %v2610_v58 = vld [vmem:[%s7419_s3 + $0x16e0] sm:$0xff] }
 0x2bf   : > { %3129 = vmatpush.msra.mxu1 %v2245_v59  ;;  %3149 = vmatpush.msra.mxu3 %v2325_v60  ;;  %v2390_v59 = vld [vmem:[%s7419_s3 + $0x1000] sm:$0xff] }
 0x2c0   : > { %3095 = vmatpush.msrb.mxu0 %v2055_v62  ;;  %3115 = vmatpush.msrb.mxu2 %v2135_v63  ;;  %v2470_v60 = vld [vmem:[%s7419_s3 + $0x1280] sm:$0xff]  ;;  %v2575_v62 = vld [vmem:[%s7419_s3 + $0x15c8] sm:$0xff]  ;;  %v2605_v63 = vld [vmem:[%s7419_s3 + $0x16b8] sm:$0xff] }
 0x2c1   : > { %3130 = vmatpush.msra.mxu1 %v2240_v0  ;;  %3150 = vmatpush.msra.mxu3 %v2320_v2  ;;  %v2385_v0 = vld [vmem:[%s7419_s3 + $0xfd8] sm:$0xff] }
 0x2c2   : > { %3096 = vmatpush.msrb.mxu0 %v2050_v3  ;;  %3116 = vmatpush.msrb.mxu2 %v2130_v4  ;;  %v2465_v2 = vld [vmem:[%s7419_s3 + $0x1258] sm:$0xff]  ;;  %v2570_v3 = vld [vmem:[%s7419_s3 + $0x15a0] sm:$0xff]  ;;  %v2600_v4 = vld [vmem:[%s7419_s3 + $0x1690] sm:$0xff] }
 0x2c3   : > { %3131 = vmatpush.msra.mxu1 %v2235_v5  ;;  %3151 = vmatpush.msra.mxu3 %v2315_v22  ;;  %v2380_v5 = vld [vmem:[%s7419_s3 + $0xfb0] sm:$0xff] }
 0x2c4   : > { %3097 = vmatpush.msrb.mxu0 %v2045_v8  ;;  %3117 = vmatpush.msrb.mxu2 %v2125_v9  ;;  %v2460_v22 = vld [vmem:[%s7419_s3 + $0x1230] sm:$0xff]  ;;  %v2565_v9 = vld [vmem:[%s7419_s3 + $0x1578] sm:$0xff] }
 0x2c5   : > { %3132 = vmatpush.msra.mxu1 %v2230_v10  ;;  %3152 = vmatpush.msra.mxu3 %v2310_v14  ;;  %v1956_v8 = vld [vmem:[%s7419_s3 + $0x270] sm:$0xff]  ;;  %v2375_v10 = vld [vmem:[%s7419_s3 + $0xf88] sm:$0xff] }
 0x2c6   : > { %3098 = vmatpush.msrb.mxu0 %v2040_v30  ;;  %3118 = vmatpush.msrb.mxu2 %v2120_v15  ;;  %v2455_v14 = vld [vmem:[%s7419_s3 + $0x1208] sm:$0xff]  ;;  %v2560_v15 = vld [vmem:[%s7419_s3 + $0x1550] sm:$0xff] }
 0x2c7   : > { %3133 = vmatpush.msra.mxu1 %v2225_v33  ;;  %3153 = vmatpush.msra.mxu3 %v2305_v16  ;;  %v1951_v30 = vld [vmem:[%s7419_s3 + $0x248] sm:$0xff]  ;;  %v2450_v33 = vld [vmem:[%s7419_s3 + $0x11e0] sm:$0xff] }
 0x2c8   : > { %3163 = vmatpush.msra.mxu0 %v2435_v17  ;;  %3183 = vmatpush.msra.mxu2 %v2515_v18  ;;  %v2370_v16 = vld [vmem:[%s7419_s3 + $0xf60] sm:$0xff]  ;;  %v2555_v18 = vld [vmem:[%s7419_s3 + $0x1528] sm:$0xff] }
 0x2c9   : > { %3134 = vmatpush.msra.mxu1 %v2220_v19  ;;  %3154 = vmatpush.msra.mxu3 %v2300_v20  ;;  %v1946_v17 = vld [vmem:[%s7419_s3 + $0x220] sm:$0xff]  ;;  %v2445_v19 = vld [vmem:[%s7419_s3 + $0x11b8] sm:$0xff] }
 0x2ca   : > { %3164 = vmatpush.msra.mxu0 %v2430_v61  ;;  %3184 = vmatpush.msra.mxu2 %v2510_v21  ;;  %v2365_v20 = vld [vmem:[%s7419_s3 + $0xf38] sm:$0xff]  ;;  %v2550_v21 = vld [vmem:[%s7419_s3 + $0x1500] sm:$0xff] }
 0x2cb   : > { %3135 = vmatpush.msra.mxu1 %v2215_v23  ;;  %3155 = vmatpush.msra.mxu3 %v2295_v1  ;;  %v1941_v61 = vld [vmem:[%s7419_s3 + $0x1f8] sm:$0xff]  ;;  %v2440_v23 = vld [vmem:[%s7419_s3 + $0x1190] sm:$0xff] }
 0x2cc   : > { %3165 = vmatpush.msra.mxu0 %v2425_v24  ;;  %3185 = vmatpush.msra.mxu2 %v2505_v25  ;;  %v2360_v1 = vld [vmem:[%s7419_s3 + $0xf10] sm:$0xff]  ;;  %v2545_v25 = vld [vmem:[%s7419_s3 + $0x14d8] sm:$0xff] }
 0x2cd   : > { %3136 = vmatpush.msra.mxu1 %v2210_v26  ;;  %3156 = vmatpush.msra.mxu3 %v2290_v6  ;;  %v1936_v24 = vld [vmem:[%s7419_s3 + $0x1d0] sm:$0xff] }
 0x2ce   : > { %3166 = vmatpush.msra.mxu0 %v2420_v7  ;;  %3186 = vmatpush.msra.mxu2 %v2500_v28  ;;  %v2036_v26 = vld [vmem:[%s7419_s3 + $0x4f0] sm:$0xff]  ;;  %v1931_v7 = vld [vmem:[%s7419_s3 + $0x1a8] sm:$0xff] }
 0x2cf   : > { %3137 = vmatpush.msra.mxu1 %v2205_v29  ;;  %3157 = vmatpush.msra.mxu3 %v2285_v31  ;;  %v2116_v6 = vld [vmem:[%s7419_s3 + $0x770] sm:$0xff]  ;;  %v2031_v29 = vld [vmem:[%s7419_s3 + $0x4c8] sm:$0xff] }
 0x2d0   : > { %3167 = vmatpush.msra.mxu0 %v2415_v32  ;;  %3187 = vmatpush.msra.mxu2 %v2495_v34  ;;  %v2540_v28 = vld [vmem:[%s7419_s3 + $0x14b0] sm:$0xff]  ;;  %v2111_v31 = vld [vmem:[%s7419_s3 + $0x748] sm:$0xff]  ;;  %v1926_v32 = vld [vmem:[%s7419_s3 + $0x180] sm:$0xff] }
 0x2d1   : > { %3138 = vmatpush.msra.mxu1 %v2200_v35  ;;  %3158 = vmatpush.msra.mxu3 %v2280_v36  ;;  %v2535_v34 = vld [vmem:[%s7419_s3 + $0x1488] sm:$0xff]  ;;  %v2026_v35 = vld [vmem:[%s7419_s3 + $0x4a0] sm:$0xff] }
 0x2d2   : > { %3168 = vmatpush.msra.mxu0 %v2410_v37  ;;  %3188 = vmatpush.msra.mxu2 %v2490_v38  ;;  %v2106_v36 = vld [vmem:[%s7419_s3 + $0x720] sm:$0xff]  ;;  %v1921_v37 = vld [vmem:[%s7419_s3 + $0x158] sm:$0xff] }
 0x2d3   : > { %3059 = vmatmul.f32.vlgmr.msrb.gmra.mxu1 %v5158_v11  ;;  %3079 = vmatmul.f32.vlgmr.msrb.gmra.mxu3 %v5160_v27  ;;  %v2530_v38 = vld [vmem:[%s7419_s3 + $0x1460] sm:$0xff] }
 0x2d4   : > { %3203 = vmatpush.msrb.mxu1 %v2595_v41  ;;  %3233 = vmatpush.msrb.mxu3 %v2625_v42  ;;  %v2021_v41 = vld [vmem:[%s7419_s3 + $0x478] sm:$0xff] }
 0x2d5   : > { %3169 = vmatpush.msra.mxu0 %v2405_v43  ;;  %3189 = vmatpush.msra.mxu2 %v2485_v47  ;;  %v2101_v42 = vld [vmem:[%s7419_s3 + $0x6f8] sm:$0xff]  ;;  %v1916_v47 = vld [vmem:[%s7419_s3 + $0x130] sm:$0xff] }
 0x2d6   : > { %3204 = vmatpush.msrb.mxu1 %v2590_v48  ;;  %3234 = vmatpush.msrb.mxu3 %v2620_v49  ;;  %v2525_v43 = vld [vmem:[%s7419_s3 + $0x1438] sm:$0xff]  ;;  %v2016_v48 = vld [vmem:[%s7419_s3 + $0x450] sm:$0xff] }
 0x2d7   : > { %3170 = vmatpush.msra.mxu0 %v2400_v51  ;;  %3190 = vmatpush.msra.mxu2 %v2480_v52  ;;  %v2096_v49 = vld [vmem:[%s7419_s3 + $0x6d0] sm:$0xff]  ;;  %v1911_v52 = vld [vmem:[%s7419_s3 + $0x108] sm:$0xff] }
 0x2d8   : > { %3205 = vmatpush.msrb.mxu1 %v2585_v53  ;;  %3235 = vmatpush.msrb.mxu3 %v2615_v54  ;;  %v2520_v51 = vld [vmem:[%s7419_s3 + $0x1410] sm:$0xff]  ;;  %v2011_v53 = vld [vmem:[%s7419_s3 + $0x428] sm:$0xff] }
 0x2d9   : > { %3171 = vmatpush.msra.mxu0 %v2395_v55  ;;  %3191 = vmatpush.msra.mxu2 %v2475_v56  ;;  %v2091_v54 = vld [vmem:[%s7419_s3 + $0x6a8] sm:$0xff]  ;;  %v1906_v55 = vld [vmem:[%s7419_s3 + $0xe0] sm:$0xff]  ;;  %v2196_v56 = vld [vmem:[%s7419_s3 + $0x9f0] sm:$0xff] }
 0x2da   : > { %3206 = vmatpush.msrb.mxu1 %v2580_v57  ;;  %3236 = vmatpush.msrb.mxu3 %v2610_v58  ;;  %v2006_v57 = vld [vmem:[%s7419_s3 + $0x400] sm:$0xff] }
 0x2db   : > { %3172 = vmatpush.msra.mxu0 %v2390_v59  ;;  %3192 = vmatpush.msra.mxu2 %v2470_v60  ;;  %v2086_v58 = vld [vmem:[%s7419_s3 + $0x680] sm:$0xff]  ;;  %v1901_v59 = vld [vmem:[%s7419_s3 + $0xb8] sm:$0xff]  ;;  %v2191_v60 = vld [vmem:[%s7419_s3 + $0x9c8] sm:$0xff] }
 0x2dc   : > { %3207 = vmatpush.msrb.mxu1 %v2575_v62  ;;  %3237 = vmatpush.msrb.mxu3 %v2605_v63  ;;  %v2001_v62 = vld [vmem:[%s7419_s3 + $0x3d8] sm:$0xff] }
 0x2dd   : > { %3173 = vmatpush.msra.mxu0 %v2385_v0  ;;  %3193 = vmatpush.msra.mxu2 %v2465_v2  ;;  %v2081_v63 = vld [vmem:[%s7419_s3 + $0x658] sm:$0xff]  ;;  %v1896_v0 = vld [vmem:[%s7419_s3 + $0x90] sm:$0xff]  ;;  %v2186_v2 = vld [vmem:[%s7419_s3 + $0x9a0] sm:$0xff] }
 0x2de   : > { %3208 = vmatpush.msrb.mxu1 %v2570_v3  ;;  %3238 = vmatpush.msrb.mxu3 %v2600_v4  ;;  %v1996_v3 = vld [vmem:[%s7419_s3 + $0x3b0] sm:$0xff] }
 0x2df   : > { %3119 = vmatmul.f32.vlgmr.msrb.gmra.mxu2 %v5164_v13  ;;  %3159 = vmatmul.f32.vlgmr.msra.gmra.mxu3 %v5250_v50  ;;  %v2076_v4 = vld [vmem:[%s7419_s3 + $0x630] sm:$0xff] }
 0x2e0   : > { %3174 = vmatpush.msra.mxu0 %v2380_v5  ;;  %3194 = vmatpush.msra.mxu2 %v2460_v22  ;;  %v1891_v5 = vld [vmem:[%s7419_s3 + $0x68] sm:$0xff]  ;;  %v2181_v22 = vld [vmem:[%s7419_s3 + $0x978] sm:$0xff] }
 0x2e1   : > { %3243 = vmatpush.msra.mxu3 %v1956_v8  ;;  %3209 = vmatpush.msrb.mxu1 %v2565_v9  ;;  %v1991_v8 = vld [vmem:[%s7419_s3 + $0x388] sm:$0xff] }
 0x2e2   : > { %3175 = vmatpush.msra.mxu0 %v2375_v10  ;;  %3195 = vmatpush.msra.mxu2 %v2455_v14  ;;  %v2071_v9 = vld [vmem:[%s7419_s3 + $0x608] sm:$0xff]  ;;  %v1886_v10 = vld [vmem:[%s7419_s3 + $0x40] sm:$0xff]  ;;  %v2176_v14 = vld [vmem:[%s7419_s3 + $0x950] sm:$0xff] }
 0x2e3   : > { %3244 = vmatpush.msra.mxu3 %v1951_v30  ;;  %3210 = vmatpush.msrb.mxu1 %v2560_v15  ;;  %v1986_v30 = vld [vmem:[%s7419_s3 + $0x360] sm:$0xff] }
 0x2e4   : > { %3099 = vmatmul.f32.vlgmr.msrb.gmra.mxu0 %v5162_v12  ;;  %3196 = vmatpush.msra.mxu2 %v2450_v33  ;;  %v2066_v15 = vld [vmem:[%s7419_s3 + $0x5e0] sm:$0xff]  ;;  %v1881_v33 = vld [vmem:[%s7419_s3 + $0x18] sm:$0xff] }
 0x2e5   : > { %3176 = vmatpush.msra.mxu0 %v2370_v16  ;;  %3245 = vmatpush.msra.mxu3 %v1946_v17  ;;  %v2171_v16 = vld [vmem:[%s7419_s3 + $0x928] sm:$0xff]  ;;  %v1981_v17 = vld [vmem:[%s7419_s3 + $0x338] sm:$0xff] }
 0x2e6   : > { %3211 = vmatpush.msrb.mxu1 %v2555_v18  ;;  %3197 = vmatpush.msra.mxu2 %v2445_v19  ;;  %v2061_v18 = vld [vmem:[%s7419_s3 + $0x5b8] sm:$0xff]  ;;  %v2276_v19 = vld [vmem:[%s7419_s3 + $0xc70] sm:$0xff] }
 0x2e7   : > { %3177 = vmatpush.msra.mxu0 %v2365_v20  ;;  %3246 = vmatpush.msra.mxu3 %v1941_v61  ;;  %v2166_v20 = vld [vmem:[%s7419_s3 + $0x900] sm:$0xff]  ;;  %v1976_v61 = vld [vmem:[%s7419_s3 + $0x310] sm:$0xff] }
 0x2e8   : > { %3212 = vmatpush.msrb.mxu1 %v2550_v21  ;;  %3198 = vmatpush.msra.mxu2 %v2440_v23  ;;  %v2056_v21 = vld [vmem:[%s7419_s3 + $0x590] sm:$0xff]  ;;  %v2271_v23 = vld [vmem:[%s7419_s3 + $0xc48] sm:$0xff] }
 0x2e9   : > { %3139 = vmatmul.f32.vlgmr.msra.gmra.mxu1 %v5233_v44  ;;  %3178 = vmatpush.msra.mxu0 %v2360_v1  ;;  %v2161_v1 = vld [vmem:[%s7419_s3 + $0x8d8] sm:$0xff] }
 0x2ea   : > { %3247 = vmatpush.msra.mxu3 %v1936_v24  ;;  %3199 = vmatmul.f32.vlgmr.msra.gmra.mxu2 %v5238_v46  ;;  %v1971_v24 = vld [vmem:[%s7419_s3 + $0x2e8] sm:$0xff] }
 0x2eb   : > { %3213 = vmatpush.msrb.mxu1 %v2545_v25  ;;  %3263 = vmatpush.msrb.mxu0 %v2036_v26  ;;  %v2051_v25 = vld [vmem:[%s7419_s3 + $0x568] sm:$0xff]  ;;  %v2266_v26 = vld [vmem:[%s7419_s3 + $0xc20] sm:$0xff] }
 0x2ec   : > { %3283 = vmatpush.msrb.mxu2 %v2116_v6  ;;  %3248 = vmatpush.msra.mxu3 %v1931_v7  ;;  %v2156_v6 = vld [vmem:[%s7419_s3 + $0x8b0] sm:$0xff]  ;;  %v1966_v7 = vld [vmem:[%s7419_s3 + $0x2c0] sm:$0xff] }
 0x2ed   : > { %3214 = vmatpush.msrb.mxu1 %v2540_v28  ;;  %3264 = vmatpush.msrb.mxu0 %v2031_v29  ;;  %v2046_v28 = vld [vmem:[%s7419_s3 + $0x540] sm:$0xff]  ;;  %v2261_v29 = vld [vmem:[%s7419_s3 + $0xbf8] sm:$0xff] }
 0x2ee   : > { %3284 = vmatpush.msrb.mxu2 %v2111_v31  ;;  %3179 = vmatmul.f32.vlgmr.msra.gmra.mxu0 %v5222_v39  ;;  %v2151_v31 = vld [vmem:[%s7419_s3 + $0x888] sm:$0xff] }
 0x2ef   : > { %3249 = vmatpush.msra.mxu3 %v1926_v32  ;;  %3215 = vmatpush.msrb.mxu1 %v2535_v34  ;;  %v1961_v32 = vld [vmem:[%s7419_s3 + $0x298] sm:$0xff] }
 0x2f0   : > { %3265 = vmatpush.msrb.mxu0 %v2026_v35  ;;  %3285 = vmatpush.msrb.mxu2 %v2106_v36  ;;  %v2041_v34 = vld [vmem:[%s7419_s3 + $0x518] sm:$0xff]  ;;  %v2256_v35 = vld [vmem:[%s7419_s3 + $0xbd0] sm:$0xff]  ;;  %v2146_v36 = vld [vmem:[%s7419_s3 + $0x860] sm:$0xff] }
 0x2f1   : > { %3250 = vmatpush.msra.mxu3 %v1921_v37  ;;  %3216 = vmatpush.msrb.mxu1 %v2530_v38  ;;  %v2356_v37 = vld [vmem:[%s7419_s3 + $0xef0] sm:$0xff] }
 0x2f2   : > { %3266 = vmatpush.msrb.mxu0 %v2021_v41  ;;  %3286 = vmatpush.msrb.mxu2 %v2101_v42  ;;  %v2436_v38 = vld [vmem:[%s7419_s3 + $0x1170] sm:$0xff]  ;;  %v2251_v41 = vld [vmem:[%s7419_s3 + $0xba8] sm:$0xff]  ;;  %v2141_v42 = vld [vmem:[%s7419_s3 + $0x838] sm:$0xff] }
 0x2f3   : > { %3923 = vmatmul.msk.f32.vlgmr.msrb.gmra.mxu3 %vm1818_vm1, %v5392_v45  ;;  %3217 = vmatpush.msrb.mxu1 %v2525_v43  ;;  %v2351_v43 = vld [vmem:[%s7419_s3 + $0xec8] sm:$0xff] }
 0x2f4   : > { %3251 = vmatpush.msra.mxu3 %v1916_v47  ;;  %3267 = vmatpush.msrb.mxu0 %v2016_v48  ;;  %v2431_v47 = vld [vmem:[%s7419_s3 + $0x1148] sm:$0xff]  ;;  %v2246_v48 = vld [vmem:[%s7419_s3 + $0xb80] sm:$0xff] }
 0x2f5   : > { %3287 = vmatpush.msrb.mxu2 %v2096_v49  ;;  %3218 = vmatpush.msrb.mxu1 %v2520_v51  ;;  %v2136_v49 = vld [vmem:[%s7419_s3 + $0x810] sm:$0xff]  ;;  %v2346_v51 = vld [vmem:[%s7419_s3 + $0xea0] sm:$0xff] }
 0x2f6   : > { %3252 = vmatpush.msra.mxu3 %v1911_v52  ;;  %3268 = vmatpush.msrb.mxu0 %v2011_v53  ;;  %v2426_v52 = vld [vmem:[%s7419_s3 + $0x1120] sm:$0xff]  ;;  %v2241_v53 = vld [vmem:[%s7419_s3 + $0xb58] sm:$0xff] }
 0x2f7   : > { %3288 = vmatpush.msrb.mxu2 %v2091_v54  ;;  %3219 = vmatmul.f32.vlgmr.msrb.gmra.mxu1 %v5381_v40  ;;  %v2131_v54 = vld [vmem:[%s7419_s3 + $0x7e8] sm:$0xff] }
 0x2f8   : > { %3253 = vmatpush.msra.mxu3 %v1906_v55  ;;  %3303 = vmatpush.msra.mxu1 %v2196_v56  ;;  %v2341_v55 = vld [vmem:[%s7419_s3 + $0xe78] sm:$0xff] }
 0x2f9   : > { %3269 = vmatpush.msrb.mxu0 %v2006_v57  ;;  %3289 = vmatpush.msrb.mxu2 %v2086_v58  ;;  %v2421_v56 = vld [vmem:[%s7419_s3 + $0x10f8] sm:$0xff]  ;;  %v2236_v57 = vld [vmem:[%s7419_s3 + $0xb30] sm:$0xff]  ;;  %v2126_v58 = vld [vmem:[%s7419_s3 + $0x7c0] sm:$0xff] }
 0x2fa   : > { %3254 = vmatpush.msra.mxu3 %v1901_v59  ;;  %3304 = vmatpush.msra.mxu1 %v2191_v60  ;;  %v2336_v59 = vld [vmem:[%s7419_s3 + $0xe50] sm:$0xff] }
 0x2fb   : > { %3270 = vmatpush.msrb.mxu0 %v2001_v62  ;;  %3290 = vmatpush.msrb.mxu2 %v2081_v63  ;;  %v2416_v60 = vld [vmem:[%s7419_s3 + $0x10d0] sm:$0xff]  ;;  %v2231_v62 = vld [vmem:[%s7419_s3 + $0xb08] sm:$0xff]  ;;  %v2121_v63 = vld [vmem:[%s7419_s3 + $0x798] sm:$0xff] }
 0x2fc   : > { %3255 = vmatpush.msra.mxu3 %v1896_v0  ;;  %3305 = vmatpush.msra.mxu1 %v2186_v2  ;;  %v2331_v0 = vld [vmem:[%s7419_s3 + $0xe28] sm:$0xff] }
 0x2fd   : > { %3271 = vmatpush.msrb.mxu0 %v1996_v3  ;;  %3291 = vmatpush.msrb.mxu2 %v2076_v4  ;;  %v2411_v2 = vld [vmem:[%s7419_s3 + $0x10a8] sm:$0xff]  ;;  %v2226_v3 = vld [vmem:[%s7419_s3 + $0xae0] sm:$0xff]  ;;  %v2516_v4 = vld [vmem:[%s7419_s3 + $0x13f0] sm:$0xff] }
 0x2fe   : > { %3256 = vmatpush.msra.mxu3 %v1891_v5  ;;  %3306 = vmatpush.msra.mxu1 %v2181_v22  ;;  %v2326_v5 = vld [vmem:[%s7419_s3 + $0xe00] sm:$0xff] }
 0x2ff   : > { %3272 = vmatpush.msrb.mxu0 %v1991_v8  ;;  %3292 = vmatpush.msrb.mxu2 %v2071_v9  ;;  %v2406_v22 = vld [vmem:[%s7419_s3 + $0x1080] sm:$0xff]  ;;  %v2221_v8 = vld [vmem:[%s7419_s3 + $0xab8] sm:$0xff]  ;;  %v2511_v9 = vld [vmem:[%s7419_s3 + $0x13c8] sm:$0xff] }
 0x300   : > { %3257 = vmatpush.msra.mxu3 %v1886_v10  ;;  %3307 = vmatpush.msra.mxu1 %v2176_v14  ;;  %v2321_v10 = vld [vmem:[%s7419_s3 + $0xdd8] sm:$0xff] }
 0x301   : > { %3273 = vmatpush.msrb.mxu0 %v1986_v30  ;;  %3293 = vmatpush.msrb.mxu2 %v2066_v15  ;;  %v2401_v14 = vld [vmem:[%s7419_s3 + $0x1058] sm:$0xff]  ;;  %v2216_v30 = vld [vmem:[%s7419_s3 + $0xa90] sm:$0xff]  ;;  %v2506_v15 = vld [vmem:[%s7419_s3 + $0x13a0] sm:$0xff] }
 0x302   : > { %3258 = vmatpush.msra.mxu3 %v1881_v33  ;;  %3308 = vmatpush.msra.mxu1 %v2171_v16  ;;  %v2316_v33 = vld [vmem:[%s7419_s3 + $0xdb0] sm:$0xff] }
 0x303   : > { %3274 = vmatpush.msrb.mxu0 %v1981_v17  ;;  %3294 = vmatpush.msrb.mxu2 %v2061_v18  ;;  %v2396_v16 = vld [vmem:[%s7419_s3 + $0x1030] sm:$0xff]  ;;  %v2211_v17 = vld [vmem:[%s7419_s3 + $0xa68] sm:$0xff]  ;;  %v2501_v18 = vld [vmem:[%s7419_s3 + $0x1378] sm:$0xff] }
 0x304   : > { %3323 = vmatpush.msrb.mxu3 %v2276_v19  ;;  %3309 = vmatpush.msra.mxu1 %v2166_v20  ;;  %v2311_v19 = vld [vmem:[%s7419_s3 + $0xd88] sm:$0xff] }
 0x305   : > { %3275 = vmatpush.msrb.mxu0 %v1976_v61  ;;  %3295 = vmatpush.msrb.mxu2 %v2056_v21  ;;  %v2391_v20 = vld [vmem:[%s7419_s3 + $0x1008] sm:$0xff]  ;;  %v2206_v61 = vld [vmem:[%s7419_s3 + $0xa40] sm:$0xff]  ;;  %v2496_v21 = vld [vmem:[%s7419_s3 + $0x1350] sm:$0xff] }
 0x306   : > { %3324 = vmatpush.msrb.mxu3 %v2271_v23  ;;  %3310 = vmatpush.msra.mxu1 %v2161_v1  ;;  %v2306_v23 = vld [vmem:[%s7419_s3 + $0xd60] sm:$0xff] }
 0x307   : > { %3276 = vmatpush.msrb.mxu0 %v1971_v24  ;;  %3296 = vmatpush.msrb.mxu2 %v2051_v25  ;;  %v2386_v1 = vld [vmem:[%s7419_s3 + $0xfe0] sm:$0xff]  ;;  %v2201_v24 = vld [vmem:[%s7419_s3 + $0xa18] sm:$0xff]  ;;  %v2491_v25 = vld [vmem:[%s7419_s3 + $0x1328] sm:$0xff] }
 0x308   : > { %3325 = vmatpush.msrb.mxu3 %v2266_v26  ;;  %3311 = vmatpush.msra.mxu1 %v2156_v6  ;;  %v2301_v26 = vld [vmem:[%s7419_s3 + $0xd38] sm:$0xff] }
 0x309   : > { %3277 = vmatpush.msrb.mxu0 %v1966_v7  ;;  %3297 = vmatpush.msrb.mxu2 %v2046_v28  ;;  %v2381_v6 = vld [vmem:[%s7419_s3 + $0xfb8] sm:$0xff]  ;;  %v2596_v7 = vld [vmem:[%s7419_s3 + $0x1670] sm:$0xff]  ;;  %v2486_v28 = vld [vmem:[%s7419_s3 + $0x1300] sm:$0xff] }
 0x30a   : > { %3326 = vmatpush.msrb.mxu3 %v2261_v29  ;;  %3312 = vmatpush.msra.mxu1 %v2151_v31  ;;  %v2296_v29 = vld [vmem:[%s7419_s3 + $0xd10] sm:$0xff] }
 0x30b   : > { %3278 = vmatpush.msrb.mxu0 %v1961_v32  ;;  %3298 = vmatpush.msrb.mxu2 %v2041_v34  ;;  %v2376_v31 = vld [vmem:[%s7419_s3 + $0xf90] sm:$0xff]  ;;  %v2591_v32 = vld [vmem:[%s7419_s3 + $0x1648] sm:$0xff]  ;;  %v2481_v34 = vld [vmem:[%s7419_s3 + $0x12d8] sm:$0xff] }
 0x30c   : > { %3327 = vmatpush.msrb.mxu3 %v2256_v35  ;;  %3313 = vmatpush.msra.mxu1 %v2146_v36  ;;  %v2291_v35 = vld [vmem:[%s7419_s3 + $0xce8] sm:$0xff] }
 0x30d   : > { %3343 = vmatpush.msra.mxu0 %v2356_v37  ;;  %3363 = vmatpush.msra.mxu2 %v2436_v38  ;;  %v2371_v36 = vld [vmem:[%s7419_s3 + $0xf68] sm:$0xff]  ;;  %v2586_v37 = vld [vmem:[%s7419_s3 + $0x1620] sm:$0xff]  ;;  %v2476_v38 = vld [vmem:[%s7419_s3 + $0x12b0] sm:$0xff] }
 0x30e   : > { %3328 = vmatpush.msrb.mxu3 %v2251_v41  ;;  %3314 = vmatpush.msra.mxu1 %v2141_v42  ;;  %v2286_v41 = vld [vmem:[%s7419_s3 + $0xcc0] sm:$0xff] }
 0x30f   : > { %3344 = vmatpush.msra.mxu0 %v2351_v43  ;;  %3364 = vmatpush.msra.mxu2 %v2431_v47  ;;  %v2366_v42 = vld [vmem:[%s7419_s3 + $0xf40] sm:$0xff]  ;;  %v2581_v43 = vld [vmem:[%s7419_s3 + $0x15f8] sm:$0xff]  ;;  %v2471_v47 = vld [vmem:[%s7419_s3 + $0x1288] sm:$0xff] }
 0x310   : > { %3329 = vmatpush.msrb.mxu3 %v2246_v48  ;;  %3315 = vmatpush.msra.mxu1 %v2136_v49  ;;  %v2281_v48 = vld [vmem:[%s7419_s3 + $0xc98] sm:$0xff] }
 0x311   : > { %3345 = vmatpush.msra.mxu0 %v2346_v51  ;;  %3365 = vmatpush.msra.mxu2 %v2426_v52  ;;  %v2361_v49 = vld [vmem:[%s7419_s3 + $0xf18] sm:$0xff]  ;;  %v2576_v51 = vld [vmem:[%s7419_s3 + $0x15d0] sm:$0xff]  ;;  %v2466_v52 = vld [vmem:[%s7419_s3 + $0x1260] sm:$0xff] }
 0x312   : > { %3330 = vmatpush.msrb.mxu3 %v2241_v53  ;;  %3316 = vmatpush.msra.mxu1 %v2131_v54  ;;  %v2626_v53 = vld [vmem:[%s7419_s3 + $0x1760] sm:$0xff]  ;;  %v1957_v54 = vld [vmem:[%s7419_s3 + $0x278] sm:$0xff] }
 0x313   : > { %3346 = vmatpush.msra.mxu0 %v2341_v55  ;;  %3366 = vmatpush.msra.mxu2 %v2421_v56  ;;  %v2571_v55 = vld [vmem:[%s7419_s3 + $0x15a8] sm:$0xff]  ;;  %v2461_v56 = vld [vmem:[%s7419_s3 + $0x1238] sm:$0xff] }
 0x314   : > { %3331 = vmatpush.msrb.mxu3 %v2236_v57  ;;  %3317 = vmatpush.msra.mxu1 %v2126_v58  ;;  %v2621_v57 = vld [vmem:[%s7419_s3 + $0x1738] sm:$0xff]  ;;  %v1952_v58 = vld [vmem:[%s7419_s3 + $0x250] sm:$0xff] }
 0x315   : > { %3347 = vmatpush.msra.mxu0 %v2336_v59  ;;  %3367 = vmatpush.msra.mxu2 %v2416_v60  ;;  %v2566_v59 = vld [vmem:[%s7419_s3 + $0x1580] sm:$0xff]  ;;  %v2456_v60 = vld [vmem:[%s7419_s3 + $0x1210] sm:$0xff] }
 0x316   : > { %3332 = vmatpush.msrb.mxu3 %v2231_v62  ;;  %3318 = vmatpush.msra.mxu1 %v2121_v63  ;;  %v2616_v62 = vld [vmem:[%s7419_s3 + $0x1710] sm:$0xff]  ;;  %v1947_v63 = vld [vmem:[%s7419_s3 + $0x228] sm:$0xff] }
 0x317   : > { %3348 = vmatpush.msra.mxu0 %v2331_v0  ;;  %3368 = vmatpush.msra.mxu2 %v2411_v2  ;;  %v2561_v0 = vld [vmem:[%s7419_s3 + $0x1558] sm:$0xff]  ;;  %v2451_v2 = vld [vmem:[%s7419_s3 + $0x11e8] sm:$0xff] }
 0x318   : > { %3333 = vmatpush.msrb.mxu3 %v2226_v3  ;;  %3383 = vmatpush.msrb.mxu1 %v2516_v4  ;;  %v2611_v3 = vld [vmem:[%s7419_s3 + $0x16e8] sm:$0xff]  ;;  %v1942_v4 = vld [vmem:[%s7419_s3 + $0x200] sm:$0xff] }
 0x319   : > { %3349 = vmatpush.msra.mxu0 %v2326_v5  ;;  %3369 = vmatpush.msra.mxu2 %v2406_v22  ;;  %v2556_v5 = vld [vmem:[%s7419_s3 + $0x1530] sm:$0xff]  ;;  %v2446_v22 = vld [vmem:[%s7419_s3 + $0x11c0] sm:$0xff] }
 0x31a   : > { %3334 = vmatpush.msrb.mxu3 %v2221_v8  ;;  %3384 = vmatpush.msrb.mxu1 %v2511_v9  ;;  %v2606_v8 = vld [vmem:[%s7419_s3 + $0x16c0] sm:$0xff]  ;;  %v1937_v9 = vld [vmem:[%s7419_s3 + $0x1d8] sm:$0xff] }
 0x31b   : > { %3350 = vmatpush.msra.mxu0 %v2321_v10  ;;  %3370 = vmatpush.msra.mxu2 %v2401_v14  ;;  %v2551_v10 = vld [vmem:[%s7419_s3 + $0x1508] sm:$0xff]  ;;  %v2441_v14 = vld [vmem:[%s7419_s3 + $0x1198] sm:$0xff] }
 0x31c   : > { %3335 = vmatpush.msrb.mxu3 %v2216_v30  ;;  %3385 = vmatpush.msrb.mxu1 %v2506_v15  ;;  %v2601_v30 = vld [vmem:[%s7419_s3 + $0x1698] sm:$0xff]  ;;  %v1932_v15 = vld [vmem:[%s7419_s3 + $0x1b0] sm:$0xff] }
 0x31d   : > { %3351 = vmatpush.msra.mxu0 %v2316_v33  ;;  %3371 = vmatpush.msra.mxu2 %v2396_v16  ;;  %v2546_v33 = vld [vmem:[%s7419_s3 + $0x14e0] sm:$0xff]  ;;  %v2037_v16 = vld [vmem:[%s7419_s3 + $0x4f8] sm:$0xff] }
 0x31e   : > { %3336 = vmatpush.msrb.mxu3 %v2211_v17  ;;  %3386 = vmatpush.msrb.mxu1 %v2501_v18  ;;  %v2117_v17 = vld [vmem:[%s7419_s3 + $0x778] sm:$0xff]  ;;  %v1927_v18 = vld [vmem:[%s7419_s3 + $0x188] sm:$0xff] }
 0x31f   : > { %3352 = vmatpush.msra.mxu0 %v2311_v19  ;;  %3372 = vmatpush.msra.mxu2 %v2391_v20  ;;  %v2541_v19 = vld [vmem:[%s7419_s3 + $0x14b8] sm:$0xff]  ;;  %v2032_v20 = vld [vmem:[%s7419_s3 + $0x4d0] sm:$0xff] }
 0x320   : > { %3337 = vmatpush.msrb.mxu3 %v2206_v61  ;;  %3387 = vmatpush.msrb.mxu1 %v2496_v21  ;;  %v2112_v61 = vld [vmem:[%s7419_s3 + $0x750] sm:$0xff]  ;;  %v1922_v21 = vld [vmem:[%s7419_s3 + $0x160] sm:$0xff] }
 0x321   : > { %3353 = vmatpush.msra.mxu0 %v2306_v23  ;;  %3373 = vmatpush.msra.mxu2 %v2386_v1  ;;  %v2536_v23 = vld [vmem:[%s7419_s3 + $0x1490] sm:$0xff]  ;;  %v2027_v1 = vld [vmem:[%s7419_s3 + $0x4a8] sm:$0xff] }
 0x322   : > { %3338 = vmatpush.msrb.mxu3 %v2201_v24  ;;  %3388 = vmatpush.msrb.mxu1 %v2491_v25  ;;  %v2107_v24 = vld [vmem:[%s7419_s3 + $0x728] sm:$0xff]  ;;  %v1917_v25 = vld [vmem:[%s7419_s3 + $0x138] sm:$0xff] }
 0x323   : > { %3259 = vmatmul.f32.vlgmr.msra.gmra.mxu3 %v5158_v11  ;;  %3354 = vmatpush.msra.mxu0 %v2301_v26  ;;  %v2531_v26 = vld [vmem:[%s7419_s3 + $0x1468] sm:$0xff] }
 0x324   : > { %3374 = vmatpush.msra.mxu2 %v2381_v6  ;;  %3403 = vmatpush.msra.mxu3 %v2596_v7  ;;  %v2022_v6 = vld [vmem:[%s7419_s3 + $0x480] sm:$0xff] }
 0x325   : > { %3389 = vmatpush.msrb.mxu1 %v2486_v28  ;;  %3355 = vmatpush.msra.mxu0 %v2296_v29  ;;  %v2102_v7 = vld [vmem:[%s7419_s3 + $0x700] sm:$0xff]  ;;  %v1912_v28 = vld [vmem:[%s7419_s3 + $0x110] sm:$0xff] }
 0x326   : > { %3375 = vmatpush.msra.mxu2 %v2376_v31  ;;  %3404 = vmatpush.msra.mxu3 %v2591_v32  ;;  %v2526_v29 = vld [vmem:[%s7419_s3 + $0x1440] sm:$0xff]  ;;  %v2017_v31 = vld [vmem:[%s7419_s3 + $0x458] sm:$0xff] }
 0x327   : > { %3390 = vmatpush.msrb.mxu1 %v2481_v34  ;;  %3356 = vmatpush.msra.mxu0 %v2291_v35  ;;  %v2097_v32 = vld [vmem:[%s7419_s3 + $0x6d8] sm:$0xff]  ;;  %v1907_v34 = vld [vmem:[%s7419_s3 + $0xe8] sm:$0xff] }
 0x328   : > { %3376 = vmatpush.msra.mxu2 %v2371_v36  ;;  %3405 = vmatpush.msra.mxu3 %v2586_v37  ;;  %v2521_v35 = vld [vmem:[%s7419_s3 + $0x1418] sm:$0xff]  ;;  %v2012_v36 = vld [vmem:[%s7419_s3 + $0x430] sm:$0xff] }
 0x329   : > { %3391 = vmatpush.msrb.mxu1 %v2476_v38  ;;  %3357 = vmatpush.msra.mxu0 %v2286_v41  ;;  %v2092_v37 = vld [vmem:[%s7419_s3 + $0x6b0] sm:$0xff]  ;;  %v1902_v38 = vld [vmem:[%s7419_s3 + $0xc0] sm:$0xff]  ;;  %v2197_v41 = vld [vmem:[%s7419_s3 + $0x9f8] sm:$0xff] }
 0x32a   : > { %3377 = vmatpush.msra.mxu2 %v2366_v42  ;;  %3406 = vmatpush.msra.mxu3 %v2581_v43  ;;  %v2007_v42 = vld [vmem:[%s7419_s3 + $0x408] sm:$0xff] }
 0x32b   : > { %3392 = vmatpush.msrb.mxu1 %v2471_v47  ;;  %3358 = vmatpush.msra.mxu0 %v2281_v48  ;;  %v2087_v43 = vld [vmem:[%s7419_s3 + $0x688] sm:$0xff]  ;;  %v1897_v47 = vld [vmem:[%s7419_s3 + $0x98] sm:$0xff]  ;;  %v2192_v48 = vld [vmem:[%s7419_s3 + $0x9d0] sm:$0xff] }
 0x32c   : > { %3378 = vmatpush.msra.mxu2 %v2361_v49  ;;  %3407 = vmatpush.msra.mxu3 %v2576_v51  ;;  %v2002_v49 = vld [vmem:[%s7419_s3 + $0x3e0] sm:$0xff] }
 0x32d   : > { %3279 = vmatmul.f32.vlgmr.msrb.gmra.mxu0 %v5160_v27  ;;  %3299 = vmatmul.f32.vlgmr.msrb.gmra.mxu2 %v5162_v12  ;;  %v2082_v51 = vld [vmem:[%s7419_s3 + $0x660] sm:$0xff] }
 0x32e   : > { %3393 = vmatpush.msrb.mxu1 %v2466_v52  ;;  %3433 = vmatpush.msrb.mxu0 %v2626_v53  ;;  %v1892_v52 = vld [vmem:[%s7419_s3 + $0x70] sm:$0xff]  ;;  %v2187_v53 = vld [vmem:[%s7419_s3 + $0x9a8] sm:$0xff] }
 0x32f   : > { %3443 = vmatpush.msrb.mxu2 %v1957_v54  ;;  %3408 = vmatpush.msra.mxu3 %v2571_v55  ;;  %v1997_v54 = vld [vmem:[%s7419_s3 + $0x3b8] sm:$0xff] }
 0x330   : > { %3394 = vmatpush.msrb.mxu1 %v2461_v56  ;;  %3434 = vmatpush.msrb.mxu0 %v2621_v57  ;;  %v2077_v55 = vld [vmem:[%s7419_s3 + $0x638] sm:$0xff]  ;;  %v1887_v56 = vld [vmem:[%s7419_s3 + $0x48] sm:$0xff]  ;;  %v2182_v57 = vld [vmem:[%s7419_s3 + $0x980] sm:$0xff] }
 0x331   : > { %3444 = vmatpush.msrb.mxu2 %v1952_v58  ;;  %3409 = vmatpush.msra.mxu3 %v2566_v59  ;;  %v1992_v58 = vld [vmem:[%s7419_s3 + $0x390] sm:$0xff] }
 0x332   : > { %3339 = vmatmul.f32.vlgmr.msrb.gmra.mxu3 %v5233_v44  ;;  %3395 = vmatpush.msrb.mxu1 %v2456_v60  ;;  %v2072_v59 = vld [vmem:[%s7419_s3 + $0x610] sm:$0xff]  ;;  %v1882_v60 = vld [vmem:[%s7419_s3 + $0x20] sm:$0xff] }
 0x333   : > { %3435 = vmatpush.msrb.mxu0 %v2616_v62  ;;  %3445 = vmatpush.msrb.mxu2 %v1947_v63  ;;  %v2177_v62 = vld [vmem:[%s7419_s3 + $0x958] sm:$0xff]  ;;  %v1987_v63 = vld [vmem:[%s7419_s3 + $0x368] sm:$0xff] }
 0x334   : > { %3410 = vmatpush.msra.mxu3 %v2561_v0  ;;  %3396 = vmatpush.msrb.mxu1 %v2451_v2  ;;  %v2067_v0 = vld [vmem:[%s7419_s3 + $0x5e8] sm:$0xff]  ;;  %v2277_v2 = vld [vmem:[%s7419_s3 + $0xc78] sm:$0xff] }
 0x335   : > { %3436 = vmatpush.msrb.mxu0 %v2611_v3  ;;  %3446 = vmatpush.msrb.mxu2 %v1942_v4  ;;  %v2172_v3 = vld [vmem:[%s7419_s3 + $0x930] sm:$0xff]  ;;  %v1982_v4 = vld [vmem:[%s7419_s3 + $0x340] sm:$0xff] }
 0x336   : > { %3411 = vmatpush.msra.mxu3 %v2556_v5  ;;  %3319 = vmatmul.f32.vlgmr.msra.gmra.mxu1 %v5164_v13  ;;  %v2062_v5 = vld [vmem:[%s7419_s3 + $0x5c0] sm:$0xff] }
 0x337   : > { %3379 = vmatmul.f32.vlgmr.msra.gmra.mxu2 %v5222_v39  ;;  %3397 = vmatpush.msrb.mxu1 %v2446_v22  ;;  %v2272_v22 = vld [vmem:[%s7419_s3 + $0xc50] sm:$0xff] }
 0x338   : > { %3437 = vmatpush.msrb.mxu0 %v2606_v8  ;;  %3447 = vmatpush.msrb.mxu2 %v1937_v9  ;;  %v2167_v8 = vld [vmem:[%s7419_s3 + $0x908] sm:$0xff]  ;;  %v1977_v9 = vld [vmem:[%s7419_s3 + $0x318] sm:$0xff] }
 0x339   : > { %3412 = vmatpush.msra.mxu3 %v2551_v10  ;;  %3398 = vmatpush.msrb.mxu1 %v2441_v14  ;;  %v2057_v10 = vld [vmem:[%s7419_s3 + $0x598] sm:$0xff]  ;;  %v2267_v14 = vld [vmem:[%s7419_s3 + $0xc28] sm:$0xff] }
 0x33a   : > { %3438 = vmatpush.msrb.mxu0 %v2601_v30  ;;  %3448 = vmatpush.msrb.mxu2 %v1932_v15  ;;  %v2162_v30 = vld [vmem:[%s7419_s3 + $0x8e0] sm:$0xff]  ;;  %v1972_v15 = vld [vmem:[%s7419_s3 + $0x2f0] sm:$0xff] }
 0x33b   : > { %3359 = vmatmul.f32.vlgmr.msra.gmra.mxu0 %v5250_v50  ;;  %3413 = vmatpush.msra.mxu3 %v2546_v33  ;;  %v2052_v33 = vld [vmem:[%s7419_s3 + $0x570] sm:$0xff] }
 0x33c   : > { %3463 = vmatpush.msra.mxu0 %v2037_v16  ;;  %3483 = vmatpush.msra.mxu1 %v2117_v17  ;;  %v2262_v16 = vld [vmem:[%s7419_s3 + $0xc00] sm:$0xff]  ;;  %v6813_v17 = vpop.f32.mrf.mxu1 }
 0x33d   : > { %3449 = vmatpush.msrb.mxu2 %v1927_v18  ;;  %3414 = vmatpush.msra.mxu3 %v2541_v19  ;;  %v2157_v18 = vld [vmem:[%s7419_s3 + $0x8b8] sm:$0xff]  ;;  %v1967_v19 = vld [vmem:[%s7419_s3 + $0x2c8] sm:$0xff] }
 0x33e   : > { %3464 = vmatpush.msra.mxu0 %v2032_v20  ;;  %3484 = vmatpush.msra.mxu1 %v2112_v61  ;;  %v2047_v20 = vld [vmem:[%s7419_s3 + $0x548] sm:$0xff]  ;;  %v2257_v61 = vld [vmem:[%s7419_s3 + $0xbd8] sm:$0xff] }
 0x33f   : > { %3450 = vmatpush.msrb.mxu2 %v1922_v21  ;;  %3415 = vmatpush.msra.mxu3 %v2536_v23  ;;  %v2152_v21 = vld [vmem:[%s7419_s3 + $0x890] sm:$0xff]  ;;  %v1962_v23 = vld [vmem:[%s7419_s3 + $0x2a0] sm:$0xff] }
 0x340   : > { %3465 = vmatpush.msra.mxu0 %v2027_v1  ;;  %3485 = vmatpush.msra.mxu1 %v2107_v24  ;;  %v2042_v1 = vld [vmem:[%s7419_s3 + $0x520] sm:$0xff]  ;;  %v2252_v24 = vld [vmem:[%s7419_s3 + $0xbb0] sm:$0xff] }
 0x341   : > { %3399 = vmatmul.f32.vlgmr.msrb.gmra.mxu1 %v5238_v46  ;;  %3451 = vmatpush.msrb.mxu2 %v1917_v25  ;;  %v6839_v25 = vpop.f32.mrf.mxu3 }
 0x342   : > { %3416 = vmatpush.msra.mxu3 %v2531_v26  ;;  %3466 = vmatpush.msra.mxu0 %v2022_v6  ;;  %v2147_v26 = vld [vmem:[%s7419_s3 + $0x868] sm:$0xff]  ;;  %v2357_v6 = vld [vmem:[%s7419_s3 + $0xef8] sm:$0xff] }
 0x343   : > { %3486 = vmatpush.msra.mxu1 %v2102_v7  ;;  %3452 = vmatpush.msrb.mxu2 %v1912_v28  ;;  %v2437_v7 = vld [vmem:[%s7419_s3 + $0x1178] sm:$0xff]  ;;  %v2247_v28 = vld [vmem:[%s7419_s3 + $0xb88] sm:$0xff] }
 0x344   : > { %3417 = vmatpush.msra.mxu3 %v2526_v29  ;;  %3467 = vmatpush.msra.mxu0 %v2017_v31  ;;  %v2142_v29 = vld [vmem:[%s7419_s3 + $0x840] sm:$0xff]  ;;  %v2352_v31 = vld [vmem:[%s7419_s3 + $0xed0] sm:$0xff] }
 0x345   : > { %3487 = vmatpush.msra.mxu1 %v2097_v32  ;;  %3453 = vmatpush.msrb.mxu2 %v1907_v34  ;;  %v2432_v32 = vld [vmem:[%s7419_s3 + $0x1150] sm:$0xff]  ;;  %v2242_v34 = vld [vmem:[%s7419_s3 + $0xb60] sm:$0xff] }
 0x346   : > { %3418 = vmatpush.msra.mxu3 %v2521_v35  ;;  %3468 = vmatpush.msra.mxu0 %v2012_v36  ;;  %v2137_v35 = vld [vmem:[%s7419_s3 + $0x818] sm:$0xff]  ;;  %v2347_v36 = vld [vmem:[%s7419_s3 + $0xea8] sm:$0xff] }
 0x347   : > { %3488 = vmatpush.msra.mxu1 %v2092_v37  ;;  %3419 = vmatmul.f32.vlgmr.msra.gmra.mxu3 %v5381_v40  ;;  %v2427_v37 = vld [vmem:[%s7419_s3 + $0x1128] sm:$0xff] }
 0x348   : > { %3454 = vmatpush.msrb.mxu2 %v1902_v38  ;;  %3503 = vmatpush.msrb.mxu3 %v2197_v41  ;;  %v2237_v38 = vld [vmem:[%s7419_s3 + $0xb38] sm:$0xff]  ;;  %v6877_v41 = vpop.f32.mrf.mxu0 }
 0x349   : > { %3469 = vmatpush.msra.mxu0 %v2007_v42  ;;  %3489 = vmatpush.msra.mxu1 %v2087_v43  ;;  %v6879_v42 = vpop.f32.mrf.mxu1  ;;  %v2132_v43 = vld [vmem:[%s7419_s3 + $0x7f0] sm:$0xff] }
 0x34a   : > { %3455 = vmatpush.msrb.mxu2 %v1897_v47  ;;  %3504 = vmatpush.msrb.mxu3 %v2192_v48  ;;  %v2342_v47 = vld [vmem:[%s7419_s3 + $0xe80] sm:$0xff] }
 0x34b   : > { %3470 = vmatpush.msra.mxu0 %v2002_v49  ;;  %3490 = vmatpush.msra.mxu1 %v2082_v51  ;;  %v2422_v48 = vld [vmem:[%s7419_s3 + $0x1100] sm:$0xff]  ;;  %v2232_v49 = vld [vmem:[%s7419_s3 + $0xb10] sm:$0xff]  ;;  %v6893_v51 = vpop.f32.mrf.mxu2 }
 0x34c   : > { %3456 = vmatpush.msrb.mxu2 %v1892_v52  ;;  %3505 = vmatpush.msrb.mxu3 %v2187_v53  ;;  %v2127_v52 = vld [vmem:[%s7419_s3 + $0x7c8] sm:$0xff]  ;;  %v2337_v53 = vld [vmem:[%s7419_s3 + $0xe58] sm:$0xff] }
 0x34d   : > { %3471 = vmatpush.msra.mxu0 %v1997_v54  ;;  %3491 = vmatpush.msra.mxu1 %v2077_v55  ;;  %v2417_v54 = vld [vmem:[%s7419_s3 + $0x10d8] sm:$0xff]  ;;  %v2227_v55 = vld [vmem:[%s7419_s3 + $0xae8] sm:$0xff] }
 0x34e   : > { %3457 = vmatpush.msrb.mxu2 %v1887_v56  ;;  %3506 = vmatpush.msrb.mxu3 %v2182_v57  ;;  %v6907_v56 = vpop.f32.mrf.mxu3  ;;  %v2122_v57 = vld [vmem:[%s7419_s3 + $0x7a0] sm:$0xff] }
 0x34f   : > { %3472 = vmatpush.msra.mxu0 %v1992_v58  ;;  %3492 = vmatpush.msra.mxu1 %v2072_v59  ;;  %v2332_v58 = vld [vmem:[%s7419_s3 + $0xe30] sm:$0xff] }
 0x350   : > { %3924 = vmatmul.msk.f32.vlgmr.msrb.gmra.mxu0 %vm1818_vm1, %v5392_v45  ;;  %3458 = vmatpush.msrb.mxu2 %v1882_v60  ;;  %v2412_v59 = vld [vmem:[%s7419_s3 + $0x10b0] sm:$0xff]  ;;  %v2222_v60 = vld [vmem:[%s7419_s3 + $0xac0] sm:$0xff] }
 0x351   : > { %3507 = vmatpush.msrb.mxu3 %v2177_v62  ;;  %3473 = vmatpush.msra.mxu0 %v1987_v63  ;;  %v2517_v62 = vld [vmem:[%s7419_s3 + $0x13f8] sm:$0xff]  ;;  %v2327_v63 = vld [vmem:[%s7419_s3 + $0xe08] sm:$0xff] }
 0x352   : > { %3493 = vmatpush.msra.mxu1 %v2067_v0  ;;  %3523 = vmatpush.msra.mxu2 %v2277_v2  ;;  %v2407_v0 = vld [vmem:[%s7419_s3 + $0x1088] sm:$0xff]  ;;  %v2217_v2 = vld [vmem:[%s7419_s3 + $0xa98] sm:$0xff] }
 0x353   : > { %3508 = vmatpush.msrb.mxu3 %v2172_v3  ;;  %3474 = vmatpush.msra.mxu0 %v1982_v4  ;;  %v6933_v3 = vpop.f32.mrf.mxu1  ;;  %v2512_v4 = vld [vmem:[%s7419_s3 + $0x13d0] sm:$0xff] }
 0x354   : > { %3494 = vmatpush.msra.mxu1 %v2062_v5  ;;  %3524 = vmatpush.msra.mxu2 %v2272_v22  ;;  %v2322_v5 = vld [vmem:[%s7419_s3 + $0xde0] sm:$0xff] }
 0x355   : > { %3509 = vmatpush.msrb.mxu3 %v2167_v8  ;;  %3475 = vmatpush.msra.mxu0 %v1977_v9  ;;  %v2402_v22 = vld [vmem:[%s7419_s3 + $0x1060] sm:$0xff]  ;;  %v2212_v8 = vld [vmem:[%s7419_s3 + $0xa70] sm:$0xff]  ;;  %v6947_v9 = vpop.f32.mrf.mxu0 }
 0x356   : > { %3495 = vmatpush.msra.mxu1 %v2057_v10  ;;  %3525 = vmatpush.msra.mxu2 %v2267_v14  ;;  %v2507_v10 = vld [vmem:[%s7419_s3 + $0x13a8] sm:$0xff]  ;;  %v2317_v14 = vld [vmem:[%s7419_s3 + $0xdb8] sm:$0xff] }
 0x357   : > { %3510 = vmatpush.msrb.mxu3 %v2162_v30  ;;  %3476 = vmatpush.msra.mxu0 %v1972_v15  ;;  %v2397_v30 = vld [vmem:[%s7419_s3 + $0x1038] sm:$0xff]  ;;  %v2207_v15 = vld [vmem:[%s7419_s3 + $0xa48] sm:$0xff] }
 0x358   : > { %3496 = vmatpush.msra.mxu1 %v2052_v33  ;;  %3526 = vmatpush.msra.mxu2 %v2262_v16  ;;  %v6961_v33 = vpop.f32.mrf.mxu2  ;;  %v6963_v16 = vpop.f32.mrf.mxu3 }
 0x359   : > { %3511 = vmatpush.msrb.mxu3 %v2157_v18  ;;  %3477 = vmatpush.msra.mxu0 %v1967_v19  ;;  %v2502_v18 = vld [vmem:[%s7419_s3 + $0x1380] sm:$0xff]  ;;  %v2312_v19 = vld [vmem:[%s7419_s3 + $0xd90] sm:$0xff] }
 0x35a   : > { %3497 = vmatpush.msra.mxu1 %v2047_v20  ;;  %3527 = vmatpush.msra.mxu2 %v2257_v61  ;;  %v2392_v20 = vld [vmem:[%s7419_s3 + $0x1010] sm:$0xff]  ;;  %v2202_v61 = vld [vmem:[%s7419_s3 + $0xa20] sm:$0xff] }
 0x35b   : > { %3512 = vmatpush.msrb.mxu3 %v2152_v21  ;;  %3478 = vmatpush.msra.mxu0 %v1962_v23  ;;  %v2497_v21 = vld [vmem:[%s7419_s3 + $0x1358] sm:$0xff]  ;;  %v2307_v23 = vld [vmem:[%s7419_s3 + $0xd68] sm:$0xff] }
 0x35c   : > { %3498 = vmatpush.msra.mxu1 %v2042_v1  ;;  %3528 = vmatpush.msra.mxu2 %v2252_v24  ;;  %v2387_v1 = vld [vmem:[%s7419_s3 + $0xfe8] sm:$0xff]  ;;  %v6986_v24 = vpop.f32.mrf.mxu1 }
 0x35d   : > { %3513 = vmatpush.msrb.mxu3 %v2147_v26  ;;  %3543 = vmatpush.msrb.mxu0 %v2357_v6  ;;  %v2597_v26 = vld [vmem:[%s7419_s3 + $0x1678] sm:$0xff]  ;;  %v2492_v6 = vld [vmem:[%s7419_s3 + $0x1330] sm:$0xff] }
 0x35e   : > { %3563 = vmatpush.msrb.mxu1 %v2437_v7  ;;  %3529 = vmatpush.msra.mxu2 %v2247_v28  ;;  %v2302_v7 = vld [vmem:[%s7419_s3 + $0xd40] sm:$0xff] }
 0x35f   : > { %3514 = vmatpush.msrb.mxu3 %v2142_v29  ;;  %3544 = vmatpush.msrb.mxu0 %v2352_v31  ;;  %v2382_v28 = vld [vmem:[%s7419_s3 + $0xfc0] sm:$0xff]  ;;  %v7006_v31 = vpop.f32.mrf.mxu0 }
 0x360   : > { %3564 = vmatpush.msrb.mxu1 %v2432_v32  ;;  %3530 = vmatpush.msra.mxu2 %v2242_v34  ;;  %v7004_v29 = vld [vmem:[%s7420_s4] sm:$0x1f]  ;;  %v2487_v32 = vld [vmem:[%s7419_s3 + $0x1308] sm:$0xff]  ;;  %v2297_v34 = vld [vmem:[%s7419_s3 + $0xd18] sm:$0xff] }
 0x361   : > { %3515 = vmatpush.msrb.mxu3 %v2137_v35  ;;  %3545 = vmatpush.msrb.mxu0 %v2347_v36  ;;  %v2377_v35 = vld [vmem:[%s7419_s3 + $0xf98] sm:$0xff]  ;;  %v7020_v36 = vpop.f32.mrf.mxu2 }
 0x362   : > { %3565 = vmatpush.msrb.mxu1 %v2427_v37  ;;  %3531 = vmatpush.msra.mxu2 %v2237_v38  ;;  %v2587_v37 = vld [vmem:[%s7419_s3 + $0x1628] sm:$0xff]  ;;  %v2482_v38 = vld [vmem:[%s7419_s3 + $0x12e0] sm:$0xff] }
 0x363   : > { %3516 = vmatpush.msrb.mxu3 %v2132_v43  ;;  %3546 = vmatpush.msrb.mxu0 %v2342_v47  ;;  %v2630_v43 = vperm.slane %v7004_v29, 0  ;;  %v2292_v47 = vld [vmem:[%s7419_s3 + $0xcf0] sm:$0xff] }
 0x364   : > { %3566 = vmatpush.msrb.mxu1 %v2422_v48  ;;  %3532 = vmatpush.msra.mxu2 %v2232_v49  ;;  %v7032_v48 = vpop.f32.mrf.mxu3  ;;  %v2372_v49 = vld [vmem:[%s7419_s3 + $0xf70] sm:$0xff] }
 0x365   : > { %3517 = vmatpush.msrb.mxu3 %v2127_v52  ;;  %3547 = vmatpush.msrb.mxu0 %v2337_v53  ;;  %v2582_v52 = vld [vmem:[%s7419_s3 + $0x1600] sm:$0xff]  ;;  %v2477_v53 = vld [vmem:[%s7419_s3 + $0x12b8] sm:$0xff] }
 0x366   : > { %3567 = vmatpush.msrb.mxu1 %v2417_v54  ;;  %3533 = vmatpush.msra.mxu2 %v2227_v55  ;;  %v2287_v54 = vld [vmem:[%s7419_s3 + $0xcc8] sm:$0xff]  ;;  %v2661_v55 = vadd.f32 %v6877_v41, %v2630_v43  ;;  %v2472_v41 = vld [vmem:[%s7419_s3 + $0x1290] sm:$0xff] }
 0x367   : > { %3518 = vmatpush.msrb.mxu3 %v2122_v57  ;;  %3548 = vmatpush.msrb.mxu0 %v2332_v58  ;;  %v2367_v57 = vld [vmem:[%s7419_s3 + $0xf48] sm:$0xff]  ;;  %v2577_v58 = vld [vmem:[%s7419_s3 + $0x15d8] sm:$0xff]  ;;  %v3658_v43 = vld [vmem:[%s7421_s5 + $0x50] sm:$0xff] }
 0x368   : > { %3568 = vmatpush.msrb.mxu1 %v2412_v59  ;;  %3534 = vmatpush.msra.mxu2 %v2222_v60  ;;  %v7054_v59 = vpop.f32.mrf.mxu0  ;;  %v2282_v60 = vld [vmem:[%s7419_s3 + $0xca0] sm:$0xff] }
 0x369   : > { %3583 = vmatpush.msra.mxu3 %v2517_v62  ;;  %3549 = vmatpush.msrb.mxu0 %v2327_v63  ;;  %v2362_v62 = vld [vmem:[%s7419_s3 + $0xf20] sm:$0xff]  ;;  %v2467_v63 = vld [vmem:[%s7419_s3 + $0x1268] sm:$0xff] }
 0x36a   : > { %3569 = vmatpush.msrb.mxu1 %v2407_v0  ;;  %3535 = vmatpush.msra.mxu2 %v2217_v2  ;;  %v2627_v0 = vld [vmem:[%s7419_s3 + $0x1768] sm:$0xff]  ;;  %v3663_v2 = vld [vmem:[%s7421_s5 + $0x78] sm:$0xff] }
 0x36b   : > { %3584 = vmatpush.msra.mxu3 %v2512_v4  ;;  %3550 = vmatpush.msrb.mxu0 %v2322_v5  ;;  %v7083_v4 = vpop.f32.mrf.mxu2 }
 0x36c   : > { %3570 = vmatpush.msrb.mxu1 %v2402_v22  ;;  %3536 = vmatpush.msra.mxu2 %v2212_v8  ;;  %v7085_v5 = vpop.f32.mrf.mxu3  ;;  %v2622_v22 = vld [vmem:[%s7419_s3 + $0x1740] sm:$0xff]  ;;  %v3662_v8 = vld [vmem:[%s7421_s5 + $0x70] sm:$0xff] }
 0x36d   : > { %3585 = vmatpush.msra.mxu3 %v2507_v10  ;;  %3551 = vmatpush.msrb.mxu0 %v2317_v14  ;;  %v2562_v10 = vld [vmem:[%s7419_s3 + $0x1560] sm:$0xff]  ;;  %v2457_v14 = vld [vmem:[%s7419_s3 + $0x1218] sm:$0xff] }
 0x36e   : > { %3571 = vmatpush.msrb.mxu1 %v2397_v30  ;;  %3537 = vmatpush.msra.mxu2 %v2207_v15  ;;  %v2632_v15 = vperm.slane %v7004_v29, 2 }
 0x36f   : > { %3586 = vmatpush.msra.mxu3 %v2502_v18  ;;  %3552 = vmatpush.msrb.mxu0 %v2312_v19  ;;  %v2617_v18 = vld [vmem:[%s7419_s3 + $0x1718] sm:$0xff]  ;;  %v3661_v19 = vld [vmem:[%s7421_s5 + $0x68] sm:$0xff] }
 0x370   : > { %3572 = vmatpush.msrb.mxu1 %v2392_v20  ;;  %3538 = vmatpush.msra.mxu2 %v2202_v61  ;;  %v2631_v20 = vperm.slane %v7004_v29, 1  ;;  %v7114_v61 = vpop.f32.mrf.mxu0 }
 0x371   : > { %3587 = vmatpush.msra.mxu3 %v2497_v21  ;;  %3459 = vmatmul.f32.vlgmr.msrb.gmra.mxu2 %v5158_v11  ;;  %v2592_v11 = vld [vmem:[%s7419_s3 + $0x1650] sm:$0xff] }
 0x372   : > { %3553 = vmatpush.msrb.mxu0 %v2307_v23  ;;  %3573 = vmatpush.msrb.mxu1 %v2387_v1  ;;  %v2452_v23 = vld [vmem:[%s7419_s3 + $0x11f0] sm:$0xff] }
 0x373   : > { %3603 = vmatpush.msrb.mxu2 %v2597_v26  ;;  %3588 = vmatpush.msra.mxu3 %v2492_v6  ;;  %v2612_v1 = vld [vmem:[%s7419_s3 + $0x16f0] sm:$0xff]  ;;  %v3660_v26 = vld [vmem:[%s7421_s5 + $0x60] sm:$0xff] }
 0x374   : > { %3554 = vmatpush.msrb.mxu0 %v2302_v7  ;;  %3574 = vmatpush.msrb.mxu1 %v2382_v28  ;;  %v2552_v6 = vld [vmem:[%s7419_s3 + $0x1510] sm:$0xff] }
 0x375   : > { %3604 = vmatpush.msrb.mxu2 %v2592_v11  ;;  %3589 = vmatpush.msra.mxu3 %v2487_v32  ;;  %v2447_v11 = vld [vmem:[%s7419_s3 + $0x11c8] sm:$0xff]  ;;  %v2861_v32 = vadd.f32 %v7020_v36, %v2631_v20  ;;  %v2442_v36 = vld [vmem:[%s7419_s3 + $0x11a0] sm:$0xff] }
 0x376   : > { %3555 = vmatpush.msrb.mxu0 %v2297_v34  ;;  %3575 = vmatpush.msrb.mxu1 %v2377_v35  ;;  %v7137_v34 = vpop.f32.mrf.mxu2  ;;  %v3080_v35 = vpop.f32.mrf.mxu3 }
 0x377   : > { %3605 = vmatpush.msrb.mxu2 %v2587_v37  ;;  %3590 = vmatpush.msra.mxu3 %v2482_v38  ;;  %v2607_v37 = vld [vmem:[%s7419_s3 + $0x16c8] sm:$0xff]  ;;  %v2602_v38 = vld [vmem:[%s7419_s3 + $0x16a0] sm:$0xff] }
 0x378   : > { %3519 = vmatmul.f32.vlgmr.msrb.gmra.mxu3 %v5164_v13  ;;  %3556 = vmatpush.msrb.mxu0 %v2292_v47  ;;  %v7056_v13 = vpop.f32.mrf.mxu1 }
 0x379   : > { %3576 = vmatpush.msrb.mxu1 %v2372_v49  ;;  %3606 = vmatpush.msrb.mxu2 %v2582_v52  ;;  %v2542_v52 = vld [vmem:[%s7419_s3 + $0x14c0] sm:$0xff] }
 0x37a   : > { %3591 = vmatpush.msra.mxu3 %v2477_v53  ;;  %3479 = vmatmul.f32.vlgmr.msra.gmra.mxu0 %v5160_v27  ;;  %v2572_v27 = vld [vmem:[%s7419_s3 + $0x15b0] sm:$0xff]  ;;  %v3100_v53 = vpop.f32.mrf.mxu0 }
 0x37b   : > { %3539 = vmatmul.f32.vlgmr.msra.gmra.mxu2 %v5233_v44  ;;  %3557 = vmatpush.msrb.mxu0 %v2287_v54  ;;  %v2681_v44 = vadd.f32 %v6813_v17, %v2661_v55  ;;  %v2567_v17 = vld [vmem:[%s7419_s3 + $0x1588] sm:$0xff]  ;;  %v3679_v54 = vld [vmem:[%s7421_s5 + $0xf8] sm:$0xff] }
 0x37c   : > { %3577 = vmatpush.msrb.mxu1 %v2367_v57  ;;  %3607 = vmatpush.msrb.mxu2 %v2577_v58  ;;  %v3657_v55 = vld [vmem:[%s7421_s5 + $0x48] sm:$0xff]  ;;  %v3678_v57 = vld [vmem:[%s7421_s5 + $0xf0] sm:$0xff] }
 0x37d   : > { %3592 = vmatpush.msra.mxu3 %v2472_v41  ;;  %3499 = vmatmul.f32.vlgmr.msra.gmra.mxu1 %v5162_v12  ;;  %v2462_v12 = vld [vmem:[%s7419_s3 + $0x1240] sm:$0xff]  ;;  %v2701_v30 = vadd.f32 %v6893_v51, %v2681_v44  ;;  %v2557_v51 = vld [vmem:[%s7419_s3 + $0x1538] sm:$0xff]  ;;  %v3694_v58 = vld [vmem:[%s7421_s5 + $0x170] sm:$0xff] }
 0x37e   : > { %3558 = vmatpush.msrb.mxu0 %v2282_v60  ;;  %3578 = vmatpush.msrb.mxu1 %v2362_v62  ;;  %v3656_v62 = vld [vmem:[%s7421_s5 + $0x40] sm:$0xff]  ;;  %v3693_v44 = vld [vmem:[%s7421_s5 + $0x168] sm:$0xff] }
 0x37f   : > { %3608 = vmatpush.msrb.mxu2 %v2572_v27  ;;  %3593 = vmatpush.msra.mxu3 %v2467_v63  ;;  %v2721_v7 = vadd.f32 %v6839_v25, %v2701_v30  ;;  %v2547_v25 = vld [vmem:[%s7419_s3 + $0x14e8] sm:$0xff]  ;;  %v3120_v63 = vpop.f32.mrf.mxu2 }
 0x380   : > { %3633 = vmatpush.msra.mxu0 %v2627_v0  ;;  %3731 = vmatpush.msra.mxu1 %v3663_v2  ;;  %v3060_v21 = vpop.f32.mrf.mxu1  ;;  %v3655_v0 = vld [vmem:[%s7421_s5 + $0x38] sm:$0xff]  ;;  %v3676_v2 = vld [vmem:[%s7421_s5 + $0xe0] sm:$0xff] }
 0x381   : > { %3609 = vmatpush.msrb.mxu2 %v2567_v17  ;;  %3594 = vmatpush.msra.mxu3 %v2462_v12  ;;  %v3061_v28 = vadd.f32 %v3060_v21, %v2632_v15  ;;  %v2741_v47 = vadd.f32 %v6947_v9, %v2721_v7  ;;  %v3695_v9 = vld [vmem:[%s7421_s5 + $0x178] sm:$0xff]  ;;  %v3692_v17 = vld [vmem:[%s7421_s5 + $0x160] sm:$0xff] }
 0x382   : > { %3634 = vmatpush.msra.mxu0 %v2622_v22  ;;  %3732 = vmatpush.msra.mxu1 %v3662_v8  ;;  %v3654_v8 = vld [vmem:[%s7421_s5 + $0x30] sm:$0xff]  ;;  %v3691_v15 = vld [vmem:[%s7421_s5 + $0x158] sm:$0xff]  ;;  %v3672_v7 = vld [vmem:[%s7421_s5 + $0xc0] sm:$0xff] }
 0x383   : > { %3610 = vmatpush.msrb.mxu2 %v2562_v10  ;;  %3595 = vmatpush.msra.mxu3 %v2457_v14  ;;  %v3081_v49 = vadd.f32 %v3080_v35, %v3061_v28  ;;  %v2761_v41 = vadd.f32 %v6879_v42, %v2741_v47  ;;  %v3677_v42 = vld [vmem:[%s7421_s5 + $0xe8] sm:$0xff]  ;;  %v2522_v10 = vld [vmem:[%s7419_s3 + $0x1420] sm:$0xff] }
 0x384   : > { %3635 = vmatpush.msra.mxu0 %v2617_v18  ;;  %3733 = vmatpush.msra.mxu1 %v3661_v19  ;;  %v3653_v18 = vld [vmem:[%s7421_s5 + $0x28] sm:$0xff]  ;;  %v3690_v19 = vld [vmem:[%s7421_s5 + $0x150] sm:$0xff]  ;;  %v3688_v28 = vld [vmem:[%s7421_s5 + $0x140] sm:$0xff] }
 0x385   : > { %3559 = vmatmul.f32.vlgmr.msrb.gmra.mxu0 %v5250_v50  ;;  %3611 = vmatpush.msrb.mxu2 %v2557_v51  ;;  %v3659_v50 = vld [vmem:[%s7421_s5 + $0x58] sm:$0xff]  ;;  %v3101_v60 = vadd.f32 %v3100_v53, %v3081_v49  ;;  %v2781_v12 = vadd.f32 %v6961_v33, %v2761_v41  ;;  %v3652_v51 = vld [vmem:[%s7421_s5 + $0x20] sm:$0xff]  ;;  %v3669_v53 = vld [vmem:[%s7421_s5 + $0xa8] sm:$0xff] }
 0x386   : > { %3596 = vmatpush.msra.mxu3 %v2452_v23  ;;  %3636 = vmatpush.msra.mxu0 %v2612_v1  ;;  %v3675_v33 = vld [vmem:[%s7421_s5 + $0xd8] sm:$0xff]  ;;  %v3160_v1 = vpop.f32.mrf.mxu3  ;;  %v3648_v47 = vld [vmem:[%s7421_s5] sm:$0xff] }
 0x387   : > { %3734 = vmatpush.msra.mxu1 %v3660_v26  ;;  %3612 = vmatpush.msrb.mxu2 %v2552_v6  ;;  %v3121_v22 = vadd.f32 %v3120_v63, %v3101_v60  ;;  %v2801_v20 = vadd.f32 %v6907_v56, %v2781_v12  ;;  %v3673_v26 = vld [vmem:[%s7421_s5 + $0xc8] sm:$0xff]  ;;  %v3708_v49 = vld [vmem:[%s7421_s5 + $0x1e0] sm:$0xff]  ;;  %v3706_v60 = vld [vmem:[%s7421_s5 + $0x1d0] sm:$0xff] }
 0x388   : > { %3579 = vmatmul.f32.vlgmr.msrb.gmra.mxu1 %v5222_v39  ;;  %3597 = vmatpush.msra.mxu3 %v2447_v11  ;;  %v2881_v39 = vadd.f32 %v6963_v16, %v2861_v32  ;;  %v2537_v16 = vld [vmem:[%s7419_s3 + $0x1498] sm:$0xff]  ;;  %v3140_v30 = vpop.f32.mrf.mxu1  ;;  %v3689_v56 = vld [vmem:[%s7421_s5 + $0x148] sm:$0xff]  ;;  %v3650_v11 = vld [vmem:[%s7421_s5 + $0x10] sm:$0xff] }
 0x389   : > { %3637 = vmatpush.msra.mxu0 %v2607_v37  ;;  %3735 = vmatpush.msra.mxu1 %v3659_v50  ;;  %v3141_v21 = vadd.f32 %v3140_v30, %v3121_v22  ;;  %v2821_v6 = vadd.f32 %v7006_v31, %v2801_v20  ;;  %v3710_v32 = vld [vmem:[%s7421_s5 + $0x1f0] sm:$0xff]  ;;  %v3180_v37 = vpop.f32.mrf.mxu0  ;;  %v3671_v50 = vld [vmem:[%s7421_s5 + $0xb8] sm:$0xff]  ;;  %v3684_v41 = vld [vmem:[%s7421_s5 + $0x120] sm:$0xff] }
 0x38a   : > { %3613 = vmatpush.msrb.mxu2 %v2547_v25  ;;  %3598 = vmatpush.msra.mxu3 %v2442_v36  ;;  %v2901_v27 = vadd.f32 %v6986_v24, %v2881_v39  ;;  %v2527_v24 = vld [vmem:[%s7419_s3 + $0x1448] sm:$0xff]  ;;  %v3200_v39 = vpop.f32.mrf.mxu2  ;;  %v3683_v63 = vld [vmem:[%s7421_s5 + $0x118] sm:$0xff]  ;;  %v3700_v20 = vld [vmem:[%s7421_s5 + $0x1a0] sm:$0xff] }
 0x38b   : > { %3638 = vmatpush.msra.mxu0 %v2602_v38  ;;  %3736 = vmatpush.msra.mxu1 %v3658_v43  ;;  %v3161_v31 = vadd.f32 %v3160_v1, %v3141_v21  ;;  %v2841_v25 = vadd.f32 %v6933_v3, %v2821_v6  ;;  %v3649_v36 = vld [vmem:[%s7421_s5 + $0x8] sm:$0xff]  ;;  %v3670_v38 = vld [vmem:[%s7421_s5 + $0xb0] sm:$0xff]  ;;  %v3703_v22 = vld [vmem:[%s7421_s5 + $0x1b8] sm:$0xff] }
 0x38c   : > { %3599 = vmatmul.f32.vlgmr.msra.gmra.mxu3 %v5238_v46  ;;  %3614 = vmatpush.msrb.mxu2 %v2542_v52  ;;  %v2532_v46 = vld [vmem:[%s7419_s3 + $0x1470] sm:$0xff]  ;;  %v2921_v14 = vadd.f32 %v7054_v59, %v2901_v27  ;;  %v3681_v12 = vld [vmem:[%s7421_s5 + $0x108] sm:$0xff]  ;;  %v3699_v21 = vld [vmem:[%s7421_s5 + $0x198] sm:$0xff] }
 0x38d   : > { %3751 = vmatpush.msrb.mxu0 %v3679_v54  ;;  %3771 = vmatpush.msrb.mxu3 %v3695_v9  ;;  %v3674_v59 = vld [vmem:[%s7421_s5 + $0xd0] sm:$0xff]  ;;  %v3181_v3 = vadd.f32 %v3180_v37, %v3161_v31  ;;  %v3643_v54 = vmax.f32 %v2841_v25, 0.0  ;;  %v3685_v9 = vld [vmem:[%s7421_s5 + $0x128] sm:$0xff] }
 0x38e   : > { %3737 = vmatpush.msra.mxu1 %v3657_v55  ;;  %3615 = vmatpush.msrb.mxu2 %v2537_v16  ;;  %v2941_v23 = vadd.f32 %v7083_v4, %v2921_v14  ;;  %v3651_v4 = vld [vmem:[%s7421_s5 + $0x18] sm:$0xff]  ;;  %v3686_v43 = vld [vmem:[%s7421_s5 + $0x130] sm:$0xff] }
 0x38f   : > { %3752 = vmatpush.msrb.mxu0 %v3678_v57  ;;  %3772 = vmatpush.msrb.mxu3 %v3694_v58  ;;  %v3707_v55 = vld [vmem:[%s7421_s5 + $0x1d8] sm:$0xff]  ;;  %v3668_v57 = vld [vmem:[%s7421_s5 + $0xa0] sm:$0xff]  ;;  %v3201_v58 = vadd.f32 %v3200_v39, %v3181_v3  ;;  %v3698_v1 = vld [vmem:[%s7421_s5 + $0x190] sm:$0xff] }
 0x390   : > { %3738 = vmatpush.msra.mxu1 %v3656_v62  ;;  %3616 = vmatpush.msrb.mxu2 %v2532_v46  ;;  %v2961_v35 = vadd.f32 %v7032_v48, %v2941_v23  ;;  %v3709_v48 = vld [vmem:[%s7421_s5 + $0x1e8] sm:$0xff]  ;;  %v3220_v16 = vpop.f32.mrf.mxu1  ;;  %v3240_v62 = vpop.f32.mrf.mxu3  ;;  %v3667_v46 = vld [vmem:[%s7421_s5 + $0x98] sm:$0xff] }
 0x391   : > { %3753 = vmatpush.msrb.mxu0 %v3677_v42  ;;  %3773 = vmatpush.msrb.mxu3 %v3693_v44  ;;  %v3221_v27 = vadd.f32 %v3220_v16, %v3201_v58  ;;  %v3705_v42 = vld [vmem:[%s7421_s5 + $0x1c8] sm:$0xff]  ;;  %v3682_v44 = vld [vmem:[%s7421_s5 + $0x110] sm:$0xff] }
 0x392   : > { %3739 = vmatpush.msra.mxu1 %v3655_v0  ;;  %3617 = vmatpush.msrb.mxu2 %v2527_v24  ;;  %v2981_v52 = vadd.f32 %v7056_v13, %v2961_v35  ;;  %v3704_v0 = vld [vmem:[%s7421_s5 + $0x1c0] sm:$0xff]  ;;  %v3721_v3 = vld [vmem:[%s7421_s5 + $0x248] sm:$0xff] }
 0x393   : > { %3754 = vmatpush.msrb.mxu0 %v3676_v2  ;;  %3774 = vmatpush.msrb.mxu3 %v3692_v17  ;;  %v3665_v2 = vld [vmem:[%s7421_s5 + $0x88] sm:$0xff]  ;;  %v3241_v17 = vadd.f32 %v3240_v62, %v3221_v27 }
 0x394   : > { %3740 = vmatpush.msra.mxu1 %v3654_v8  ;;  %3618 = vmatpush.msrb.mxu2 %v2522_v10  ;;  %v3001_v13 = vadd.f32 %v7114_v61, %v2981_v52  ;;  %v3680_v8 = vld [vmem:[%s7421_s5 + $0x100] sm:$0xff]  ;;  %v2633_v10 = vperm.slane %v7004_v29, 3  ;;  %v3718_v52 = vld [vmem:[%s7421_s5 + $0x230] sm:$0xff]  ;;  %v3717_v39 = vld [vmem:[%s7421_s5 + $0x228] sm:$0xff] }
 0x395   : > { %3755 = vmatpush.msrb.mxu0 %v3675_v33  ;;  %3775 = vmatpush.msrb.mxu3 %v3691_v15  ;;  %v3702_v33 = vld [vmem:[%s7421_s5 + $0x1b0] sm:$0xff]  ;;  %v3645_v15 = vmax.f32 %v3241_v17, 0.0  ;;  %v3713_v16 = vld [vmem:[%s7421_s5 + $0x208] sm:$0xff] }
 0x396   : > { %3619 = vmatmul.f32.vlgmr.msrb.gmra.mxu2 %v5381_v40  ;;  %3741 = vmatpush.msra.mxu1 %v3653_v18  ;;  %v3711_v40 = vld [vmem:[%s7421_s5 + $0x1f8] sm:$0xff]  ;;  %v3021_v61 = vadd.f32 %v7137_v34, %v3001_v13  ;;  %v3666_v34 = vld [vmem:[%s7421_s5 + $0x90] sm:$0xff]  ;;  %v3701_v18 = vld [vmem:[%s7421_s5 + $0x1a8] sm:$0xff] }
 0x397   : > { %3756 = vmatpush.msrb.mxu0 %v3674_v59  ;;  %3776 = vmatpush.msrb.mxu3 %v3690_v19  ;;  %v3714_v13 = vld [vmem:[%s7421_s5 + $0x210] sm:$0xff] }
 0x398   : > { %3742 = vmatpush.msra.mxu1 %v3652_v51  ;;  %3925 = vmatmul.msk.f32.vlgmr.msra.gmra.mxu0 %vm1818_vm1, %v5392_v45  ;;  %v3687_v45 = vld [vmem:[%s7421_s5 + $0x138] sm:$0xff]  ;;  %v3041_v24 = vadd.f32 %v7085_v5, %v3021_v61  ;;  %v3664_v5 = vld [vmem:[%s7421_s5 + $0x80] sm:$0xff] }
 0x399   : > { %3757 = vmatpush.msrb.mxu0 %v3673_v26  ;;  %3777 = vmatpush.msrb.mxu3 %v3689_v56  ;;  %v3697_v26 = vld [vmem:[%s7421_s5 + $0x188] sm:$0xff] }
 0x39a   : > { %3743 = vmatpush.msra.mxu1 %v3651_v4  ;;  %3791 = vmatpush.msra.mxu2 %v3711_v40  ;;  %v3644_v14 = vmax.f32 %v3041_v24, 0.0  ;;  %v3696_v4 = vld [vmem:[%s7421_s5 + $0x180] sm:$0xff] }
 0x39b   : > { %3758 = vmatpush.msrb.mxu0 %v3672_v7  ;;  %3778 = vmatpush.msrb.mxu3 %v3688_v28 }
 0x39c   : > { %3744 = vmatpush.msra.mxu1 %v3650_v11  ;;  %3792 = vmatpush.msra.mxu2 %v3710_v32 }
 0x39d   : > { %3759 = vmatpush.msrb.mxu0 %v3671_v50  ;;  %3779 = vmatpush.msrb.mxu3 %v3687_v45 }
 0x39e   : > { %3745 = vmatpush.msra.mxu1 %v3649_v36  ;;  %3793 = vmatpush.msra.mxu2 %v3709_v48 }
 0x39f   : > { %3760 = vmatpush.msrb.mxu0 %v3670_v38  ;;  %3780 = vmatpush.msrb.mxu3 %v3686_v43  ;;  %v3722_v43 = vld [vmem:[%s7421_s5 + $0x250] sm:$0xff] }
 0x3a0   : > { %3746 = vmatpush.msra.mxu1 %v3648_v47  ;;  %3794 = vmatpush.msra.mxu2 %v3708_v49  ;;  %v3720_v47 = vld [vmem:[%s7421_s5 + $0x240] sm:$0xff]  ;;  %v3719_v49 = vld [vmem:[%s7421_s5 + $0x238] sm:$0xff] }
 0x3a1   : > { %3747 = vmatmul.f32.vlgmr.msra.gmra.mxu1 %v3643_v54  ;;  %3761 = vmatpush.msrb.mxu0 %v3669_v53  ;;  %v3716_v53 = vld [vmem:[%s7421_s5 + $0x220] sm:$0xff]  ;;  %v3715_v54 = vld [vmem:[%s7421_s5 + $0x218] sm:$0xff] }
 0x3a2   : > { %3781 = vmatpush.msrb.mxu3 %v3685_v9  ;;  %3795 = vmatpush.msra.mxu2 %v3707_v55  ;;  %v2634_v9 = vperm.slane %v7004_v29, 4 }
 0x3a3   : > { %3762 = vmatpush.msrb.mxu0 %v3668_v57  ;;  %3816 = vmatpush.msrb.mxu1 %v3722_v43 }
 0x3a4   : > { %3782 = vmatpush.msrb.mxu3 %v3684_v41  ;;  %3796 = vmatpush.msra.mxu2 %v3706_v60  ;;  %v3712_v41 = vld [vmem:[%s7421_s5 + $0x200] sm:$0xff] }
 0x3a5   : > { %3763 = vmatpush.msrb.mxu0 %v3667_v46  ;;  %3817 = vmatpush.msrb.mxu1 %v3721_v3 }
 0x3a6   : > { %3783 = vmatpush.msrb.mxu3 %v3683_v63  ;;  %3797 = vmatpush.msra.mxu2 %v3705_v42  ;;  %v3260_v30 = vpop.f32.mrf.mxu3 }
 0x3a7   : > { %3764 = vmatpush.msrb.mxu0 %v3666_v34  ;;  %v3261_v59 = vadd.f32 %v3260_v30, %v2633_v10  ;;  %3818 = vmatpush.msrb.mxu1 %v3720_v47  ;;  %v3964_v10 = vld [vmem:[%s7422_s6] ss:$0 sm:$0xff] }
 0x3a8   : > { %3784 = vmatpush.msrb.mxu3 %v3682_v44  ;;  %3798 = vmatpush.msra.mxu2 %v3704_v0 }
 0x3a9   : > { %3765 = vmatpush.msrb.mxu0 %v3665_v2  ;;  %3819 = vmatpush.msrb.mxu1 %v3719_v49 }
 0x3aa   : > { %3785 = vmatpush.msrb.mxu3 %v3681_v12  ;;  %3799 = vmatpush.msra.mxu2 %v3703_v22  ;;  %v3280_v19 = vpop.f32.mrf.mxu0 }
 0x3ab   : > { %3766 = vmatpush.msrb.mxu0 %v3664_v5  ;;  %v3281_v51 = vadd.f32 %v3280_v19, %v3261_v59  ;;  %3820 = vmatpush.msrb.mxu1 %v3718_v52 }
 0x3ac   : > { %3786 = vmatpush.msrb.mxu3 %v3680_v8  ;;  %3767 = vmatmul.f32.vlgmr.msrb.gmra.mxu0 %v3644_v14 }
 0x3ad   : > { %3787 = vmatmul.f32.vlgmr.msrb.gmra.mxu3 %v3645_v15  ;;  %3800 = vmatpush.msra.mxu2 %v3702_v33 }
 0x3ae   : > { %3821 = vmatpush.msrb.mxu1 %v3717_v39 }
 0x3af   : > { %3801 = vmatpush.msra.mxu2 %v3701_v18 }
 0x3b0   : > { %v3300_v23 = vpop.f32.mrf.mxu2  ;;  %3822 = vmatpush.msrb.mxu1 %v3716_v53 }
 0x3b1   : > { %3802 = vmatpush.msra.mxu2 %v3700_v20  ;;  %v3301_v56 = vadd.f32 %v3300_v23, %v3281_v51 }
 0x3b2   : > { %3823 = vmatpush.msrb.mxu1 %v3715_v54 }
 0x3b3   : > { %3803 = vmatpush.msra.mxu2 %v3699_v21  ;;  %v3320_v6 = vpop.f32.mrf.mxu1 }
 0x3b4   : > { %v3321_v40 = vadd.f32 %v3320_v6, %v3301_v56  ;;  %3824 = vmatpush.msrb.mxu1 %v3714_v13 }
 0x3b5   : > { %3804 = vmatpush.msra.mxu2 %v3698_v1  ;;  %v3340_v7 = vpop.f32.mrf.mxu3 }
 0x3b6   : > { %v3341_v28 = vadd.f32 %v3340_v7, %v3321_v40  ;;  %3825 = vmatpush.msrb.mxu1 %v3713_v16 }
 0x3b7   : > { %3805 = vmatpush.msra.mxu2 %v3697_v26 }
 0x3b8   : > { %v3360_v31 = vpop.f32.mrf.mxu0  ;;  %3826 = vmatpush.msrb.mxu1 %v3712_v41 }
 0x3b9   : > { %3806 = vmatpush.msra.mxu2 %v3696_v4  ;;  %v3361_v11 = vadd.f32 %v3360_v31, %v3341_v28 }
 0x3ba   : > { %v3380_v32 = vpop.f32.mrf.mxu2 }
 0x3bb   : > { %v3381_v35 = vadd.f32 %v3380_v32, %v3361_v11 }
 0x3be   : > { %v3400_v37 = vpop.f32.mrf.mxu1 }
 0x3bf   : > { %v3401_v50 = vadd.f32 %v3400_v37, %v3381_v35 }
 0x3ca   : > { %v3420_v45 = vpop.f32.mrf.mxu3 }
 0x3cb   : > { %v3421_v25 = vadd.f32 %v3420_v45, %v3401_v50 }
 0x3cd   : > { %v3440_v36 = vpop.f32.mrf.mxu0 }
 0x3ce   : > { %v3441_v48 = vadd.f32 %v3440_v36, %v3421_v25 }
 0x3d0   : > { %v3646_v38 = vmax.f32 %v3441_v48, 0.0 }
 0x3d2   : > { %3807 = vmatmul.f32.vlgmr.msra.gmra.mxu2 %v3646_v38 }
 0x3f4   : > { %v3460_v55 = vpop.f32.mrf.mxu2 }
 0x3f5   : > { %v3461_v57 = vadd.f32 %v3460_v55, %v2634_v9 }
 0x3f7   : > { %v3480_v58 = vpop.f32.mrf.mxu0 }
 0x3f8   : > { %v3481_v29 = vadd.f32 %v3480_v58, %v3461_v57 }
 0x3fa   : > { %v3500_v60 = vpop.f32.mrf.mxu1 }
 0x3fb   : > { %v3501_v61 = vadd.f32 %v3500_v60, %v3481_v29  ;;  %v3520_v62 = vpop.f32.mrf.mxu3 }
 0x3fd   : > { %v3521_v46 = vadd.f32 %v3520_v62, %v3501_v61 }
 0x3fe   : > { %v3540_v27 = vpop.f32.mrf.mxu2 }
 0x3ff   : > { %v3541_v63 = vadd.f32 %v3540_v27, %v3521_v46 }
 0x402   : > { %v3560_v42 = vpop.f32.mrf.mxu0 }
 0x403   : > { %v3561_v34 = vadd.f32 %v3560_v42, %v3541_v63 }
 0x405   : > { %v3580_v44 = vpop.f32.mrf.mxu1 }
 0x406   : > { %v3581_v24 = vadd.f32 %v3580_v44, %v3561_v34 }
 0x40f   : > { %v3600_v0 = vpop.f32.mrf.mxu3 }
 0x410   : > { %v3601_v2 = vadd.f32 %v3600_v0, %v3581_v24 }
 0x415   : > { %v3640_v12 = vpop.f32.mrf.mxu0 }
 0x419   : > { %v3620_v17 = vpop.f32.mrf.mxu2 }
 0x41a   : > { %v3621_v22 = vadd.f32 %v3620_v17, %v3601_v2 }
 0x41c   : > { %v3641_v5 = vadd.f32 %v3640_v12, %v3621_v22 }
 0x41e   : > { %v3647_v8 = vmax.f32 %v3641_v5, 0.0  ;;  %v3748_v14 = vpop.f32.mrf.mxu1 }
 0x41f   : > { %v3749_v33 = vadd.f32 %v3964_v10, %v3748_v14 }
 0x420   : > { %3926 = vmatmul.msk.f32.vlgmr.msrb.gmra.mxu1 %vm3727_vm2, %v3647_v8 }
 0x429   : > { %v3768_v30 = vpop.f32.mrf.mxu0 }
 0x42a   : > { %v3769_v18 = vadd.f32 %v3768_v30, %v3749_v33 }
 0x430   : > { %v3788_v15 = vpop.f32.mrf.mxu3 }
 0x431   : > { %v3789_v19 = vadd.f32 %v3788_v15, %v3769_v18 }
 0x455   : > { %v3808_v59 = vpop.f32.mrf.mxu2 }
 0x456   : > { %v3809_v20 = vadd.f32 %v3808_v59, %v3789_v19 }
 0x49d   : > { %v3828_v21 = vpop.f32.mrf.mxu1 }
 0x49e   : > { %v3829_v51 = vadd.f32 %v3828_v21, %v3809_v20 }
 0x4a0   : > { %v3831_v23 = vmax.f32 %v3829_v51, 0.0 }
 0x4a2   : > { %3833 = vst.msk [vmem:[%s7423_s7] sm:$0xff] %vm3832_vm3, %v3831_v23 }
 0x4a3 PF: > { %s17_s26 = sadd.s32 1, %s3987_s26   ;;  %s7424_s24 = smov %s3983_s25 }
 0x4a4   : > { %p14_p8 = scmp.ge.s32.totalorder %s17_s26, 8   ;;  %s7425_s25 = smov %s7427_s27 }
 0x4a6   :  { %16 = sbr.rel (!%p14_p8) target bundleno = 2 (0x2), region = 89 }

</bundles_post_ra>
